<compile_context>
chip_gen: v7x
topology: tpu7x:2x2x1
jax: 0.10.0
libtpu: 0.0.40
codegen_flags: <defaults>
</compile_context>

<pallas_src>
import functools

import jax
import jax.numpy as jnp
import numpy as np
from jax import lax
from jax.experimental import pallas as pl
from jax.experimental.pallas import tpu as pltpu


# ------------------------------ fused kernel -------------------------------

def protonet_fused_kernel(x_ref, *refs, layer_dims, nb):
    """Runs all 4 ConvBlocks for a chunk of `nb` images, entirely in VMEM.

    x_ref       : (nb, H0, W0*C0)               lane-dense NHWC input rows
    refs[2l+0]  : (3, W_l*Cin_l, W_l*Cout_l)     banded conv weights (BN scale folded in)
    refs[2l+1]  : (1, W_l*Cout_l)                folded conv-bias + BN shift (tiled over W)
    refs[2L]    : (nb, H_L//2, (W_L//2)*Cout_L)  output ref
    refs[2L+1:] : per-layer VMEM scratch (nb, H_l+2, W_l*Cin_l) for height padding
    """
    n_w = 2 * len(layer_dims)
    o_ref = refs[n_w]
    pad_refs = refs[n_w + 1:]

    act = x_ref[...]                                                # (nb, H0, W0*C0)
    for l, (H, Wd, Cin, Cout) in enumerate(layer_dims):
        bw_ref = refs[2 * l]
        sh_ref = refs[2 * l + 1]
        pad_ref = pad_refs[l]
        wc_in = Wd * Cin
        wc_out = Wd * Cout

        # Height zero-padding in VMEM scratch (width padding is folded into bw):
        # only the two boundary rows need explicit zeros.
        pad_ref[:, 0:1, :] = jnp.zeros((nb, 1, wc_in), jnp.float32)
        pad_ref[:, H + 1:H + 2, :] = jnp.zeros((nb, 1, wc_in), jnp.float32)
        pad_ref[:, 1:H + 1, :] = act

        # Conv3x3 as 3 banded matmuls; dx taps + width padding + BN scale live in bw.
        acc = jnp.dot(act.reshape(nb * H, wc_in), bw_ref[1],
                      preferred_element_type=jnp.float32)           # center row (dy=1)
        acc = acc + jnp.dot(pad_ref[:, 0:H, :].reshape(nb * H, wc_in), bw_ref[0],
                            preferred_element_type=jnp.float32)     # row above (dy=0)
        acc = acc + jnp.dot(pad_ref[:, 2:H + 2, :].reshape(nb * H, wc_in), bw_ref[2],
                            preferred_element_type=jnp.float32)     # row below (dy=2)

        # Folded conv-bias + BatchNorm(eval) shift, then ReLU.
        y = jnp.maximum(acc + sh_ref[...], 0.0)                     # (nb*H, wc_out)

        # 2x2 max pool: rows via adjacent sublane pairs; columns via the two lane
        # halves (bw's output columns are permuted even-w-first), landing back in
        # natural (w, c) lane order for the next layer.
        y = y.reshape(nb, H // 2, 2, wc_out)
        y = jnp.maximum(y[:, :, 0, :], y[:, :, 1, :])               # (nb, H//2, wc_out)
        half = (Wd // 2) * Cout
        act = jnp.maximum(y[..., :half], y[..., half:])             # (nb, H//2, half)

    o_ref[...] = act.astype(o_ref.dtype)


# ------------------------- parameter construction -------------------------

def init_conv_block_params(key, in_ch, out_ch):
    kw, kb = jax.random.split(key)
    weight = 0.1 * jax.random.normal(kw, (out_ch, in_ch, 3, 3), jnp.float32)
    bias = 0.1 * jax.random.normal(kb, (out_ch,), jnp.float32)
    return dict(weight=weight, bias=bias,
                gamma=jnp.ones((out_ch,), jnp.float32),
                beta=jnp.zeros((out_ch,), jnp.float32),
                mean=jnp.zeros((out_ch,), jnp.float32),
                var=jnp.ones((out_ch,), jnp.float32))


def init_protonet_params(key, input_dim, hid_dim=64, z_dim=64):
    keys = jax.random.split(key, 4)
    dims = [(input_dim, hid_dim), (hid_dim, hid_dim), (hid_dim, hid_dim), (hid_dim, z_dim)]
    return [init_conv_block_params(k, ci, co) for k, (ci, co) in zip(keys, dims)]


def _banded_conv_weight(weight_oihw, Wd, scale=None):
    """(Cout,Cin,3,3) -> (3, Wd*Cin, Wd*Cout) banded matrices, one per kernel row dy.

    Folds the 3 dx taps, the width zero-padding and (optionally) the per-channel BN
    scale into the matrix; output columns are permuted even-w-first so the in-kernel
    2x2 pool reduces to a max of the two lane halves (and lands in natural (w, c)
    lane order).
    """
    w = np.transpose(np.asarray(weight_oihw, np.float32), (2, 3, 1, 0))  # (ky,kx,Cin,Cout)
    if scale is not None:
        w = w * np.asarray(scale, np.float32)[None, None, None, :]
    Cin, Cout = w.shape[2], w.shape[3]
    b = np.zeros((3, Wd * Cin, Wd, Cout), np.float32)
    for dy in range(3):
        for wo in range(Wd):
            for dx in range(3):
                wi = wo + dx - 1
                if 0 <= wi < Wd:
                    b[dy, wi * Cin:(wi + 1) * Cin, wo, :] = w[dy, dx]
    order = np.concatenate([np.arange(0, Wd, 2), np.arange(1, Wd, 2)])
    b = b[:, :, order, :].reshape(3, Wd * Cin, Wd * Cout)
    return jnp.asarray(b)


def prepare_fused_params(params, H, W, eps=1e-5):
    """Precompute per-layer (banded_weight_with_scale, shift) and static layer dims."""
    fused, layer_dims = [], []
    Hl, Wl = H, W
    for raw in params:
        Cout, Cin = raw["weight"].shape[0], raw["weight"].shape[1]
        s = np.asarray(raw["gamma"]) / np.sqrt(np.asarray(raw["var"]) + eps)
        shift = (np.asarray(raw["bias"]) - np.asarray(raw["mean"])) * s + np.asarray(raw["beta"])
        bw = _banded_conv_weight(raw["weight"], Wl, scale=s)
        shift_t = jnp.asarray(np.tile(shift, Wl).reshape(1, Wl * Cout), jnp.float32)
        fused.append((bw, shift_t))
        layer_dims.append((Hl, Wl, Cin, Cout))
        Hl, Wl = Hl // 2, Wl // 2
    return fused, tuple(layer_dims)


# ------------------------------ forward pass -------------------------------

def protonet_forward(x, fused_params, layer_dims):
    """x: (B, S, C, H, W) float32 (NCHW per sample).  Returns (B, S, feat)."""
    B, S, C, H, W = x.shape
    N = B * S
    # NCHW -> lane-dense NHWC rows (N, H, W*C); one tiny XLA transpose for the batch.
    t = x.reshape(N, C, H, W).transpose(0, 2, 3, 1).reshape(N, H, W * C)

    num_steps = 2 if (N % 2 == 0 and N >= 2) else 1
    nb = N // num_steps

    Hl, Wl, _, Co = layer_dims[-1]
    Ho, Wo = Hl // 2, Wl // 2

    in_specs = [pl.BlockSpec((nb, H, W * C), lambda s: (s, 0, 0))]
    flat_args = []
    for (Hd, Wd, Ci, Cc), (bw, sh) in zip(layer_dims, fused_params):
        in_specs.append(pl.BlockSpec((3, Wd * Ci, Wd * Cc), lambda s: (0, 0, 0)))
        in_specs.append(pl.BlockSpec((1, Wd * Cc), lambda s: (0, 0)))
        flat_args += [bw, sh]

    scratch_shapes = [pltpu.VMEM((nb, Hd + 2, Wd * Ci), jnp.float32)
                      for (Hd, Wd, Ci, Cc) in layer_dims]

    kernel = functools.partial(protonet_fused_kernel, layer_dims=layer_dims, nb=nb)
    out = pl.pallas_call(
        kernel,
        out_shape=jax.ShapeDtypeStruct((N, Ho, Wo * Co), jnp.float32),
        grid=(num_steps,),
        in_specs=in_specs,
        out_specs=pl.BlockSpec((nb, Ho, Wo * Co), lambda s: (s, 0, 0)),
        scratch_shapes=scratch_shapes,
        compiler_params=pltpu.CompilerParams(dimension_semantics=("parallel",)),
    )(t, *flat_args)

    # NHWC -> NCHW flatten, matching tmp.view(B, -1) in PyTorch (trivial: spatial is 1x1).
    feat = out.reshape(N, Ho, Wo, Co).transpose(0, 3, 1, 2).reshape(N, -1)
    return feat.reshape(B, S, -1)


# --------------------------- pure-JAX reference ----------------------------

def conv_block_ref(x_nhwc, raw, eps=1e-5):
    w_hwio = jnp.transpose(raw["weight"], (2, 3, 1, 0))
    y = lax.conv_general_dilated(
        x_nhwc, w_hwio, window_strides=(1, 1), padding=((1, 1), (1, 1)),
        dimension_numbers=("NHWC", "HWIO", "NHWC"))
    y = y + raw["bias"]
    y = (y - raw["mean"]) / jnp.sqrt(raw["var"] + eps) * raw["gamma"] + raw["beta"]
    y = jnp.maximum(y, 0.0)
    y = lax.reduce_window(y, -jnp.inf, lax.max, (1, 2, 2, 1), (1, 2, 2, 1), "VALID")
    return y


def protonet_forward_ref(x, params):
    B, S, C, H, W = x.shape
    t = x.reshape(B * S, C, H, W).transpose(0, 2, 3, 1)
    for p in params:
        t = conv_block_ref(t, p)
    t = t.transpose(0, 3, 1, 2)
    return t.reshape(B * S, -1).reshape(B, S, -1)


# ---------------------------------- main -----------------------------------

if __name__ == "__main__":
    key = jax.random.PRNGKey(0)
    kx, kp = jax.random.split(key)

    # Small shapes: batch=2, samples-per-batch=3, input_dim=4, spatial=16.
    B, S, C, H, W = 2, 3, 4, 16, 16
    hid_dim, z_dim = 32, 32

    x = jax.random.normal(kx, (B, S, C, H, W), jnp.float32)
    params = init_protonet_params(kp, input_dim=C, hid_dim=hid_dim, z_dim=z_dim)
    fused, layer_dims = prepare_fused_params(params, H, W)

    out = jax.block_until_ready(protonet_forward(x, fused, layer_dims))
    ref = jax.block_until_ready(protonet_forward_ref(x, params))

    assert out.shape == (B, S, z_dim), out.shape
    max_err = float(jnp.max(jnp.abs(out - ref)))
    assert jnp.allclose(out, ref, atol=2e-4, rtol=2e-4), max_err

    print("KERNEL_OK")
</pallas_src>

<mosaic_0001>
module attributes {stable_mosaic.version = 11 : i64} {
  func.func @protonet_fused_kernel(%arg0: i32, %arg1: memref<3x16x64xf32, #tpu.memory_space<vmem>>, %arg2: memref<3x64x512xf32, #tpu.memory_space<vmem>>, %arg3: memref<1x512xf32, #tpu.memory_space<vmem>>, %arg4: memref<3x256x256xf32, #tpu.memory_space<vmem>>, %arg5: memref<1x256xf32, #tpu.memory_space<vmem>>, %arg6: memref<3x128x128xf32, #tpu.memory_space<vmem>>, %arg7: memref<1x128xf32, #tpu.memory_space<vmem>>, %arg8: memref<3x64x64xf32, #tpu.memory_space<vmem>>, %arg9: memref<1x64xf32, #tpu.memory_space<vmem>>, %arg10: memref<3x1x32xf32, #tpu.memory_space<vmem>>, %arg11: memref<3x18x64xf32, #tpu.memory_space<vmem>>, %arg12: memref<3x10x256xf32, #tpu.memory_space<vmem>>, %arg13: memref<3x6x128xf32, #tpu.memory_space<vmem>>, %arg14: memref<3x4x64xf32, #tpu.memory_space<vmem>>) attributes {dimension_semantics = [#tpu.dimension_semantics<parallel>], iteration_bounds = array<i64: 2>, scalar_prefetch = 0 : i64, scratch_operands = 4 : i64, tpu.core_type = #tpu.core_type<tc>, window_params = [{transform_indices = @transform_0, window_bounds = array<i64: 3, 16, 64>}, {pipeline_mode = #tpu.pipeline_mode<synchronous>, transform_indices = @transform_1, window_bounds = array<i64: 3, 64, 512>}, {pipeline_mode = #tpu.pipeline_mode<synchronous>, transform_indices = @transform_2, window_bounds = array<i64: 1, 512>}, {pipeline_mode = #tpu.pipeline_mode<synchronous>, transform_indices = @transform_3, window_bounds = array<i64: 3, 256, 256>}, {pipeline_mode = #tpu.pipeline_mode<synchronous>, transform_indices = @transform_4, window_bounds = array<i64: 1, 256>}, {pipeline_mode = #tpu.pipeline_mode<synchronous>, transform_indices = @transform_5, window_bounds = array<i64: 3, 128, 128>}, {pipeline_mode = #tpu.pipeline_mode<synchronous>, transform_indices = @transform_6, window_bounds = array<i64: 1, 128>}, {pipeline_mode = #tpu.pipeline_mode<synchronous>, transform_indices = @transform_7, window_bounds = array<i64: 3, 64, 64>}, {pipeline_mode = #tpu.pipeline_mode<synchronous>, transform_indices = @transform_8, window_bounds = array<i64: 1, 64>}, {transform_indices = @transform_9, window_bounds = array<i64: 3, 1, 32>}]} {
    %c0 = arith.constant 0 : index
    %c0_0 = arith.constant 0 : index
    %c0_1 = arith.constant 0 : index
    %0 = vector.load %arg1[%c0, %c0_0, %c0_1] : memref<3x16x64xf32, #tpu.memory_space<vmem>>, vector<3x16x64xf32>
    %cst = arith.constant 0.000000e+00 : f32
    %1 = vector.broadcast %cst : f32 to vector<3x1x64xf32>
    %c0_2 = arith.constant 0 : index
    %c0_3 = arith.constant 0 : index
    %c0_4 = arith.constant 0 : index
    %2 = vector.load %arg11[%c0_2, %c0_3, %c0_4] : memref<3x18x64xf32, #tpu.memory_space<vmem>>, vector<3x1x64xf32>
    tpu.vector_store %arg11[%c0_2, %c0_3, %c0_4], %1 {strides = array<i32>} : memref<3x18x64xf32, #tpu.memory_space<vmem>>, vector<3x1x64xf32>,
    %cst_5 = arith.constant 0.000000e+00 : f32
    %3 = vector.broadcast %cst_5 : f32 to vector<3x1x64xf32>
    %c0_6 = arith.constant 0 : index
    %c17 = arith.constant 17 : index
    %c0_7 = arith.constant 0 : index
    %4 = vector.load %arg11[%c0_6, %c17, %c0_7] : memref<3x18x64xf32, #tpu.memory_space<vmem>>, vector<3x1x64xf32>
    tpu.vector_store %arg11[%c0_6, %c17, %c0_7], %3 {strides = array<i32>} : memref<3x18x64xf32, #tpu.memory_space<vmem>>, vector<3x1x64xf32>,
    %c0_8 = arith.constant 0 : index
    %c1 = arith.constant 1 : index
    %c0_9 = arith.constant 0 : index
    %5 = vector.load %arg11[%c0_8, %c1, %c0_9] : memref<3x18x64xf32, #tpu.memory_space<vmem>>, vector<3x16x64xf32>
    tpu.vector_store %arg11[%c0_8, %c1, %c0_9], %0 {strides = array<i32>} : memref<3x18x64xf32, #tpu.memory_space<vmem>>, vector<3x16x64xf32>,
    %6 = vector.shape_cast %0 : vector<3x16x64xf32> to vector<48x64xf32>
    %c1_10 = arith.constant 1 : index
    %c0_11 = arith.constant 0 : index
    %c0_12 = arith.constant 0 : index
    %7 = vector.load %arg2[%c1_10, %c0_11, %c0_12] : memref<3x64x512xf32, #tpu.memory_space<vmem>>, vector<1x64x512xf32>
    %8 = vector.shape_cast %7 : vector<1x64x512xf32> to vector<64x512xf32>
    %cst_13 = arith.constant dense<0.000000e+00> : vector<48x512xf32>
    %9 = tpu.matmul %6, %8, %cst_13 {dimension_numbers = #tpu.dot_dimension_numbers<[1], [0], [0], [1], [0, 0, 1, 1], [], []>} : vector<48x64xf32>, vector<64x512xf32>, vector<48x512xf32> -> vector<48x512xf32>
    %c0_14 = arith.constant 0 : index
    %c0_15 = arith.constant 0 : index
    %c0_16 = arith.constant 0 : index
    %10 = vector.load %arg11[%c0_14, %c0_15, %c0_16] : memref<3x18x64xf32, #tpu.memory_space<vmem>>, vector<3x16x64xf32>
    %11 = vector.shape_cast %10 : vector<3x16x64xf32> to vector<48x64xf32>
    %c0_17 = arith.constant 0 : index
    %c0_18 = arith.constant 0 : index
    %c0_19 = arith.constant 0 : index
    %12 = vector.load %arg2[%c0_17, %c0_18, %c0_19] : memref<3x64x512xf32, #tpu.memory_space<vmem>>, vector<1x64x512xf32>
    %13 = vector.shape_cast %12 : vector<1x64x512xf32> to vector<64x512xf32>
    %cst_20 = arith.constant dense<0.000000e+00> : vector<48x512xf32>
    %14 = tpu.matmul %11, %13, %cst_20 {dimension_numbers = #tpu.dot_dimension_numbers<[1], [0], [0], [1], [0, 0, 1, 1], [], []>} : vector<48x64xf32>, vector<64x512xf32>, vector<48x512xf32> -> vector<48x512xf32>
    %15 = arith.addf %9, %14 : vector<48x512xf32>
    %c0_21 = arith.constant 0 : index
    %c2 = arith.constant 2 : index
    %c0_22 = arith.constant 0 : index
    %16 = vector.load %arg11[%c0_21, %c2, %c0_22] : memref<3x18x64xf32, #tpu.memory_space<vmem>>, vector<3x16x64xf32>
    %17 = vector.shape_cast %16 : vector<3x16x64xf32> to vector<48x64xf32>
    %c2_23 = arith.constant 2 : index
    %c0_24 = arith.constant 0 : index
    %c0_25 = arith.constant 0 : index
    %18 = vector.load %arg2[%c2_23, %c0_24, %c0_25] : memref<3x64x512xf32, #tpu.memory_space<vmem>>, vector<1x64x512xf32>
    %19 = vector.shape_cast %18 : vector<1x64x512xf32> to vector<64x512xf32>
    %cst_26 = arith.constant dense<0.000000e+00> : vector<48x512xf32>
    %20 = tpu.matmul %17, %19, %cst_26 {dimension_numbers = #tpu.dot_dimension_numbers<[1], [0], [0], [1], [0, 0, 1, 1], [], []>} : vector<48x64xf32>, vector<64x512xf32>, vector<48x512xf32> -> vector<48x512xf32>
    %21 = arith.addf %15, %20 : vector<48x512xf32>
    %c0_27 = arith.constant 0 : index
    %c0_28 = arith.constant 0 : index
    %22 = vector.load %arg3[%c0_27, %c0_28] : memref<1x512xf32, #tpu.memory_space<vmem>>, vector<1x512xf32>
    %23 = vector.broadcast %22 : vector<1x512xf32> to vector<48x512xf32>
    %24 = arith.addf %21, %23 : vector<48x512xf32>
    %cst_29 = arith.constant 0.000000e+00 : f32
    %25 = vector.broadcast %cst_29 : f32 to vector<48x512xf32>
    %26 = arith.maximumf %24, %25 : vector<48x512xf32>
    %27 = vector.shape_cast %26 : vector<48x512xf32> to vector<3x8x2x512xf32>
    %28 = vector.extract_strided_slice %27 {offsets = [0, 0, 0, 0], sizes = [3, 8, 1, 512], strides = [1, 1, 1, 1]} : vector<3x8x2x512xf32> to vector<3x8x1x512xf32>
    %29 = vector.shape_cast %28 : vector<3x8x1x512xf32> to vector<3x8x512xf32>
    %30 = vector.extract_strided_slice %27 {offsets = [0, 0, 1, 0], sizes = [3, 8, 1, 512], strides = [1, 1, 1, 1]} : vector<3x8x2x512xf32> to vector<3x8x1x512xf32>
    %31 = vector.shape_cast %30 : vector<3x8x1x512xf32> to vector<3x8x512xf32>
    %32 = arith.maximumf %29, %31 : vector<3x8x512xf32>
    %33 = vector.extract_strided_slice %32 {offsets = [0, 0, 0], sizes = [3, 8, 256], strides = [1, 1, 1]} : vector<3x8x512xf32> to vector<3x8x256xf32>
    %34 = vector.extract_strided_slice %32 {offsets = [0, 0, 256], sizes = [3, 8, 256], strides = [1, 1, 1]} : vector<3x8x512xf32> to vector<3x8x256xf32>
    %35 = arith.maximumf %33, %34 : vector<3x8x256xf32>
    %cst_30 = arith.constant 0.000000e+00 : f32
    %36 = vector.broadcast %cst_30 : f32 to vector<3x1x256xf32>
    %c0_31 = arith.constant 0 : index
    %c0_32 = arith.constant 0 : index
    %c0_33 = arith.constant 0 : index
    %37 = vector.load %arg12[%c0_31, %c0_32, %c0_33] : memref<3x10x256xf32, #tpu.memory_space<vmem>>, vector<3x1x256xf32>
    tpu.vector_store %arg12[%c0_31, %c0_32, %c0_33], %36 {strides = array<i32>} : memref<3x10x256xf32, #tpu.memory_space<vmem>>, vector<3x1x256xf32>,
    %cst_34 = arith.constant 0.000000e+00 : f32
    %38 = vector.broadcast %cst_34 : f32 to vector<3x1x256xf32>
    %c0_35 = arith.constant 0 : index
    %c9 = arith.constant 9 : index
    %c0_36 = arith.constant 0 : index
    %39 = vector.load %arg12[%c0_35, %c9, %c0_36] : memref<3x10x256xf32, #tpu.memory_space<vmem>>, vector<3x1x256xf32>
    tpu.vector_store %arg12[%c0_35, %c9, %c0_36], %38 {strides = array<i32>} : memref<3x10x256xf32, #tpu.memory_space<vmem>>, vector<3x1x256xf32>,
    %c0_37 = arith.constant 0 : index
    %c1_38 = arith.constant 1 : index
    %c0_39 = arith.constant 0 : index
    %40 = vector.load %arg12[%c0_37, %c1_38, %c0_39] : memref<3x10x256xf32, #tpu.memory_space<vmem>>, vector<3x8x256xf32>
    tpu.vector_store %arg12[%c0_37, %c1_38, %c0_39], %35 {strides = array<i32>} : memref<3x10x256xf32, #tpu.memory_space<vmem>>, vector<3x8x256xf32>,
    %41 = vector.shape_cast %35 : vector<3x8x256xf32> to vector<24x256xf32>
    %c1_40 = arith.constant 1 : index
    %c0_41 = arith.constant 0 : index
    %c0_42 = arith.constant 0 : index
    %42 = vector.load %arg4[%c1_40, %c0_41, %c0_42] : memref<3x256x256xf32, #tpu.memory_space<vmem>>, vector<1x256x256xf32>
    %43 = vector.shape_cast %42 : vector<1x256x256xf32> to vector<256x256xf32>
    %cst_43 = arith.constant dense<0.000000e+00> : vector<24x256xf32>
    %44 = tpu.matmul %41, %43, %cst_43 {dimension_numbers = #tpu.dot_dimension_numbers<[1], [0], [0], [1], [0, 0, 1, 1], [], []>} : vector<24x256xf32>, vector<256x256xf32>, vector<24x256xf32> -> vector<24x256xf32>
    %c0_44 = arith.constant 0 : index
    %c0_45 = arith.constant 0 : index
    %c0_46 = arith.constant 0 : index
    %45 = vector.load %arg12[%c0_44, %c0_45, %c0_46] : memref<3x10x256xf32, #tpu.memory_space<vmem>>, vector<3x8x256xf32>
    %46 = vector.shape_cast %45 : vector<3x8x256xf32> to vector<24x256xf32>
    %c0_47 = arith.constant 0 : index
    %c0_48 = arith.constant 0 : index
    %c0_49 = arith.constant 0 : index
    %47 = vector.load %arg4[%c0_47, %c0_48, %c0_49] : memref<3x256x256xf32, #tpu.memory_space<vmem>>, vector<1x256x256xf32>
    %48 = vector.shape_cast %47 : vector<1x256x256xf32> to vector<256x256xf32>
    %cst_50 = arith.constant dense<0.000000e+00> : vector<24x256xf32>
    %49 = tpu.matmul %46, %48, %cst_50 {dimension_numbers = #tpu.dot_dimension_numbers<[1], [0], [0], [1], [0, 0, 1, 1], [], []>} : vector<24x256xf32>, vector<256x256xf32>, vector<24x256xf32> -> vector<24x256xf32>
    %50 = arith.addf %44, %49 : vector<24x256xf32>
    %c0_51 = arith.constant 0 : index
    %c2_52 = arith.constant 2 : index
    %c0_53 = arith.constant 0 : index
    %51 = vector.load %arg12[%c0_51, %c2_52, %c0_53] : memref<3x10x256xf32, #tpu.memory_space<vmem>>, vector<3x8x256xf32>
    %52 = vector.shape_cast %51 : vector<3x8x256xf32> to vector<24x256xf32>
    %c2_54 = arith.constant 2 : index
    %c0_55 = arith.constant 0 : index
    %c0_56 = arith.constant 0 : index
    %53 = vector.load %arg4[%c2_54, %c0_55, %c0_56] : memref<3x256x256xf32, #tpu.memory_space<vmem>>, vector<1x256x256xf32>
    %54 = vector.shape_cast %53 : vector<1x256x256xf32> to vector<256x256xf32>
    %cst_57 = arith.constant dense<0.000000e+00> : vector<24x256xf32>
    %55 = tpu.matmul %52, %54, %cst_57 {dimension_numbers = #tpu.dot_dimension_numbers<[1], [0], [0], [1], [0, 0, 1, 1], [], []>} : vector<24x256xf32>, vector<256x256xf32>, vector<24x256xf32> -> vector<24x256xf32>
    %56 = arith.addf %50, %55 : vector<24x256xf32>
    %c0_58 = arith.constant 0 : index
    %c0_59 = arith.constant 0 : index
    %57 = vector.load %arg5[%c0_58, %c0_59] : memref<1x256xf32, #tpu.memory_space<vmem>>, vector<1x256xf32>
    %58 = vector.broadcast %57 : vector<1x256xf32> to vector<24x256xf32>
    %59 = arith.addf %56, %58 : vector<24x256xf32>
    %cst_60 = arith.constant 0.000000e+00 : f32
    %60 = vector.broadcast %cst_60 : f32 to vector<24x256xf32>
    %61 = arith.maximumf %59, %60 : vector<24x256xf32>
    %62 = vector.shape_cast %61 : vector<24x256xf32> to vector<3x4x2x256xf32>
    %63 = vector.extract_strided_slice %62 {offsets = [0, 0, 0, 0], sizes = [3, 4, 1, 256], strides = [1, 1, 1, 1]} : vector<3x4x2x256xf32> to vector<3x4x1x256xf32>
    %64 = vector.shape_cast %63 : vector<3x4x1x256xf32> to vector<3x4x256xf32>
    %65 = vector.extract_strided_slice %62 {offsets = [0, 0, 1, 0], sizes = [3, 4, 1, 256], strides = [1, 1, 1, 1]} : vector<3x4x2x256xf32> to vector<3x4x1x256xf32>
    %66 = vector.shape_cast %65 : vector<3x4x1x256xf32> to vector<3x4x256xf32>
    %67 = arith.maximumf %64, %66 : vector<3x4x256xf32>
    %68 = vector.extract_strided_slice %67 {offsets = [0, 0, 0], sizes = [3, 4, 128], strides = [1, 1, 1]} : vector<3x4x256xf32> to vector<3x4x128xf32>
    %69 = vector.extract_strided_slice %67 {offsets = [0, 0, 128], sizes = [3, 4, 128], strides = [1, 1, 1]} : vector<3x4x256xf32> to vector<3x4x128xf32>
    %70 = arith.maximumf %68, %69 : vector<3x4x128xf32>
    %cst_61 = arith.constant 0.000000e+00 : f32
    %71 = vector.broadcast %cst_61 : f32 to vector<3x1x128xf32>
    %c0_62 = arith.constant 0 : index
    %c0_63 = arith.constant 0 : index
    %c0_64 = arith.constant 0 : index
    %72 = vector.load %arg13[%c0_62, %c0_63, %c0_64] : memref<3x6x128xf32, #tpu.memory_space<vmem>>, vector<3x1x128xf32>
    tpu.vector_store %arg13[%c0_62, %c0_63, %c0_64], %71 {strides = array<i32>} : memref<3x6x128xf32, #tpu.memory_space<vmem>>, vector<3x1x128xf32>,
    %cst_65 = arith.constant 0.000000e+00 : f32
    %73 = vector.broadcast %cst_65 : f32 to vector<3x1x128xf32>
    %c0_66 = arith.constant 0 : index
    %c5 = arith.constant 5 : index
    %c0_67 = arith.constant 0 : index
    %74 = vector.load %arg13[%c0_66, %c5, %c0_67] : memref<3x6x128xf32, #tpu.memory_space<vmem>>, vector<3x1x128xf32>
    tpu.vector_store %arg13[%c0_66, %c5, %c0_67], %73 {strides = array<i32>} : memref<3x6x128xf32, #tpu.memory_space<vmem>>, vector<3x1x128xf32>,
    %c0_68 = arith.constant 0 : index
    %c1_69 = arith.constant 1 : index
    %c0_70 = arith.constant 0 : index
    %75 = vector.load %arg13[%c0_68, %c1_69, %c0_70] : memref<3x6x128xf32, #tpu.memory_space<vmem>>, vector<3x4x128xf32>
    tpu.vector_store %arg13[%c0_68, %c1_69, %c0_70], %70 {strides = array<i32>} : memref<3x6x128xf32, #tpu.memory_space<vmem>>, vector<3x4x128xf32>,
    %76 = vector.shape_cast %70 : vector<3x4x128xf32> to vector<12x128xf32>
    %c1_71 = arith.constant 1 : index
    %c0_72 = arith.constant 0 : index
    %c0_73 = arith.constant 0 : index
    %77 = vector.load %arg6[%c1_71, %c0_72, %c0_73] : memref<3x128x128xf32, #tpu.memory_space<vmem>>, vector<1x128x128xf32>
    %78 = vector.shape_cast %77 : vector<1x128x128xf32> to vector<128x128xf32>
    %cst_74 = arith.constant dense<0.000000e+00> : vector<12x128xf32>
    %79 = tpu.matmul %76, %78, %cst_74 {dimension_numbers = #tpu.dot_dimension_numbers<[1], [0], [0], [1], [0, 0, 1, 1], [], []>} : vector<12x128xf32>, vector<128x128xf32>, vector<12x128xf32> -> vector<12x128xf32>
    %c0_75 = arith.constant 0 : index
    %c0_76 = arith.constant 0 : index
    %c0_77 = arith.constant 0 : index
    %80 = vector.load %arg13[%c0_75, %c0_76, %c0_77] : memref<3x6x128xf32, #tpu.memory_space<vmem>>, vector<3x4x128xf32>
    %81 = vector.shape_cast %80 : vector<3x4x128xf32> to vector<12x128xf32>
    %c0_78 = arith.constant 0 : index
    %c0_79 = arith.constant 0 : index
    %c0_80 = arith.constant 0 : index
    %82 = vector.load %arg6[%c0_78, %c0_79, %c0_80] : memref<3x128x128xf32, #tpu.memory_space<vmem>>, vector<1x128x128xf32>
    %83 = vector.shape_cast %82 : vector<1x128x128xf32> to vector<128x128xf32>
    %cst_81 = arith.constant dense<0.000000e+00> : vector<12x128xf32>
    %84 = tpu.matmul %81, %83, %cst_81 {dimension_numbers = #tpu.dot_dimension_numbers<[1], [0], [0], [1], [0, 0, 1, 1], [], []>} : vector<12x128xf32>, vector<128x128xf32>, vector<12x128xf32> -> vector<12x128xf32>
    %85 = arith.addf %79, %84 : vector<12x128xf32>
    %c0_82 = arith.constant 0 : index
    %c2_83 = arith.constant 2 : index
    %c0_84 = arith.constant 0 : index
    %86 = vector.load %arg13[%c0_82, %c2_83, %c0_84] : memref<3x6x128xf32, #tpu.memory_space<vmem>>, vector<3x4x128xf32>
    %87 = vector.shape_cast %86 : vector<3x4x128xf32> to vector<12x128xf32>
    %c2_85 = arith.constant 2 : index
    %c0_86 = arith.constant 0 : index
    %c0_87 = arith.constant 0 : index
    %88 = vector.load %arg6[%c2_85, %c0_86, %c0_87] : memref<3x128x128xf32, #tpu.memory_space<vmem>>, vector<1x128x128xf32>
    %89 = vector.shape_cast %88 : vector<1x128x128xf32> to vector<128x128xf32>
    %cst_88 = arith.constant dense<0.000000e+00> : vector<12x128xf32>
    %90 = tpu.matmul %87, %89, %cst_88 {dimension_numbers = #tpu.dot_dimension_numbers<[1], [0], [0], [1], [0, 0, 1, 1], [], []>} : vector<12x128xf32>, vector<128x128xf32>, vector<12x128xf32> -> vector<12x128xf32>
    %91 = arith.addf %85, %90 : vector<12x128xf32>
    %c0_89 = arith.constant 0 : index
    %c0_90 = arith.constant 0 : index
    %92 = vector.load %arg7[%c0_89, %c0_90] : memref<1x128xf32, #tpu.memory_space<vmem>>, vector<1x128xf32>
    %93 = vector.broadcast %92 : vector<1x128xf32> to vector<12x128xf32>
    %94 = arith.addf %91, %93 : vector<12x128xf32>
    %cst_91 = arith.constant 0.000000e+00 : f32
    %95 = vector.broadcast %cst_91 : f32 to vector<12x128xf32>
    %96 = arith.maximumf %94, %95 : vector<12x128xf32>
    %97 = vector.shape_cast %96 : vector<12x128xf32> to vector<3x2x2x128xf32>
    %98 = vector.extract_strided_slice %97 {offsets = [0, 0, 0, 0], sizes = [3, 2, 1, 128], strides = [1, 1, 1, 1]} : vector<3x2x2x128xf32> to vector<3x2x1x128xf32>
    %99 = vector.shape_cast %98 : vector<3x2x1x128xf32> to vector<3x2x128xf32>
    %100 = vector.extract_strided_slice %97 {offsets = [0, 0, 1, 0], sizes = [3, 2, 1, 128], strides = [1, 1, 1, 1]} : vector<3x2x2x128xf32> to vector<3x2x1x128xf32>
    %101 = vector.shape_cast %100 : vector<3x2x1x128xf32> to vector<3x2x128xf32>
    %102 = arith.maximumf %99, %101 : vector<3x2x128xf32>
    %103 = vector.extract_strided_slice %102 {offsets = [0, 0, 0], sizes = [3, 2, 64], strides = [1, 1, 1]} : vector<3x2x128xf32> to vector<3x2x64xf32>
    %104 = vector.extract_strided_slice %102 {offsets = [0, 0, 64], sizes = [3, 2, 64], strides = [1, 1, 1]} : vector<3x2x128xf32> to vector<3x2x64xf32>
    %105 = arith.maximumf %103, %104 : vector<3x2x64xf32>
    %cst_92 = arith.constant 0.000000e+00 : f32
    %106 = vector.broadcast %cst_92 : f32 to vector<3x1x64xf32>
    %c0_93 = arith.constant 0 : index
    %c0_94 = arith.constant 0 : index
    %c0_95 = arith.constant 0 : index
    %107 = vector.load %arg14[%c0_93, %c0_94, %c0_95] : memref<3x4x64xf32, #tpu.memory_space<vmem>>, vector<3x1x64xf32>
    tpu.vector_store %arg14[%c0_93, %c0_94, %c0_95], %106 {strides = array<i32>} : memref<3x4x64xf32, #tpu.memory_space<vmem>>, vector<3x1x64xf32>,
    %cst_96 = arith.constant 0.000000e+00 : f32
    %108 = vector.broadcast %cst_96 : f32 to vector<3x1x64xf32>
    %c0_97 = arith.constant 0 : index
    %c3 = arith.constant 3 : index
    %c0_98 = arith.constant 0 : index
    %109 = vector.load %arg14[%c0_97, %c3, %c0_98] : memref<3x4x64xf32, #tpu.memory_space<vmem>>, vector<3x1x64xf32>
    tpu.vector_store %arg14[%c0_97, %c3, %c0_98], %108 {strides = array<i32>} : memref<3x4x64xf32, #tpu.memory_space<vmem>>, vector<3x1x64xf32>,
    %c0_99 = arith.constant 0 : index
    %c1_100 = arith.constant 1 : index
    %c0_101 = arith.constant 0 : index
    %110 = vector.load %arg14[%c0_99, %c1_100, %c0_101] : memref<3x4x64xf32, #tpu.memory_space<vmem>>, vector<3x2x64xf32>
    tpu.vector_store %arg14[%c0_99, %c1_100, %c0_101], %105 {strides = array<i32>} : memref<3x4x64xf32, #tpu.memory_space<vmem>>, vector<3x2x64xf32>,
    %111 = vector.shape_cast %105 : vector<3x2x64xf32> to vector<6x64xf32>
    %c1_102 = arith.constant 1 : index
    %c0_103 = arith.constant 0 : index
    %c0_104 = arith.constant 0 : index
    %112 = vector.load %arg8[%c1_102, %c0_103, %c0_104] : memref<3x64x64xf32, #tpu.memory_space<vmem>>, vector<1x64x64xf32>
    %113 = vector.shape_cast %112 : vector<1x64x64xf32> to vector<64x64xf32>
    %cst_105 = arith.constant dense<0.000000e+00> : vector<6x64xf32>
    %114 = tpu.matmul %111, %113, %cst_105 {dimension_numbers = #tpu.dot_dimension_numbers<[1], [0], [0], [1], [0, 0, 1, 1], [], []>} : vector<6x64xf32>, vector<64x64xf32>, vector<6x64xf32> -> vector<6x64xf32>
    %c0_106 = arith.constant 0 : index
    %c0_107 = arith.constant 0 : index
    %c0_108 = arith.constant 0 : index
    %115 = vector.load %arg14[%c0_106, %c0_107, %c0_108] : memref<3x4x64xf32, #tpu.memory_space<vmem>>, vector<3x2x64xf32>
    %116 = vector.shape_cast %115 : vector<3x2x64xf32> to vector<6x64xf32>
    %c0_109 = arith.constant 0 : index
    %c0_110 = arith.constant 0 : index
    %c0_111 = arith.constant 0 : index
    %117 = vector.load %arg8[%c0_109, %c0_110, %c0_111] : memref<3x64x64xf32, #tpu.memory_space<vmem>>, vector<1x64x64xf32>
    %118 = vector.shape_cast %117 : vector<1x64x64xf32> to vector<64x64xf32>
    %cst_112 = arith.constant dense<0.000000e+00> : vector<6x64xf32>
    %119 = tpu.matmul %116, %118, %cst_112 {dimension_numbers = #tpu.dot_dimension_numbers<[1], [0], [0], [1], [0, 0, 1, 1], [], []>} : vector<6x64xf32>, vector<64x64xf32>, vector<6x64xf32> -> vector<6x64xf32>
    %120 = arith.addf %114, %119 : vector<6x64xf32>
    %c0_113 = arith.constant 0 : index
    %c2_114 = arith.constant 2 : index
    %c0_115 = arith.constant 0 : index
    %121 = vector.load %arg14[%c0_113, %c2_114, %c0_115] : memref<3x4x64xf32, #tpu.memory_space<vmem>>, vector<3x2x64xf32>
    %122 = vector.shape_cast %121 : vector<3x2x64xf32> to vector<6x64xf32>
    %c2_116 = arith.constant 2 : index
    %c0_117 = arith.constant 0 : index
    %c0_118 = arith.constant 0 : index
    %123 = vector.load %arg8[%c2_116, %c0_117, %c0_118] : memref<3x64x64xf32, #tpu.memory_space<vmem>>, vector<1x64x64xf32>
    %124 = vector.shape_cast %123 : vector<1x64x64xf32> to vector<64x64xf32>
    %cst_119 = arith.constant dense<0.000000e+00> : vector<6x64xf32>
    %125 = tpu.matmul %122, %124, %cst_119 {dimension_numbers = #tpu.dot_dimension_numbers<[1], [0], [0], [1], [0, 0, 1, 1], [], []>} : vector<6x64xf32>, vector<64x64xf32>, vector<6x64xf32> -> vector<6x64xf32>
    %126 = arith.addf %120, %125 : vector<6x64xf32>
    %c0_120 = arith.constant 0 : index
    %c0_121 = arith.constant 0 : index
    %127 = vector.load %arg9[%c0_120, %c0_121] : memref<1x64xf32, #tpu.memory_space<vmem>>, vector<1x64xf32>
    %128 = vector.broadcast %127 : vector<1x64xf32> to vector<6x64xf32>
    %129 = arith.addf %126, %128 : vector<6x64xf32>
    %cst_122 = arith.constant 0.000000e+00 : f32
    %130 = vector.broadcast %cst_122 : f32 to vector<6x64xf32>
    %131 = arith.maximumf %129, %130 : vector<6x64xf32>
    %132 = vector.shape_cast %131 : vector<6x64xf32> to vector<3x1x2x64xf32>
    %133 = vector.extract_strided_slice %132 {offsets = [0, 0, 0, 0], sizes = [3, 1, 1, 64], strides = [1, 1, 1, 1]} : vector<3x1x2x64xf32> to vector<3x1x1x64xf32>
    %134 = vector.shape_cast %133 : vector<3x1x1x64xf32> to vector<3x1x64xf32>
    %135 = vector.extract_strided_slice %132 {offsets = [0, 0, 1, 0], sizes = [3, 1, 1, 64], strides = [1, 1, 1, 1]} : vector<3x1x2x64xf32> to vector<3x1x1x64xf32>
    %136 = vector.shape_cast %135 : vector<3x1x1x64xf32> to vector<3x1x64xf32>
    %137 = arith.maximumf %134, %136 : vector<3x1x64xf32>
    %138 = vector.extract_strided_slice %137 {offsets = [0, 0, 0], sizes = [3, 1, 32], strides = [1, 1, 1]} : vector<3x1x64xf32> to vector<3x1x32xf32>
    %139 = vector.extract_strided_slice %137 {offsets = [0, 0, 32], sizes = [3, 1, 32], strides = [1, 1, 1]} : vector<3x1x64xf32> to vector<3x1x32xf32>
    %140 = arith.maximumf %138, %139 : vector<3x1x32xf32>
    %c0_123 = arith.constant 0 : index
    %c0_124 = arith.constant 0 : index
    %c0_125 = arith.constant 0 : index
    %141 = vector.load %arg10[%c0_123, %c0_124, %c0_125] : memref<3x1x32xf32, #tpu.memory_space<vmem>>, vector<3x1x32xf32>
    tpu.vector_store %arg10[%c0_123, %c0_124, %c0_125], %140 {strides = array<i32>} : memref<3x1x32xf32, #tpu.memory_space<vmem>>, vector<3x1x32xf32>,
    return
  }
  func.func @transform_0(%arg0: i32) -> (i32, i32, i32) {
    %c0_i32 = arith.constant 0 : i32
    %c0_i32_0 = arith.constant 0 : i32
    %c0_i32_1 = arith.constant 0 : i32
    return %arg0, %c0_i32, %c0_i32_0 : i32, i32, i32
  }
  func.func @transform_1(%arg0: i32) -> (i32, i32, i32) {
    %c0_i32 = arith.constant 0 : i32
    %c0_i32_0 = arith.constant 0 : i32
    %c0_i32_1 = arith.constant 0 : i32
    %c0_i32_2 = arith.constant 0 : i32
    return %c0_i32, %c0_i32_0, %c0_i32_1 : i32, i32, i32
  }
  func.func @transform_2(%arg0: i32) -> (i32, i32) {
    %c0_i32 = arith.constant 0 : i32
    %c0_i32_0 = arith.constant 0 : i32
    %c0_i32_1 = arith.constant 0 : i32
    return %c0_i32, %c0_i32_0 : i32, i32
  }
  func.func @transform_3(%arg0: i32) -> (i32, i32, i32) {
    %c0_i32 = arith.constant 0 : i32
    %c0_i32_0 = arith.constant 0 : i32
    %c0_i32_1 = arith.constant 0 : i32
    %c0_i32_2 = arith.constant 0 : i32
    return %c0_i32, %c0_i32_0, %c0_i32_1 : i32, i32, i32
  }
  func.func @transform_4(%arg0: i32) -> (i32, i32) {
    %c0_i32 = arith.constant 0 : i32
    %c0_i32_0 = arith.constant 0 : i32
    %c0_i32_1 = arith.constant 0 : i32
    return %c0_i32, %c0_i32_0 : i32, i32
  }
  func.func @transform_5(%arg0: i32) -> (i32, i32, i32) {
    %c0_i32 = arith.constant 0 : i32
    %c0_i32_0 = arith.constant 0 : i32
    %c0_i32_1 = arith.constant 0 : i32
    %c0_i32_2 = arith.constant 0 : i32
    return %c0_i32, %c0_i32_0, %c0_i32_1 : i32, i32, i32
  }
  func.func @transform_6(%arg0: i32) -> (i32, i32) {
    %c0_i32 = arith.constant 0 : i32
    %c0_i32_0 = arith.constant 0 : i32
    %c0_i32_1 = arith.constant 0 : i32
    return %c0_i32, %c0_i32_0 : i32, i32
  }
  func.func @transform_7(%arg0: i32) -> (i32, i32, i32) {
    %c0_i32 = arith.constant 0 : i32
    %c0_i32_0 = arith.constant 0 : i32
    %c0_i32_1 = arith.constant 0 : i32
    %c0_i32_2 = arith.constant 0 : i32
    return %c0_i32, %c0_i32_0, %c0_i32_1 : i32, i32, i32
  }
  func.func @transform_8(%arg0: i32) -> (i32, i32) {
    %c0_i32 = arith.constant 0 : i32
    %c0_i32_0 = arith.constant 0 : i32
    %c0_i32_1 = arith.constant 0 : i32
    return %c0_i32, %c0_i32_0 : i32, i32
  }
  func.func @transform_9(%arg0: i32) -> (i32, i32, i32) {
    %c0_i32 = arith.constant 0 : i32
    %c0_i32_0 = arith.constant 0 : i32
    %c0_i32_1 = arith.constant 0 : i32
    return %arg0, %c0_i32, %c0_i32_0 : i32, i32, i32
  }
}

</mosaic_0001>

<bundles_post_ra>
// kernel: tpu_custom_call.1
= control target key start
LH: loop header
LB: loop body
LE: loop exit
PB: predicated region body
PF: predicated region fallthrough
CT: control target
= control target key end

     0   :  { %s6240_s0 = inlined_call_operand.hbm [shape: f32[6,16,64], index: 0, kind: input, shape index: {}]   ;;  %s6241_s1 = inlined_call_operand.hbm [shape: f32[3,64,512], index: 1, kind: input, shape index: {}]   ;;  %s6242_s2 = inlined_call_operand.vmem [shape: f32[1,512], index: 2, kind: input, shape index: {}]   ;;  %s6243_s3 = inlined_call_operand.hbm [shape: f32[3,256,256], index: 3, kind: input, shape index: {}]   ;;  %s6244_s4 = inlined_call_operand.vmem [shape: f32[1,256], index: 4, kind: input, shape index: {}]   ;;  %s6245_s5 = inlined_call_operand.hbm [shape: f32[3,128,128], index: 5, kind: input, shape index: {}]   ;;  %s6246_s6 = inlined_call_operand.vmem [shape: f32[1,128], index: 6, kind: input, shape index: {}]   ;;  %s6247_s7 = inlined_call_operand.hbm [shape: f32[3,64,64], index: 7, kind: input, shape index: {}]   ;;  %s6248_s8 = inlined_call_operand.vmem [shape: f32[1,64], index: 8, kind: input, shape index: {}]   ;;  %s6249_s9 = inlined_call_operand.hbm [shape: f32[6,1,32], index: 9, kind: output, shape index: {}]  }
   0x1   :  { %6293 = sst [smem:[#allocation53_spill]] %s6241_s1 }
   0x2   :  { %6294 = sst [smem:[#allocation54_spill]] %s6243_s3 }
   0x3   :  { %6295 = sst [smem:[#allocation55_spill]] %s6245_s5 }
   0x4   :  { %14 = vsyncpa [#allocation7], 0 }
   0x5   :  { %16 = vsyncpa [#allocation7 + $0x1], 0 }
   0x6   :  { %17 = vsyncpa [#allocation10], 0 }
   0x7   :  { %18 = vsyncpa [#allocation13], 0 }
   0x8   :  { %19 = vsyncpa [#allocation8], 0 }
   0x9   :  { %21 = vsyncpa [#allocation8 + $0x1], 0  ;;  %s5031_s30 = smov 0   ;;  %s5033_s10 = smov 0  }
   0xa   :  { %s5035_s11 = smov 0   ;;  %s5037_s12 = smov 0  }
   0xb LB: > { %6296 = sst [smem:[#allocation20_spill]] %s4947_s30  ;;  %s5052_s13 = sadd.s32 4294967295, %s4959_s12   ;;  %s4959_s12 = sphi %s5037_s12, %s6410_s12   ;;  %s4955_s11 = sphi %s5035_s11, %s6409_s11   ;;  %s4951_s10 = sphi %s5033_s10, %s6408_s10   ;;  %s4947_s30 = sphi %s5031_s30, %s6407_s30  }
   0xc   : > { %s3797_s14 = sadd.s32 4294967294, %s4959_s12   ;;  %p47_p0 = scmp.ne.s32.totalorder %s4951_s10, %s4947_s30 }
   0xd   : > { %p6250_p1 = scmp.eq.s32.totalorder %s5052_s13, 0  ;;  %p245_p3 = scmp.eq.s32.totalorder %s3797_s14, 1 }
   0xe   : > { %p3798_p5 = scmp.ge.s32.totalorder %s4959_s12, 1  ;;  %p252_p7 = scmp.lt.s32.totalorder %s4959_s12, 3 }
   0xf   : > { %p5061_p4 = por %p6250_p1, %p47_p0  ;;  %p5066_p6 = por %p245_p3, %p47_p0 }
  0x10   : > { %p5071_p8 = pnand %p3798_p5, %p252_p7  ;;  %s4961_s18 = smov [#allocation9]  }
  0x11   : > { %s6297_s15 = scalar_select %p5061_p4, 1, 0 }
  0x12   : > { %s6298_s16 = scalar_select %p5066_p6, 1, 0 }
  0x13   : > { %s6300_s17 = scalar_select %p5071_p8, 1, 0 }
  0x14   : > { %6299 = sst [smem:[#allocation21_spill]] %s6298_s16  ;;  %s264_s19 = sshll.u32 %s4961_s18, 4  ;;  %s5075_s19 = int_to_ptr.vmem [resolvable:$true] %s264_s19 }
  0x15   : > { %p4656_p9 = pneg %p5071_p8  ;;  %s4962_s21 = smov [#allocation12]  }
  0x16   : > { %s296_s22 = sshll.u32 %s4962_s21, 4  ;;  %s6302_s1 = sld [smem:[#allocation53_spill]]  ;;  %s5086_s22 = int_to_ptr.vmem [resolvable:$true] %s296_s22 }
  0x17   : > { %p5082_p11 = pnand %p4656_p9, %p6250_p1 }
  0x19   : > { %p5096_p13 = pneg %p5082_p11 }
  0x1c   : > { %s4743_s25 = scalar_lea.hbm %s6302_s1, 12288 }
  0x1d   : > { %p4744_p12 = scmp.ne.s32.totalorder %s6302_s1, %s4743_s25  ;;  %p4750_p5 = scmp.lt.u32.totalorder %s4743_s25, %s6302_s1 }
  0x1f   : > { %p4746_p0 = pnand %p5096_p13, %p4744_p12 }
  0x21   : > { %p4747_p3 = pneg %p4746_p0 }
  0x23   : > { %p4752_p7 = pnand %p4750_p5, %p4747_p3 }
  0x25   : > { %4755 = shalt.err (!%p4752_p7)
}
  0x26   : > { %s4756_s18 = scalar_lea.vmem %s5075_s19, 12288  ;;  %p4764_p2 = scmp.lt.s32.totalorder %s5075_s19, %s5075_s19 }
  0x27   : > { %p4757_p9 = scmp.ne.s32.totalorder %s5075_s19, %s4756_s18  ;;  %p4765_p6 = scmp.lt.s32.totalorder %s4756_s18, %s4756_s18 }
  0x29   : > { %p4759_p10 = pnand %p4757_p9, %p5096_p13  ;;  %p4766_p12 = por %p4765_p6, %p4764_p2 }
  0x2b   : > { %p4760_p1 = pneg %p4759_p10 }
  0x2d   : > { %p4767_p0 = pnand %p4766_p12, %p4760_p1 }
  0x2f   : > { %4770 = shalt.err (!%p4767_p0)
}
  0x30   : > { %s4963_s21 = smov 512   ;;  %s4964_s23 = smov 32  }
  0x31   : > { %4659 = dma.hbm_to_vmem [thread:$0]  (!%p5082_p11), %s6302_s1, 12288, %s5075_s19, [#allocation10], %s4963_s21, %s4963_s21, %s4964_s23  }
  0x32   : > { %s6304_s5 = sld [smem:[#allocation55_spill]] }
  0x38   : > { %s4771_s29 = scalar_lea.hbm %s6304_s5, 6144 }
  0x39   : > { %p4772_p2 = scmp.ne.s32.totalorder %s6304_s5, %s4771_s29  ;;  %p4778_p10 = scmp.lt.u32.totalorder %s4771_s29, %s6304_s5 }
  0x3b   : > { %p4774_p1 = pnand %p4772_p2, %p5096_p13 }
  0x3d   : > { %p4775_p6 = pneg %p4774_p1 }
  0x3f   : > { %p4780_p3 = pnand %p4778_p10, %p4775_p6 }
  0x41   : > { %4783 = shalt.err (!%p4780_p3)
}
  0x42   : > { %s4784_s19 = scalar_lea.vmem %s5086_s22, 6144  ;;  %p4792_p12 = scmp.lt.s32.totalorder %s5086_s22, %s5086_s22 }
  0x43   : > { %p4785_p5 = scmp.ne.s32.totalorder %s5086_s22, %s4784_s19  ;;  %p4793_p0 = scmp.lt.s32.totalorder %s4784_s19, %s4784_s19 }
  0x45   : > { %p4787_p7 = pnand %p4785_p5, %p5096_p13  ;;  %p4794_p2 = por %p4793_p0, %p4792_p12 }
  0x47   : > { %p4788_p9 = pneg %p4787_p7 }
  0x49   : > { %p4795_p1 = pnand %p4794_p2, %p4788_p9 }
  0x4b   : > { %4798 = shalt.err (!%p4795_p1)
}
  0x4c   : > { %s6255_s16 = smov 128   ;;  %s6257_s30 = smov 8  }
  0x4d   : > { %4665 = dma.hbm_to_vmem [thread:$0]  (!%p5082_p11), %s6304_s5, 6144, %s5086_s22, [#allocation13], %s6255_s16, %s6255_s16, %s6257_s30  }
  0x4e   : > { %s4967_s24 = smov [#allocation11]   ;;  %s6305_s3 = sld [smem:[#allocation54_spill]] }
  0x4f   : > { %s280_s25 = sshll.u32 %s4967_s24, 4  ;;  %s281_s25 = int_to_ptr.vmem [resolvable:$true] %s280_s25 }
  0x54   : > { %s4799_s29 = scalar_lea.hbm %s6305_s3, 24576 }
  0x55   : > { %p4800_p6 = scmp.ne.s32.totalorder %s6305_s3, %s4799_s29  ;;  %p4806_p5 = scmp.lt.u32.totalorder %s4799_s29, %s6305_s3 }
  0x57   : > { %p4802_p10 = pnand %p4800_p6, %p5096_p13 }
  0x59   : > { %p4803_p3 = pneg %p4802_p10 }
  0x5b   : > { %p4808_p7 = pnand %p4806_p5, %p4803_p3 }
  0x5d   : > { %4811 = shalt.err (!%p4808_p7)
}
  0x5e   : > { %s4812_s22 = scalar_lea.vmem %s281_s25, 24576  ;;  %p4820_p2 = scmp.lt.s32.totalorder %s281_s25, %s281_s25 }
  0x5f   : > { %p4813_p9 = scmp.ne.s32.totalorder %s281_s25, %s4812_s22  ;;  %p4821_p1 = scmp.lt.s32.totalorder %s4812_s22, %s4812_s22 }
  0x61   : > { %p4815_p12 = pnand %p4813_p9, %p5096_p13  ;;  %p4822_p4 = por %p4821_p1, %p4820_p2 }
  0x63   : > { %p4816_p0 = pneg %p4815_p12 }
  0x65   : > { %p4823_p8 = pnand %p4822_p4, %p4816_p0 }
  0x67   : > { %4826 = shalt.err (!%p4823_p8)
}
  0x68   : > { %s4968_s21 = smov 256   ;;  %s4969_s23 = smov 16  }
  0x69   : > { %4662 = dma.hbm_to_vmem [thread:$0]  (!%p5082_p11), %s6305_s3, 24576, %s281_s25, [#allocation10], %s4968_s21, %s4968_s21, %s4969_s23  }
  0x6a   : > { %s4970_s26 = smov [#allocation14]   ;;  %s4827_s18 = scalar_lea.hbm %s6247_s7, 3072 }
  0x6b   : > { %s312_s27 = sshll.u32 %s4970_s26, 4  ;;  %p4828_p4 = scmp.ne.s32.totalorder %s6247_s7, %s4827_s18  ;;  %s313_s27 = int_to_ptr.vmem [resolvable:$true] %s312_s27 }
  0x6c   : > { %p4834_p10 = scmp.lt.u32.totalorder %s4827_s18, %s6247_s7 }
  0x6d   : > { %p4830_p8 = pnand %p4828_p4, %p5096_p13 }
  0x6f   : > { %p4831_p6 = pneg %p4830_p8 }
  0x71   : > { %p4836_p3 = pnand %p4834_p10, %p4831_p6 }
  0x73   : > { %4839 = shalt.err (!%p4836_p3)
}
  0x74   : > { %s4840_s25 = scalar_lea.vmem %s313_s27, 3072  ;;  %p4848_p12 = scmp.lt.s32.totalorder %s313_s27, %s313_s27 }
  0x75   : > { %p4841_p5 = scmp.ne.s32.totalorder %s313_s27, %s4840_s25  ;;  %p4849_p0 = scmp.lt.s32.totalorder %s4840_s25, %s4840_s25 }
  0x77   : > { %p4843_p7 = pnand %p4841_p5, %p5096_p13  ;;  %p4850_p2 = por %p4849_p0, %p4848_p12 }
  0x79   : > { %p4844_p9 = pneg %p4843_p7 }
  0x7b   : > { %p4851_p1 = pnand %p4850_p2, %p4844_p9 }
  0x7d   : > { %4854 = shalt.err (!%p4851_p1)
}
  0x7e   : > { %s6306_s21 = smov 8   ;;  %s6307_s23 = smov 128  }
  0x7f   : > { %4668 = dma.hbm_to_vmem [thread:$0]  (!%p5082_p11), %s6247_s7, 3072, %s313_s27, [#allocation13], %s6307_s23, %s6307_s23, %s6306_s21  }
  0x80   : > { %s5183_s28 = sadd.s32 1, %s4959_s12   ;;  %s34_s20 = sadd.s32 1, %s4955_s11 }
  0x81   : > { %s31_s1 = ssub.s32 %s4959_s12, %s5183_s28  ;;  %p41_p13 = scmp.ne.s32.totalorder %s4955_s11, %s4951_s10 }
  0x82   : > { %p32_p4 = scmp.eq.s32.totalorder %s31_s1, 0  ;;  %p42_p8 = scmp.eq.s32.totalorder %s4959_s12, 0 }
  0x83   : > { %p6308_p6 = scmp.eq.s32.totalorder %s5052_s13, 1  ;;  %p4681_p3 = scmp.lt.s32.totalorder %s4959_s12, 2 }
  0x84   : > { %s5199_s26 = scalar_select %p32_p4, %s4955_s11, %s34_s20  }
  0x85   : > { %p5193_p10 = por %p6308_p6, %p41_p13  ;;  %p43_p5 = por %p42_p8, %p41_p13 }
  0x86   : > { %s329_s29 = sand.u32 1, %s4955_s11   ;;  %s3905_s27 = smul.u32 768, %s4959_s12 }
  0x87   : > { %s4633_s14 = smul.u32 48, %s329_s29  ;;  %p5203_p11 = pnand %p4681_p3, %p43_p5 }
  0x88   : > { %s5210_s25 = scalar_lea.hbm %s6240_s0, %s3905_s27  ;;  %s5214_s20 = scalar_lea.sflag [#allocation7], %s329_s29 }
  0x89   : > { %s333_s16 = scalar_lea.vmem [#allocation6], %s4633_s14  ;;  %s4855_s1 = scalar_lea.hbm %s5210_s25, 768 }
  0x8a   : > { %s341_s30 = sshll.u32 %s333_s16, 4  ;;  %p4856_p7 = scmp.ne.s32.totalorder %s5210_s25, %s4855_s1  ;;  %s5212_s30 = int_to_ptr.vmem [resolvable:$true] %s341_s30 }
  0x8b   : > { %p4857_p9 = pneg %p5203_p11  ;;  %s4860_s22 = scalar_lea.hbm %s6240_s0, 1536 }
  0x8c   : > { %p4861_p2 = scmp.lt.u32.totalorder %s5210_s25, %s6240_s0  ;;  %p4862_p1 = scmp.lt.u32.totalorder %s4860_s22, %s4855_s1 }
  0x8d   : > { %p4858_p12 = pnand %p4857_p9, %p4856_p7  ;;  %p4864_p4 = scmp.lt.u32.totalorder %s4855_s1, %s5210_s25 }
  0x8e   : > { %p4863_p13 = por %p4862_p1, %p4861_p2 }
  0x8f   : > { %p4859_p0 = pneg %p4858_p12 }
  0x90   : > { %p4865_p8 = por %p4864_p4, %p4863_p13 }
  0x92   : > { %p4866_p6 = pnand %p4865_p8, %p4859_p0 }
  0x94   : > { %4869 = shalt.err (!%p4866_p6)
}
  0x95   : > { %s4870_s29 = scalar_lea.vmem %s5212_s30, 768  ;;  %s4971_s14 = smov [#allocation6]  }
  0x96   : > { %p4871_p3 = scmp.ne.s32.totalorder %s5212_s30, %s4870_s29  ;;  %s4875_s16 = sshll.u32 %s4971_s14, 4  ;;  %s4876_s16 = int_to_ptr.vmem [resolvable:$false] %s4875_s16 }
  0x97   : > { %s4877_s3 = scalar_lea.vmem %s4876_s16, 1536  ;;  %p4878_p12 = scmp.lt.s32.totalorder %s5212_s30, %s4876_s16 }
  0x98   : > { %p4873_p5 = pnand %p4871_p3, %p4857_p9  ;;  %p4879_p2 = scmp.lt.s32.totalorder %s4877_s3, %s4870_s29 }
  0x9a   : > { %p4874_p7 = pneg %p4873_p5  ;;  %p4880_p1 = por %p4879_p2, %p4878_p12 }
  0x9c   : > { %p4881_p13 = pnand %p4880_p1, %p4874_p7 }
  0x9e   : > { %4884 = shalt.err (!%p4881_p13)
}
  0x9f   : > { %4672 = dma.hbm_to_vmem [thread:$0]  (!%p5203_p11), %s5210_s25, 768, %s5212_s30, %s5214_s20, %s6307_s23, %s6307_s23, %s6306_s21  }
  0xa0   : > { %p6311_p9 = scmp.ne.s32.totalorder %s6300_s17, 0 }
  0xa2   : > { %353 = sbr.rel (%p6311_p9) target bundleno = 1742 (0x6ce), region = 56 }
  0xa9   : > { %s5248_s5 = sand.u32 1, %s4951_s10   ;;  %p6312_p0 = scmp.ne.s32.totalorder %s6297_s15, 0 }
  0xaa   : > { %s4634_s1 = smul.u32 48, %s5248_s5  ;;  %s356_s27 = scalar_lea.sflag [#allocation7], %s5248_s5 }
  0xac   : > { %s5252_s19 = scalar_lea.vmem [#allocation6], %s4634_s1 }
  0xad   : > { %4930 = dma.done.wait (%p6312_p0), %s356_s27, 768  }
  0xae   : > { %4932 = vsyncadd (%p6312_p0), %s356_s27, 4294966528  ;;  %p6313_p11 = scmp.eq.s32.totalorder %s5052_s13, 0 }
  0xb0   : > { %4934 = dma.done.wait (%p6313_p11), [#allocation10], 36864   ;;  %p6314_p4 = pmov %p6313_p11 }
  0xb2   : > { %4936 = vsyncadd (%p6314_p4), [#allocation10], 4294930432  ;;  %p6315_p8 = pmov %p6314_p4 }
  0xb3   : > { %p6316_p6 = pmov %p6314_p4 }
  0xb4   : > { %4938 = dma.done.wait (%p6315_p8), [#allocation13], 9216  }
  0xb5   : > { %4940 = vsyncadd (%p6316_p6), [#allocation13], 4294958080  ;;  %vm418_vm0 = vcmask 516096   ;;  %v6259_v0 = vmov 0.0   ;;  %v472_v1 = vld [vmem:[#allocation9 + $0x8] sm:$0xff]  ;;  %v471_v6 = vld [vmem:[#allocation9] sm:$0xff] }
  0xb6   : > { %585 = vmatprep.mubr.f32.mxu1 %v6259_v0  ;;  %2800 = vst [vmem:[#allocation4] sm:$0x1] %v6259_v0  ;;  %2801 = vst [vmem:[#allocation4 + $0x8] sm:$0x1] %v6259_v0  ;;  %805 = vmatprep.mubr.f32.mxu0 %v6259_v0  ;;  %v476_v2 = vld [vmem:[#allocation9 + $0x28] sm:$0xff]  ;;  %v475_v7 = vld [vmem:[#allocation9 + $0x20] sm:$0xff] }
  0xb7   : > { %2802 = vst [vmem:[#allocation4 + $0x10] sm:$0x1] %v6259_v0  ;;  %2803 = vst [vmem:[#allocation4 + $0x5] sm:$0x1] %v6259_v0  ;;  %v434_v3 = vld [vmem:[#allocation9 + $0x108] sm:$0xff]  ;;  %v4149_v4 = vpack.c.bf16 %v476_v2, %v472_v1  ;;  %v4151_v9 = vpack.c.bf16 %v475_v7, %v471_v6  ;;  %v433_v10 = vld [vmem:[#allocation9 + $0x100] sm:$0xff] }
  0xb8   : > { %2804 = vst [vmem:[#allocation4 + $0xd] sm:$0x1] %v6259_v0  ;;  %2805 = vst [vmem:[#allocation4 + $0x15] sm:$0x1] %v6259_v0  ;;  %v438_v5 = vld [vmem:[#allocation9 + $0x128] sm:$0xff]  ;;  %v437_v11 = vld [vmem:[#allocation9 + $0x120] sm:$0xff] }
  0xb9   : > { %419 = vst.msk [vmem:[#allocation2] sm:$0x1] %vm418_vm0, %v6259_v0  ;;  %420 = vst.msk [vmem:[#allocation2 + $0x18] sm:$0x1] %vm418_vm0, %v6259_v0  ;;  %v4181_v8 = vpack.c.bf16 %v438_v5, %v434_v3  ;;  %v480_v12 = vld [vmem:[#allocation9 + $0x48] sm:$0xff]  ;;  %4150 = vmatprep.subr.bf16.mxu1 %v4149_v4  ;;  %v4183_v13 = vpack.c.bf16 %v437_v11, %v433_v10  ;;  %v479_v19 = vld [vmem:[#allocation9 + $0x40] sm:$0xff] }
  0xba   : > { %421 = vst.msk [vmem:[#allocation2 + $0x30] sm:$0x1] %vm418_vm0, %v6259_v0  ;;  %422 = vst.msk [vmem:[#allocation2 + $0x11] sm:$0x1] %vm418_vm0, %v6259_v0  ;;  %v484_v14 = vld [vmem:[#allocation9 + $0x68] sm:$0xff]  ;;  %4152 = vmatpush1.bf16.msra.mxu1 %v4151_v9  ;;  %v483_v20 = vld [vmem:[#allocation9 + $0x60] sm:$0xff] }
  0xbb   : > { %423 = vst.msk [vmem:[#allocation2 + $0x29] sm:$0x1] %vm418_vm0, %v6259_v0  ;;  %424 = vst.msk [vmem:[#allocation2 + $0x41] sm:$0x1] %vm418_vm0, %v6259_v0  ;;  %v442_v15 = vld [vmem:[#allocation9 + $0x148] sm:$0xff]  ;;  %4182 = vmatprep.subr.bf16.mxu0 %v4181_v8  ;;  %v4153_v17 = vpack.c.bf16 %v484_v14, %v480_v12  ;;  %v441_v21 = vld [vmem:[#allocation9 + $0x140] sm:$0xff]  ;;  %v4155_v22 = vpack.c.bf16 %v483_v20, %v479_v19 }
  0xbc   : > { %3275 = vst.msk [vmem:[#allocation5] sm:$0x1] %vm418_vm0, %v6259_v0  ;;  %3276 = vst.msk [vmem:[#allocation5 + $0x4] sm:$0x1] %vm418_vm0, %v6259_v0  ;;  %v446_v16 = vld [vmem:[#allocation9 + $0x168] sm:$0xff]  ;;  %4184 = vmatpush1.bf16.msra.mxu0 %v4183_v13  ;;  %v445_v23 = vld [vmem:[#allocation9 + $0x160] sm:$0xff] }
  0xbd   : > { %3277 = vst.msk [vmem:[#allocation5 + $0x8] sm:$0x1] %vm418_vm0, %v6259_v0  ;;  %3278 = vst.msk [vmem:[#allocation5 + $0x3] sm:$0x1] %vm418_vm0, %v6259_v0  ;;  %v4185_v18 = vpack.c.bf16 %v446_v16, %v442_v15  ;;  %v488_v24 = vld [vmem:[#allocation9 + $0x88] sm:$0xff]  ;;  %4154 = vmatprep.subr.bf16.mxu1 %v4153_v17  ;;  %v4187_v26 = vpack.c.bf16 %v445_v23, %v441_v21  ;;  %v487_v30 = vld [vmem:[#allocation9 + $0x80] sm:$0xff] }
  0xbe   : > { %3279 = vst.msk [vmem:[#allocation5 + $0x7] sm:$0x1] %vm418_vm0, %v6259_v0  ;;  %3280 = vst.msk [vmem:[#allocation5 + $0xb] sm:$0x1] %vm418_vm0, %v6259_v0  ;;  %v492_v25 = vld [vmem:[#allocation9 + $0xa8] sm:$0xff]  ;;  %v491_v32 = vld [vmem:[#allocation9 + $0xa0] sm:$0xff]  ;;  %4156 = vmatpush1.bf16.msra.mxu1 %v4155_v22 }
  0xbf   : > { %4186 = vmatprep.subr.bf16.mxu0 %v4185_v18  ;;  %v4157_v27 = vpack.c.bf16 %v492_v25, %v488_v24  ;;  %v450_v28 = vld [vmem:[#allocation9 + $0x188] sm:$0xff]  ;;  %v449_v33 = vld [vmem:[#allocation9 + $0x180] sm:$0xff]  ;;  %v4159_v35 = vpack.c.bf16 %v491_v32, %v487_v30  ;;  %vm425_vm1 = vcmask 523264   ;;  %v474_v48 = vld [vmem:[#allocation9 + $0x18] sm:$0xff]  ;;  %vm1989_vm3 = vcmask 1042434   ;;  %s4974_s30 = smov 64  }
  0xc0   : > { %v454_v29 = vld [vmem:[#allocation9 + $0x1a8] sm:$0xff]  ;;  %v453_v34 = vld [vmem:[#allocation9 + $0x1a0] sm:$0xff]  ;;  %4188 = vmatpush1.bf16.msra.mxu0 %v4187_v26  ;;  %v478_v49 = vld [vmem:[#allocation9 + $0x38] sm:$0xff]  ;;  %vm2273_vm4 = vcmask 1041409   ;;  %vm1991_vm5 = vcmask 1043459   ;;  %vm1993_vm6 = vcmask 1044484  }
  0xc1   : > { %v4189_v31 = vpack.c.bf16 %v454_v29, %v450_v28  ;;  %v496_v36 = vld [vmem:[#allocation9 + $0xc8] sm:$0xff]  ;;  %4158 = vmatprep.subr.bf16.mxu1 %v4157_v27  ;;  %v4191_v39 = vpack.c.bf16 %v453_v34, %v449_v33  ;;  %v495_v42 = vld [vmem:[#allocation9 + $0xc0] sm:$0xff]  ;;  %v473_v51 = vld [vmem:[#allocation9 + $0x10] sm:$0xff]  ;;  %v4165_v54 = vpack.c.bf16 %v478_v49, %v474_v48  ;;  %vm1995_vm7 = vcmask 1045509   ;;  %s4977_s29 = smov 96   ;;  %s4635_s14 = smul.u32 3, %s5248_s5 }
  0xc2   : > { %v500_v37 = vld [vmem:[#allocation9 + $0xe8] sm:$0xff]  ;;  %v499_v43 = vld [vmem:[#allocation9 + $0xe0] sm:$0xff]  ;;  %4160 = vmatpush1.bf16.msra.mxu1 %v4159_v35  ;;  %v477_v55 = vld [vmem:[#allocation9 + $0x30] sm:$0xff]  ;;  %vm1997_vm8 = vcmask 1046534   ;;  %vm1999_vm9 = vcmask 1047559   ;;  %vm2429_vm10 = vcmask 1045504  }
  0xc3   : > { %v458_v38 = vld [vmem:[#allocation9 + $0x1c8] sm:$0xff]  ;;  %v4161_v40 = vpack.c.bf16 %v500_v37, %v496_v36  ;;  %4190 = vmatprep.subr.bf16.mxu0 %v4189_v31  ;;  %v457_v45 = vld [vmem:[#allocation9 + $0x1c0] sm:$0xff]  ;;  %v4163_v50 = vpack.c.bf16 %v499_v43, %v495_v42  ;;  %v482_v56 = vld [vmem:[#allocation9 + $0x58] sm:$0xff]  ;;  %v4167_v2 = vpack.c.bf16 %v477_v55, %v473_v51  ;;  %vm4976_vm11 = vmmov 0   ;;  %s409_s16 = scalar_lea.vmem [#allocation15], %s4635_s14  ;;  %s3904_s1 = smul.u32 48, %s5052_s13 }
  0xc4   : > { %v462_v41 = vld [vmem:[#allocation9 + $0x1e8] sm:$0xff]  ;;  %v461_v46 = vld [vmem:[#allocation9 + $0x1e0] sm:$0xff]  ;;  %4192 = vmatpush1.bf16.msra.mxu0 %v4191_v39  ;;  %v486_v57 = vld [vmem:[#allocation9 + $0x78] sm:$0xff]  ;;  %vm3317_vm12 = vcmask 517120   ;;  %vm3668_vm13 = vcmask 253952   ;;  %s3686_s3 = sshll.u32 %s409_s16, 4  ;;  %s6191_s3 = int_to_ptr.vmem [resolvable:$true] %s3686_s3 }
  0xc5   : > { %v4193_v44 = vpack.c.bf16 %v462_v41, %v458_v38  ;;  %v5299_v47 = vld [vmem:[%s5252_s19] sm:$0xff]  ;;  %v5304_v52 = vld [vmem:[%s5252_s19 + $0x8] sm:$0xff]  ;;  %4162 = vmatprep.subr.bf16.mxu1 %v4161_v40  ;;  %v4195_v53 = vpack.c.bf16 %v461_v46, %v457_v45  ;;  %v5309_v58 = vld [vmem:[%s5252_s19 + $0x10] sm:$0xff]  ;;  %v4169_v8 = vpack.c.bf16 %v486_v57, %v482_v56  ;;  %s6196_s15 = scalar_lea.hbm %s6249_s9, %s3904_s1  ;;  %s3673_s17 = scalar_lea.sflag [#allocation8], %s5248_s5 }
  0xc6   : > { %426 = vst.msk [vmem:[#allocation2 + $0x1] sm:$0xff] %vm425_vm1, %v5299_v47  ;;  %427 = vst.msk [vmem:[#allocation2 + $0x9] sm:$0xff] %vm425_vm1, %v5304_v52  ;;  %v951_v59 = vld [vmem:[#allocation9 + $0x208] sm:$0xff]  ;;  %v950_v62 = vld [vmem:[#allocation9 + $0x200] sm:$0xff]  ;;  %4164 = vmatpush1.bf16.msra.mxu1 %v4163_v50  ;;  %s4885_s21 = scalar_lea.vmem %s6191_s3, 48  ;;  %s4978_s13 = smov [#allocation15]  }
  0xc7   : > { %4194 = vmatprep.subr.bf16.mxu0 %v4193_v44  ;;  %v955_v60 = vld [vmem:[#allocation9 + $0x228] sm:$0xff]  ;;  %428 = vst.msk [vmem:[#allocation2 + $0x19] sm:$0xff] %vm425_vm1, %v5309_v58  ;;  %v954_v63 = vld [vmem:[#allocation9 + $0x220] sm:$0xff]  ;;  %4166 = vmatprep.subr.bf16.mxu1 %v4165_v54  ;;  %v481_v4 = vld [vmem:[#allocation9 + $0x50] sm:$0xff]  ;;  %p4886_p3 = scmp.ne.s32.totalorder %s6191_s3, %s4885_s21  ;;  %s4889_s23 = sshll.u32 %s4978_s13, 4  ;;  %s4890_s23 = int_to_ptr.vmem [resolvable:$false] %s4889_s23 }
  0xc8   : > { %v4213_v61 = vpack.c.bf16 %v955_v60, %v951_v59  ;;  %v5314_v1 = vld [vmem:[%s5252_s19 + $0x18] sm:$0xff]  ;;  %4196 = vmatpush1.bf16.msra.mxu0 %v4195_v53  ;;  %v485_v5 = vld [vmem:[#allocation9 + $0x70] sm:$0xff]  ;;  %v4215_v9 = vpack.c.bf16 %v954_v63, %v950_v62  ;;  %v958_v13 = vld [vmem:[#allocation9 + $0x240] sm:$0xff]  ;;  %s4891_s18 = scalar_lea.vmem %s4890_s23, 96  ;;  %p4892_p12 = scmp.lt.s32.totalorder %s6191_s3, %s4890_s23 }
  0xc9   : > { %429 = vst.msk [vmem:[#allocation2 + $0x21] sm:$0xff] %vm425_vm1, %v5314_v1  ;;  %v959_v3 = vld [vmem:[#allocation9 + $0x248] sm:$0xff]  ;;  %v490_v10 = vld [vmem:[#allocation9 + $0x98] sm:$0xff]  ;;  %v962_v14 = vld [vmem:[#allocation9 + $0x260] sm:$0xff]  ;;  %v4171_v19 = vpack.c.bf16 %v485_v5, %v481_v4  ;;  %p4887_p5 = pnand %p4886_p3, %p5193_p10  ;;  %p4893_p2 = scmp.lt.s32.totalorder %s4891_s18, %s4885_s21 }
  0xca   : > { %v963_v6 = vld [vmem:[#allocation9 + $0x268] sm:$0xff]  ;;  %4214 = vmatprep.subr.bf16.mxu0 %v4213_v61  ;;  %v494_v11 = vld [vmem:[#allocation9 + $0xb8] sm:$0xff]  ;;  %v5323_v15 = vld [vmem:[%s5252_s19 + $0x20] sm:$0xff]  ;;  %v4219_v23 = vpack.c.bf16 %v962_v14, %v958_v13 }
  0xcb   : > { %v4217_v12 = vpack.c.bf16 %v963_v6, %v959_v3  ;;  %3823 = vmatmul.mubr.msk.f32.vlgmr.msra.gmra.mrb[0].mxu0 %vm425_vm1, %v5299_v47  ;;  %430 = vst.msk [vmem:[#allocation2 + $0x31] sm:$0xff] %vm425_vm1, %v5323_v15  ;;  %v967_v17 = vld [vmem:[#allocation9 + $0x288] sm:$0xff]  ;;  %v489_v20 = vld [vmem:[#allocation9 + $0x90] sm:$0xff]  ;;  %v4173_v21 = vpack.c.bf16 %v494_v11, %v490_v10  ;;  %v966_v24 = vld [vmem:[#allocation9 + $0x280] sm:$0xff]  ;;  %p4888_p7 = pneg %p4887_p5  ;;  %p4894_p1 = por %p4893_p2, %p4892_p12 }
  0xcc   : > { %v971_v18 = vld [vmem:[#allocation9 + $0x2a8] sm:$0xff]  ;;  %811 = vmatprep.mubr.f32.mxu0 %v6259_v0  ;;  %4216 = vmatpush1.bf16.msra.mxu0 %v4215_v9  ;;  %v493_v22 = vld [vmem:[#allocation9 + $0xb0] sm:$0xff]  ;;  %v970_v27 = vld [vmem:[#allocation9 + $0x2a0] sm:$0xff] }
  0xcd   : > { %v5318_v7 = vld [vmem:[#allocation2] sm:$0xff]  ;;  %v5327_v16 = vld [vmem:[#allocation2 + $0x8] sm:$0xff]  ;;  %4218 = vmatprep.subr.bf16.mxu0 %v4217_v12  ;;  %v4221_v26 = vpack.c.bf16 %v971_v18, %v967_v17  ;;  %v975_v31 = vld [vmem:[#allocation9 + $0x2c8] sm:$0xff]  ;;  %v4175_v33 = vpack.c.bf16 %v493_v22, %v489_v20  ;;  %v4223_v34 = vpack.c.bf16 %v970_v27, %v966_v24  ;;  %p4895_p13 = pnand %p4894_p1, %p4888_p7 }
  0xce   : > { %3811 = vmatmul.mubr.msk.f32.vlgmr.msra.gmra.mrb[0].mxu1 %vm425_vm1, %v5318_v7  ;;  %v5334_v25 = vld [vmem:[%s5252_s19 + $0x28] sm:$0xff]  ;;  %v497_v36 = vld [vmem:[#allocation9 + $0xd0] sm:$0xff]  ;;  %v974_v38 = vld [vmem:[#allocation9 + $0x2c0] sm:$0xff] }
  0xcf   : > { %4168 = vmatpush1.bf16.msra.mxu1 %v4167_v2  ;;  %591 = vmatprep.mubr.f32.mxu1 %v6259_v0  ;;  %v498_v28 = vld [vmem:[#allocation9 + $0xd8] sm:$0xff]  ;;  %431 = vst.msk [vmem:[#allocation2 + $0x39] sm:$0xff] %vm425_vm1, %v5334_v25  ;;  %v5343_v30 = vld [vmem:[#allocation2 + $0x18] sm:$0xff]  ;;  %v978_v40 = vld [vmem:[#allocation9 + $0x2e0] sm:$0xff] }
  0xd0   : > { %4170 = vmatprep.subr.bf16.mxu1 %v4169_v8  ;;  %v502_v29 = vld [vmem:[#allocation9 + $0xf8] sm:$0xff]  ;;  %3824 = vmatmul.mubr.msk.f32.gmra.mrb[2].mxu0 %vm425_vm1, %v5304_v52  ;;  %v979_v32 = vld [vmem:[#allocation9 + $0x2e8] sm:$0xff]  ;;  %v501_v37 = vld [vmem:[#allocation9 + $0xf0] sm:$0xff]  ;;  %v4227_v45 = vpack.c.bf16 %v978_v40, %v974_v38 }
  0xd1   : > { %817 = vmatprep.mubr.f32.mxu0 %v6259_v0  ;;  %4220 = vmatpush1.bf16.msra.mxu0 %v4219_v23  ;;  %v4177_v35 = vpack.c.bf16 %v502_v29, %v498_v28  ;;  %v4225_v39 = vpack.c.bf16 %v979_v32, %v975_v31  ;;  %v436_v41 = vld [vmem:[#allocation9 + $0x118] sm:$0xff]  ;;  %v4179_v44 = vpack.c.bf16 %v501_v37, %v497_v36  ;;  %v435_v50 = vld [vmem:[#allocation9 + $0x110] sm:$0xff] }
  0xd2   : > { %3812 = vmatmul.mubr.msk.f32.gmra.mrb[2].mxu1 %vm425_vm1, %v5327_v16  ;;  %4222 = vmatprep.subr.bf16.mxu0 %v4221_v26  ;;  %v440_v42 = vld [vmem:[#allocation9 + $0x138] sm:$0xff]  ;;  %v5359_v48 = vld [vmem:[#allocation2 + $0x30] sm:$0xff]  ;;  %v439_v51 = vld [vmem:[#allocation9 + $0x130] sm:$0xff] }
  0xd3   : > { %597 = vmatprep.mubr.f32.mxu1 %v6259_v0  ;;  %4172 = vmatpush1.bf16.msra.mxu1 %v4171_v19  ;;  %v5351_v43 = vld [vmem:[#allocation2 + $0x20] sm:$0xff]  ;;  %v4197_v46 = vpack.c.bf16 %v440_v42, %v436_v41  ;;  %v4199_v55 = vpack.c.bf16 %v439_v51, %v435_v50  ;;  %v5384_v63 = vld [vmem:[#allocation2 + $0xa] sm:$0xff]  ;;  %v2135_v51 = vld [vmem:[#allocation11 + $0x48] sm:$0xff] }
  0xd4   : > { %4174 = vmatprep.subr.bf16.mxu1 %v4173_v21  ;;  %3825 = vmatmul.mubr.msk.f32.gmra.mrb[4].mxu0 %vm425_vm1, %v5309_v58  ;;  %v444_v53 = vld [vmem:[#allocation9 + $0x158] sm:$0xff]  ;;  %v443_v59 = vld [vmem:[#allocation9 + $0x150] sm:$0xff] }
  0xd5   : > { %823 = vmatprep.mubr.f32.mxu0 %v6259_v0  ;;  %4224 = vmatpush1.bf16.msra.mxu0 %v4223_v34  ;;  %v448_v54 = vld [vmem:[#allocation9 + $0x178] sm:$0xff]  ;;  %v447_v60 = vld [vmem:[#allocation9 + $0x170] sm:$0xff] }
  0xd6   : > { %3813 = vmatmul.mubr.msk.f32.gmra.mrb[4].mxu1 %vm425_vm1, %v5343_v30  ;;  %4226 = vmatprep.subr.bf16.mxu0 %v4225_v39  ;;  %v5367_v49 = vld [vmem:[#allocation2 + $0x38] sm:$0xff]  ;;  %v5376_v56 = vld [vmem:[#allocation2 + $0x2] sm:$0xff]  ;;  %v4201_v57 = vpack.c.bf16 %v448_v54, %v444_v53  ;;  %v4203_v2 = vpack.c.bf16 %v447_v60, %v443_v59 }
  0xd7   : > { %603 = vmatprep.mubr.f32.mxu1 %v6259_v0  ;;  %4176 = vmatpush1.bf16.msra.mxu1 %v4175_v33  ;;  %v452_v61 = vld [vmem:[#allocation9 + $0x198] sm:$0xff]  ;;  %v451_v4 = vld [vmem:[#allocation9 + $0x190] sm:$0xff]  ;;  %v947_v19 = vld [vmem:[#allocation2 + $0x32] sm:$0xff] }
  0xd8   : > { %4178 = vmatprep.subr.bf16.mxu1 %v4177_v35  ;;  %3826 = vmatmul.mubr.msk.f32.gmra.mrb[6].mxu0 %vm425_vm1, %v5314_v1  ;;  %v456_v62 = vld [vmem:[#allocation9 + $0x1b8] sm:$0xff]  ;;  %v455_v5 = vld [vmem:[#allocation9 + $0x1b0] sm:$0xff]  ;;  %v2139_v59 = vld [vmem:[#allocation11 + $0x68] sm:$0xff] }
  0xd9   : > { %829 = vmatprep.mubr.f32.mxu0 %v6259_v0  ;;  %4228 = vmatpush1.bf16.msra.mxu0 %v4227_v45  ;;  %v4205_v3 = vpack.c.bf16 %v456_v62, %v452_v61  ;;  %v460_v6 = vld [vmem:[#allocation9 + $0x1d8] sm:$0xff]  ;;  %v5392_v8 = vld [vmem:[#allocation2 + $0x1a] sm:$0xff]  ;;  %v4207_v9 = vpack.c.bf16 %v455_v5, %v451_v4  ;;  %v2138_v61 = vld [vmem:[#allocation11 + $0x60] sm:$0xff] }
  0xda   : > { %3814 = vmatmul.mubr.msk.f32.gmra.mrb[6].mxu1 %vm425_vm1, %v5351_v43  ;;  %v459_v11 = vld [vmem:[#allocation9 + $0x1d0] sm:$0xff]  ;;  %v953_v13 = vld [vmem:[#allocation9 + $0x218] sm:$0xff] }
  0xdb   : > { %609 = vmatprep.mubr.f32.mxu1 %v6259_v0  ;;  %4180 = vmatpush1.bf16.msra.mxu1 %v4179_v44  ;;  %v463_v12 = vld [vmem:[#allocation9 + $0x1f0] sm:$0xff]  ;;  %v957_v14 = vld [vmem:[#allocation9 + $0x238] sm:$0xff]  ;;  %v2131_v44 = vld [vmem:[#allocation11 + $0x28] sm:$0xff] }
  0xdc   : > { %4198 = vmatprep.subr.bf16.mxu1 %v4197_v46  ;;  %3827 = vmatmul.mubr.msk.f32.gmra.mrb[8].mxu0 %vm425_vm1, %v5323_v15  ;;  %v4211_v17 = vpack.c.bf16 %v463_v12, %v459_v11  ;;  %v4229_v18 = vpack.c.bf16 %v957_v14, %v953_v13  ;;  %v948_v20 = vld [vmem:[#allocation2 + $0x3a] sm:$0xff]  ;;  %v961_v23 = vld [vmem:[#allocation9 + $0x258] sm:$0xff]  ;;  %v2146_v12 = vld [vmem:[#allocation11 + $0xa0] sm:$0xff] }
  0xdd   : > { %835 = vmatprep.mubr.f32.mxu0 %v6259_v0  ;;  %v952_v21 = vld [vmem:[#allocation9 + $0x210] sm:$0xff]  ;;  %v965_v24 = vld [vmem:[#allocation9 + $0x278] sm:$0xff]  ;;  %v2151_v14 = vld [vmem:[#allocation11 + $0xc8] sm:$0xff] }
  0xde   : > { %3815 = vmatmul.mubr.msk.f32.gmra.mrb[8].mxu1 %vm425_vm1, %v5359_v48  ;;  %v956_v22 = vld [vmem:[#allocation9 + $0x230] sm:$0xff]  ;;  %v4233_v27 = vpack.c.bf16 %v965_v24, %v961_v23  ;;  %v973_v31 = vld [vmem:[#allocation9 + $0x2b8] sm:$0xff] }
  0xdf   : > { %615 = vmatprep.mubr.f32.mxu1 %v6259_v0  ;;  %v4231_v26 = vpack.c.bf16 %v956_v22, %v952_v21  ;;  %v960_v28 = vld [vmem:[#allocation9 + $0x250] sm:$0xff]  ;;  %v977_v36 = vld [vmem:[#allocation9 + $0x2d8] sm:$0xff]  ;;  %v2155_v22 = vld [vmem:[#allocation11 + $0xe8] sm:$0xff] }
  0xe0   : > { %3828 = vmatmul.mubr.msk.f32.gmra.mrb[10].mxu0 %vm425_vm1, %v5334_v25  ;;  %v964_v29 = vld [vmem:[#allocation9 + $0x270] sm:$0xff]  ;;  %v981_v37 = vld [vmem:[#allocation9 + $0x2f8] sm:$0xff] }
  0xe1   : > { %1064 = vmatprep.mubr.f32.mxu0 %v6259_v0  ;;  %v4235_v32 = vpack.c.bf16 %v964_v29, %v960_v28  ;;  %v968_v34 = vld [vmem:[#allocation9 + $0x290] sm:$0xff]  ;;  %v4241_v39 = vpack.c.bf16 %v981_v37, %v977_v36  ;;  %v2133_v45 = vld [vmem:[#allocation11 + $0x38] sm:$0xff]  ;;  %v2159_v29 = vld [vmem:[#allocation11 + $0x108] sm:$0xff] }
  0xe2   : > { %3816 = vmatmul.mubr.msk.f32.gmra.mrb[10].mxu1 %vm425_vm1, %v5367_v49  ;;  %v972_v35 = vld [vmem:[#allocation9 + $0x2b0] sm:$0xff]  ;;  %v4249_v46 = vpack.c.bf16 %v2133_v45, %v2131_v44  ;;  %v2137_v53 = vld [vmem:[#allocation11 + $0x58] sm:$0xff]  ;;  %v2170_v45 = vld [vmem:[#allocation11 + $0x160] sm:$0xff] }
  0xe3   : > { %686 = vmatprep.mubr.f32.mxu1 %v6259_v0  ;;  %v4239_v38 = vpack.c.bf16 %v972_v35, %v968_v34  ;;  %v980_v40 = vld [vmem:[#allocation9 + $0x2f0] sm:$0xff]  ;;  %v4253_v54 = vpack.c.bf16 %v2137_v53, %v2135_v51  ;;  %v2141_v60 = vld [vmem:[#allocation11 + $0x78] sm:$0xff]  ;;  %v2163_v35 = vld [vmem:[#allocation11 + $0x128] sm:$0xff] }
  0xe4   : > { %3835 = vmatmul.mubr.msk.f32.vlgmr.msra.gmra.mrb[0].mxu0 %vm425_vm1, %v5376_v56  ;;  %v2128_v42 = vld [vmem:[#allocation11 + $0x10] sm:$0xff]  ;;  %v4257_v62 = vpack.c.bf16 %v2141_v60, %v2139_v59  ;;  %v2157_v23 = vld [vmem:[#allocation11 + $0xf8] sm:$0xff]  ;;  %v2174_v53 = vld [vmem:[#allocation11 + $0x180] sm:$0xff] }
  0xe5   : > { %1070 = vmatprep.mubr.f32.mxu0 %v6259_v0  ;;  %v2148_v13 = vld [vmem:[#allocation11 + $0xb0] sm:$0xff]  ;;  %v4273_v24 = vpack.c.bf16 %v2157_v23, %v2155_v22  ;;  %v2165_v36 = vld [vmem:[#allocation11 + $0x138] sm:$0xff]  ;;  %v2178_v60 = vld [vmem:[#allocation11 + $0x1a0] sm:$0xff] }
  0xe6   : > { %3817 = vmatmul.mubr.msk.f32.vlgmr.msra.gmra.mrb[12].mxu1 %vm425_vm1, %v5318_v7  ;;  %v464_v7 = vld [vmem:[#allocation9 + $0x1f8] sm:$0xff]  ;;  %v4281_v37 = vpack.c.bf16 %v2165_v36, %v2163_v35 }
  0xe7   : > { %4200 = vmatpush1.bf16.msra.mxu1 %v4199_v55  ;;  %692 = vmatprep.mubr.f32.mxu1 %v6259_v0  ;;  %v4209_v10 = vpack.c.bf16 %v464_v7, %v460_v6  ;;  %v2134_v55 = vld [vmem:[#allocation11 + $0x40] sm:$0xff]  ;;  %v2144_v7 = vld [vmem:[#allocation11 + $0x90] sm:$0xff] }
  0xe8   : > { %4202 = vmatprep.subr.bf16.mxu1 %v4201_v57  ;;  %3836 = vmatmul.mubr.msk.f32.gmra.mrb[2].mxu0 %vm425_vm1, %v5384_v63  ;;  %v2142_v6 = vld [vmem:[#allocation11 + $0x80] sm:$0xff] }
  0xe9   : > { %1076 = vmatprep.mubr.f32.mxu0 %v6259_v0 }
  0xea   : > { %3818 = vmatmul.mubr.msk.f32.gmra.mrb[14].mxu1 %vm425_vm1, %v5327_v16  ;;  %v5400_v16 = vld [vmem:[#allocation2 + $0x22] sm:$0xff] }
  0xeb   : > { %698 = vmatprep.mubr.f32.mxu1 %v6259_v0  ;;  %4204 = vmatpush1.bf16.msra.mxu1 %v4203_v2  ;;  %v2143_v2 = vld [vmem:[#allocation11 + $0x88] sm:$0xff] }
  0xec   : > { %4206 = vmatprep.subr.bf16.mxu1 %v4205_v3  ;;  %3837 = vmatmul.mubr.msk.f32.gmra.mrb[4].mxu0 %vm425_vm1, %v5392_v8  ;;  %v2145_v3 = vld [vmem:[#allocation11 + $0x98] sm:$0xff] }
  0xed   : > { %1082 = vmatprep.mubr.f32.mxu0 %v6259_v0  ;;  %v4261_v5 = vpack.c.bf16 %v2145_v3, %v2143_v2  ;;  %v2183_v3 = vld [vmem:[#allocation11 + $0x1c8] sm:$0xff] }
  0xee   : > { %3819 = vmatmul.mubr.msk.f32.gmra.mrb[16].mxu1 %vm425_vm1, %v5343_v30  ;;  %v969_v30 = vld [vmem:[#allocation9 + $0x298] sm:$0xff] }
  0xef   : > { %704 = vmatprep.mubr.f32.mxu1 %v6259_v0  ;;  %4208 = vmatpush1.bf16.msra.mxu1 %v4207_v9  ;;  %v4237_v33 = vpack.c.bf16 %v973_v31, %v969_v30  ;;  %v2149_v9 = vld [vmem:[#allocation11 + $0xb8] sm:$0xff] }
  0xf0   : > { %4210 = vmatprep.subr.bf16.mxu1 %v4209_v10  ;;  %3838 = vmatmul.mubr.msk.f32.gmra.mrb[6].mxu0 %vm425_vm1, %v5400_v16  ;;  %v4263_v10 = vpack.c.bf16 %v2144_v7, %v2142_v6  ;;  %v2161_v30 = vld [vmem:[#allocation11 + $0x118] sm:$0xff]  ;;  %v2182_v6 = vld [vmem:[#allocation11 + $0x1c0] sm:$0xff]  ;;  %v2184_v7 = vld [vmem:[#allocation11 + $0x1d0] sm:$0xff] }
  0xf1   : > { %1088 = vmatprep.mubr.f32.mxu0 %v6259_v0  ;;  %v4277_v31 = vpack.c.bf16 %v2161_v30, %v2159_v29 }
  0xf2   : > { %3820 = vmatmul.mubr.msk.f32.gmra.mrb[18].mxu1 %vm425_vm1, %v5351_v43 }
  0xf3   : > { %710 = vmatprep.mubr.f32.mxu1 %v6259_v0  ;;  %4212 = vmatpush1.bf16.msra.mxu1 %v4211_v17  ;;  %v4267_v17 = vpack.c.bf16 %v2148_v13, %v2146_v12  ;;  %v2189_v12 = vld [vmem:[#allocation11 + $0x1f8] sm:$0xff] }
  0xf4   : > { %4230 = vmatprep.subr.bf16.mxu1 %v4229_v18  ;;  %3839 = vmatmul.mubr.msk.f32.gmra.mrb[8].mxu0 %vm425_vm1, %v947_v19 }
  0xf5   : > { %1094 = vmatprep.mubr.f32.mxu0 %v6259_v0 }
  0xf6   : > { %3821 = vmatmul.mubr.msk.f32.gmra.mrb[20].mxu1 %vm425_vm1, %v5359_v48  ;;  %v2130_v48 = vld [vmem:[#allocation11 + $0x20] sm:$0xff] }
  0xf7   : > { %716 = vmatprep.mubr.f32.mxu1 %v6259_v0 }
  0xf8   : > { %3840 = vmatmul.mubr.msk.f32.gmra.mrb[10].mxu0 %vm425_vm1, %v948_v20 }
  0xfa   : > { %3822 = vmatmul.mubr.msk.f32.gmra.mrb[22].mxu1 %vm425_vm1, %v5367_v49  ;;  %v2132_v49 = vld [vmem:[#allocation11 + $0x30] sm:$0xff] }
  0xfb   : > { %906 = vmatprep.mubr.f32.mxu1 %v6259_v0  ;;  %v4251_v50 = vpack.c.bf16 %v2132_v49, %v2130_v48  ;;  %v2175_v49 = vld [vmem:[#allocation11 + $0x188] sm:$0xff] }
  0xfe   : > { %3829 = vmatmul.mubr.msk.f32.vlgmr.msra.gmra.mrb[12].mxu1 %vm425_vm1, %v5299_v47  ;;  %v976_v47 = vld [vmem:[#allocation9 + $0x2d0] sm:$0xff] }
  0xff   : > { %4232 = vmatpush1.bf16.msra.mxu1 %v4231_v26  ;;  %912 = vmatprep.mubr.f32.mxu1 %v6259_v0  ;;  %v4243_v41 = vpack.c.bf16 %v980_v40, %v976_v47  ;;  %v2154_v26 = vld [vmem:[#allocation11 + $0xe0] sm:$0xff]  ;;  %v2167_v40 = vld [vmem:[#allocation11 + $0x148] sm:$0xff] }
 0x100   : > { %4234 = vmatprep.subr.bf16.mxu1 %v4233_v27  ;;  %v2156_v27 = vld [vmem:[#allocation11 + $0xf0] sm:$0xff] }
 0x101   : > { %v4275_v28 = vpack.c.bf16 %v2156_v27, %v2154_v26 }
 0x102   : > { %3830 = vmatmul.mubr.msk.f32.gmra.mrb[14].mxu1 %vm425_vm1, %v5304_v52  ;;  %v1228_v52 = vlaneseq }
 0x103   : > { %918 = vmatprep.mubr.f32.mxu1 %v6259_v0  ;;  %4236 = vmatpush1.bf16.msra.mxu1 %v4235_v32  ;;  %v2158_v32 = vld [vmem:[#allocation11 + $0x100] sm:$0xff] }
 0x104   : > { %4238 = vmatprep.subr.bf16.mxu1 %v4237_v33  ;;  %vm1754_vm2 = vcmp.lt.s32.totalorder %v1228_v52, 256  ;;  %v2160_v33 = vld [vmem:[#allocation11 + $0x110] sm:$0xff]  ;;  %v5458_v27 = vshrl.u32 %v1228_v52, 7 }
 0x105   : > { %1756 = vst.msk [vmem:[#allocation3] ss:$8 sm:$0x3] %vm1754_vm2, %v6259_v0  ;;  %1759 = vst.msk [vmem:[#allocation3 + $0x20] ss:$8 sm:$0x3] %vm1754_vm2, %v6259_v0  ;;  %v4279_v34 = vpack.c.bf16 %v2160_v33, %v2158_v32 }
 0x106   : > { %3831 = vmatmul.mubr.msk.f32.gmra.mrb[16].mxu1 %vm425_vm1, %v5309_v58  ;;  %1762 = vst.msk [vmem:[#allocation3 + $0x40] ss:$8 sm:$0x3] %vm1754_vm2, %v6259_v0  ;;  %1765 = vst.msk [vmem:[#allocation3 + $0x11] ss:$8 sm:$0x3] %vm1754_vm2, %v6259_v0 }
 0x107   : > { %924 = vmatprep.mubr.f32.mxu1 %v6259_v0  ;;  %4240 = vmatpush1.bf16.msra.mxu1 %v4239_v38  ;;  %1768 = vst.msk [vmem:[#allocation3 + $0x31] ss:$8 sm:$0x3] %vm1754_vm2, %v6259_v0  ;;  %1771 = vst.msk [vmem:[#allocation3 + $0x51] ss:$8 sm:$0x3] %vm1754_vm2, %v6259_v0 }
 0x108   : > { %4242 = vmatprep.subr.bf16.mxu1 %v4241_v39  ;;  %v2127_v58 = vld [vmem:[#allocation11 + $0x8] sm:$0xff]  ;;  %v2162_v38 = vld [vmem:[#allocation11 + $0x120] sm:$0xff]  ;;  %v2164_v39 = vld [vmem:[#allocation11 + $0x130] sm:$0xff]  ;;  %6317 = vst [vmem:[#allocation22_spill] sm:$0xff] %v5458_v27  ;;  %v5461_v30 = vsub.s32 0, %v5458_v27  ;;  %v6261_v33 = vsub.s32 1, %v5458_v27 }
 0x109   : > { %v4283_v47 = vpack.c.bf16 %v2164_v39, %v2162_v38  ;;  %v5466_v32 = vld [vmem:[%s6242_s2] sm:$0xf] }
 0x10a   : > { %3832 = vmatmul.mubr.msk.f32.gmra.mrb[18].mxu1 %vm425_vm1, %v5314_v1  ;;  %v2129_v1 = vld [vmem:[#allocation11 + $0x18] sm:$0xff]  ;;  %v1235_v52 = vrot.slane %v5466_v32, %v6261_v33 }
 0x10b   : > { %930 = vmatprep.mubr.f32.mxu1 %v6259_v0  ;;  %4244 = vmatpush1.bf16.msra.mxu1 %v4243_v41  ;;  %v2169_v41 = vld [vmem:[#allocation11 + $0x158] sm:$0xff] }
 0x10e   : > { %3833 = vmatmul.mubr.msk.f32.gmra.mrb[20].mxu1 %vm425_vm1, %v5323_v15  ;;  %v4245_v15 = vpack.c.bf16 %v2129_v1, %v2127_v58  ;;  %v4285_v58 = vpack.c.bf16 %v2169_v41, %v2167_v40  ;;  %v2166_v1 = vld [vmem:[#allocation11 + $0x140] sm:$0xff] }
 0x10f   : > { %936 = vmatprep.mubr.f32.mxu1 %v6259_v0 }
 0x110   : > { %4246 = vmatprep.subr.bf16.mxu0 %v4245_v15  ;;  %v2168_v15 = vld [vmem:[#allocation11 + $0x150] sm:$0xff] }
 0x112   : > { %3834 = vmatmul.mubr.msk.f32.gmra.mrb[22].mxu1 %vm425_vm1, %v5334_v25  ;;  %v2126_v25 = vld [vmem:[#allocation11] sm:$0xff] }
 0x113   : > { %1165 = vmatprep.mubr.f32.mxu1 %v6259_v0  ;;  %v4247_v43 = vpack.c.bf16 %v2128_v42, %v2126_v25  ;;  %v4287_v25 = vpack.c.bf16 %v2168_v15, %v2166_v1  ;;  %v2171_v42 = vld [vmem:[#allocation11 + $0x168] sm:$0xff] }
 0x115   : > { %4248 = vmatpush1.bf16.msra.mxu0 %v4247_v43  ;;  %v2173_v43 = vld [vmem:[#allocation11 + $0x178] sm:$0xff] }
 0x116   : > { %3841 = vmatmul.mubr.msk.f32.vlgmr.msra.gmra.mrb[12].mxu1 %vm425_vm1, %v5376_v56  ;;  %4250 = vmatprep.subr.bf16.mxu0 %v4249_v46  ;;  %v2136_v56 = vld [vmem:[#allocation11 + $0x50] sm:$0xff]  ;;  %v4289_v44 = vpack.c.bf16 %v2173_v43, %v2171_v42 }
 0x117   : > { %1171 = vmatprep.mubr.f32.mxu1 %v6259_v0  ;;  %v4255_v57 = vpack.c.bf16 %v2136_v56, %v2134_v55  ;;  %v2172_v46 = vld [vmem:[#allocation11 + $0x170] sm:$0xff]  ;;  %v2179_v56 = vld [vmem:[#allocation11 + $0x1a8] sm:$0xff] }
 0x118   : > { %v4291_v48 = vpack.c.bf16 %v2172_v46, %v2170_v45 }
 0x119   : > { %4252 = vmatpush1.bf16.msra.mxu0 %v4251_v50  ;;  %v2177_v50 = vld [vmem:[#allocation11 + $0x198] sm:$0xff] }
 0x11a   : > { %3842 = vmatmul.mubr.msk.f32.gmra.mrb[14].mxu1 %vm425_vm1, %v5384_v63  ;;  %4254 = vmatprep.subr.bf16.mxu0 %v4253_v54  ;;  %v2140_v63 = vld [vmem:[#allocation11 + $0x70] sm:$0xff]  ;;  %v4293_v51 = vpack.c.bf16 %v2177_v50, %v2175_v49 }
 0x11b   : > { %1177 = vmatprep.mubr.f32.mxu1 %v6259_v0  ;;  %v4259_v4 = vpack.c.bf16 %v2140_v63, %v2138_v61  ;;  %v2176_v54 = vld [vmem:[#allocation11 + $0x190] sm:$0xff] }
 0x11c   : > { %v4295_v55 = vpack.c.bf16 %v2176_v54, %v2174_v53  ;;  %v2180_v61 = vld [vmem:[#allocation11 + $0x1b0] sm:$0xff] }
 0x11d   : > { %4256 = vmatpush1.bf16.msra.mxu0 %v4255_v57  ;;  %v2181_v57 = vld [vmem:[#allocation11 + $0x1b8] sm:$0xff] }
 0x11e   : > { %3843 = vmatmul.mubr.msk.f32.gmra.mrb[16].mxu1 %vm425_vm1, %v5392_v8  ;;  %v2147_v8 = vld [vmem:[#allocation11 + $0xa8] sm:$0xff]  ;;  %4258 = vmatprep.subr.bf16.mxu0 %v4257_v62  ;;  %v4297_v59 = vpack.c.bf16 %v2181_v57, %v2179_v56  ;;  %v4299_v62 = vpack.c.bf16 %v2180_v61, %v2178_v60 }
 0x11f   : > { %1183 = vmatprep.mubr.f32.mxu1 %v6259_v0  ;;  %v4265_v11 = vpack.c.bf16 %v2149_v9, %v2147_v8  ;;  %v4303_v8 = vpack.c.bf16 %v2184_v7, %v2182_v6 }
 0x121   : > { %4260 = vmatpush1.bf16.msra.mxu0 %v4259_v4  ;;  %v2185_v4 = vld [vmem:[#allocation11 + $0x1d8] sm:$0xff] }
 0x122   : > { %3844 = vmatmul.mubr.msk.f32.gmra.mrb[18].mxu1 %vm425_vm1, %v5400_v16  ;;  %4262 = vmatprep.subr.bf16.mxu0 %v4261_v5  ;;  %v2153_v16 = vld [vmem:[#allocation11 + $0xd8] sm:$0xff]  ;;  %v4301_v5 = vpack.c.bf16 %v2185_v4, %v2183_v3 }
 0x123   : > { %1189 = vmatprep.mubr.f32.mxu1 %v6259_v0  ;;  %v4269_v18 = vpack.c.bf16 %v2153_v16, %v2151_v14  ;;  %v2186_v14 = vld [vmem:[#allocation11 + $0x1e0] sm:$0xff]  ;;  %v2188_v16 = vld [vmem:[#allocation11 + $0x1f0] sm:$0xff] }
 0x125   : > { %4264 = vmatpush1.bf16.msra.mxu0 %v4263_v10 }
 0x126   : > { %3845 = vmatmul.mubr.msk.f32.gmra.mrb[20].mxu1 %vm425_vm1, %v947_v19  ;;  %4266 = vmatprep.subr.bf16.mxu0 %v4265_v11  ;;  %v2150_v19 = vld [vmem:[#allocation11 + $0xc0] sm:$0xff]  ;;  %v2187_v11 = vld [vmem:[#allocation11 + $0x1e8] sm:$0xff] }
 0x127   : > { %1195 = vmatprep.mubr.f32.mxu1 %v6259_v0  ;;  %v4305_v13 = vpack.c.bf16 %v2189_v12, %v2187_v11  ;;  %v5598_v0 = vld [vmem:[#allocation11 + $0x328] sm:$0xff] }
 0x128   : > { %6335 = vst [vmem:[#allocation40_spill] sm:$0xff] %v5598_v0 }
 0x129   : > { %4268 = vmatpush1.bf16.msra.mxu0 %v4267_v17  ;;  %v4307_v17 = vpack.c.bf16 %v2188_v16, %v2186_v14 }
 0x12a   : > { %3846 = vmatmul.mubr.msk.f32.gmra.mrb[22].mxu1 %vm425_vm1, %v948_v20  ;;  %v2152_v20 = vld [vmem:[#allocation11 + $0xd0] sm:$0xff]  ;;  %4270 = vmatprep.subr.bf16.mxu0 %v4269_v18 }
 0x12b   : > { %v4271_v21 = vpack.c.bf16 %v2152_v20, %v2150_v19  ;;  %v2057_v20 = vld [vmem:[#allocation11 + $0x208] sm:$0xff] }
 0x12d   : > { %4272 = vmatpush1.bf16.msra.mxu0 %v4271_v21  ;;  %v2059_v21 = vld [vmem:[#allocation11 + $0x218] sm:$0xff] }
 0x12e   : > { %4274 = vmatprep.subr.bf16.mxu0 %v4273_v24  ;;  %v4309_v22 = vpack.c.bf16 %v2059_v21, %v2057_v20 }
 0x131   : > { %4276 = vmatpush1.bf16.msra.mxu0 %v4275_v28 }
 0x132   : > { %4278 = vmatprep.subr.bf16.mxu0 %v4277_v31 }
 0x135   : > { %4280 = vmatpush1.bf16.msra.mxu0 %v4279_v34  ;;  %v1231_v34 = vrot.slane %v5466_v32, %v5461_v30 }
 0x136   : > { %4282 = vmatprep.subr.bf16.mxu0 %v4281_v37 }
 0x139   : > { %4284 = vmatpush1.bf16.msra.mxu0 %v4283_v47 }
 0x13a   : > { %4286 = vmatprep.subr.bf16.mxu0 %v4285_v58 }
 0x13d   : > { %4288 = vmatpush1.bf16.msra.mxu0 %v4287_v25 }
 0x13e   : > { %4290 = vmatprep.subr.bf16.mxu0 %v4289_v44 }
 0x141   : > { %4292 = vmatpush1.bf16.msra.mxu0 %v4291_v48 }
 0x142   : > { %4294 = vmatprep.subr.bf16.mxu0 %v4293_v51 }
 0x145   : > { %4296 = vmatpush1.bf16.msra.mxu0 %v4295_v55 }
 0x146   : > { %4298 = vmatprep.subr.bf16.mxu0 %v4297_v59 }
 0x149   : > { %4300 = vmatpush1.bf16.msra.mxu0 %v4299_v62 }
 0x14a   : > { %4302 = vmatprep.subr.bf16.mxu0 %v4301_v5 }
 0x14d   : > { %4304 = vmatpush1.bf16.msra.mxu0 %v4303_v8 }
 0x14e   : > { %4306 = vmatprep.subr.bf16.mxu0 %v4305_v13 }
 0x151   : > { %4308 = vmatpush1.bf16.msra.mxu0 %v4307_v17 }
 0x152   : > { %4310 = vmatprep.subr.bf16.mxu0 %v4309_v22 }
 0x1a1   : > { %v587_v63 = vpop.f32.mrb[0].mxu1 }
 0x1a2   : > { %v589_v2 = vpop.f32.mrb[1].mxu1 }
 0x1a5   : > { %v593_v9 = vpop.f32.mrb[2].mxu1 }
 0x1a6   : > { %v595_v10 = vpop.f32.mrb[3].mxu1 }
 0x1a9   : > { %v599_v18 = vpop.f32.mrb[4].mxu1 }
 0x1aa   : > { %v601_v19 = vpop.f32.mrb[5].mxu1 }
 0x1ad   : > { %v605_v23 = vpop.f32.mrb[6].mxu1 }
 0x1ae   : > { %v607_v24 = vpop.f32.mrb[7].mxu1 }
 0x1b1   : > { %v611_v26 = vpop.f32.mrb[8].mxu1 }
 0x1b2   : > { %v613_v28 = vpop.f32.mrb[9].mxu1 }
 0x1b5   : > { %v617_v29 = vpop.f32.mrb[10].mxu1 }
 0x1b6   : > { %v619_v31 = vpop.f32.mrb[11].mxu1 }
 0x1b7   : > { %v1066_v35 = vpop.f32.mrb[0].mxu0 }
 0x1b8   : > { %v4569_v36 = vadd.f32 %v1066_v35, %v587_v63  ;;  %v1068_v37 = vpop.f32.mrb[1].mxu0 }
 0x1b9   : > { %v4570_v38 = vadd.f32 %v1068_v37, %v589_v2 }
 0x1ba   : > { %v1248_v39 = vadd.f32 %v4569_v36, %v1231_v34 }
 0x1bb   : > { %v1249_v47 = vadd.f32 %v4570_v38, %v1235_v52  ;;  %v1072_v40 = vpop.f32.mrb[2].mxu0 }
 0x1bc   : > { %v1272_v41 = vmax.f32 %v1248_v39, 0.0  ;;  %v4571_v58 = vadd.f32 %v1072_v40, %v593_v9  ;;  %v1074_v1 = vpop.f32.mrb[3].mxu0 }
 0x1bd   : > { %v1273_v15 = vmax.f32 %v1249_v47, 0.0  ;;  %v4572_v25 = vadd.f32 %v1074_v1, %v595_v10  ;;  %v4973_v47 = vmov 1983009808   ;;  %v5506_v1 = vld [vmem:[#allocation11 + $0x228] sm:$0xff] }
 0x1be   : > { %v1252_v42 = vadd.f32 %v4571_v58, %v1231_v34  ;;  %v1325_v40 = vunpack.c.l.s4 %v4973_v47  ;;  %v1242_v58 = vsub.s32 3, %v5458_v27  ;;  %v5622_v47 = vld [vmem:[#allocation11 + $0x358] sm:$0xff] }
 0x1bf   : > { %v5474_v43 = vcombine.low %v1272_v41, %v1273_v15  ;;  %v5476_v44 = vcombine.high %v1272_v41, %v1273_v15  ;;  %v1253_v45 = vadd.f32 %v4572_v25, %v1235_v52  ;;  %v1078_v46 = vpop.f32.mrb[4].mxu0  ;;  %v5499_v41 = vsub.s32 2, %v5458_v27  ;;  %v5510_v15 = vld [vmem:[#allocation11 + $0x220] sm:$0xff]  ;;  %v5512_v25 = vld [vmem:[#allocation11 + $0x230] sm:$0xff]  ;;  %6340 = vst [vmem:[#allocation45_spill] sm:$0xff] %v5622_v47 }
 0x1c0   : > { %v1276_v48 = vmax.f32 %v1252_v42, 0.0  ;;  %v4573_v49 = vadd.f32 %v1078_v46, %v599_v18  ;;  %v1080_v50 = vpop.f32.mrb[5].mxu0  ;;  %v5514_v42 = vld [vmem:[#allocation11 + $0x248] sm:$0xff]  ;;  %v5518_v46 = vld [vmem:[#allocation11 + $0x240] sm:$0xff] }
 0x1c1   : > { %v1277_v51 = vmax.f32 %v1253_v45, 0.0  ;;  %v4574_v53 = vadd.f32 %v1080_v50, %v601_v19  ;;  %v5516_v45 = vld [vmem:[#allocation11 + $0x258] sm:$0xff] }
 0x1c2   : > { %v1256_v54 = vadd.f32 %v4573_v49, %v1231_v34  ;;  %v5522_v49 = vld [vmem:[#allocation11 + $0x268] sm:$0xff]  ;;  %v5524_v50 = vld [vmem:[#allocation11 + $0x278] sm:$0xff] }
 0x1c3   : > { %v5478_v55 = vcombine.low %v1276_v48, %v1277_v51  ;;  %v5480_v56 = vcombine.high %v1276_v48, %v1277_v51  ;;  %v1257_v57 = vadd.f32 %v4574_v53, %v1235_v52  ;;  %v1084_v59 = vpop.f32.mrb[6].mxu0  ;;  %v5520_v48 = vld [vmem:[#allocation11 + $0x250] sm:$0xff]  ;;  %v5526_v51 = vld [vmem:[#allocation11 + $0x260] sm:$0xff] }
 0x1c4   : > { %v1280_v60 = vmax.f32 %v1256_v54, 0.0  ;;  %v4575_v61 = vadd.f32 %v1084_v59, %v605_v23  ;;  %v1086_v62 = vpop.f32.mrb[7].mxu0  ;;  %v5528_v53 = vld [vmem:[#allocation11 + $0x270] sm:$0xff]  ;;  %v5530_v54 = vld [vmem:[#allocation11 + $0x288] sm:$0xff]  ;;  %v5534_v59 = vld [vmem:[#allocation11 + $0x280] sm:$0xff] }
 0x1c5   : > { %v1281_v63 = vmax.f32 %v1257_v57, 0.0  ;;  %v4576_v2 = vadd.f32 %v1086_v62, %v607_v24  ;;  %v5532_v57 = vld [vmem:[#allocation11 + $0x298] sm:$0xff]  ;;  %6318 = vst [vmem:[#allocation23_spill] sm:$0xff] %v5534_v59 }
 0x1c6   : > { %v1260_v3 = vadd.f32 %v4575_v61, %v1231_v34  ;;  %v5538_v61 = vld [vmem:[#allocation11 + $0x2a8] sm:$0xff]  ;;  %v5540_v62 = vld [vmem:[#allocation11 + $0x2b8] sm:$0xff] }
 0x1c7   : > { %v5482_v4 = vcombine.low %v1280_v60, %v1281_v63  ;;  %v5484_v5 = vcombine.high %v1280_v60, %v1281_v63  ;;  %v1261_v6 = vadd.f32 %v4576_v2, %v1235_v52  ;;  %v1090_v7 = vpop.f32.mrb[8].mxu0  ;;  %v5536_v60 = vld [vmem:[#allocation11 + $0x290] sm:$0xff]  ;;  %6319 = vst [vmem:[#allocation24_spill] sm:$0xff] %v5538_v61  ;;  %6320 = vst [vmem:[#allocation25_spill] sm:$0xff] %v5540_v62  ;;  %v5542_v63 = vld [vmem:[#allocation11 + $0x2a0] sm:$0xff] }
 0x1c8   : > { %v1284_v8 = vmax.f32 %v1260_v3, 0.0  ;;  %v4577_v9 = vadd.f32 %v1090_v7, %v611_v26  ;;  %v1092_v10 = vpop.f32.mrb[9].mxu0  ;;  %6321 = vst [vmem:[#allocation26_spill] sm:$0xff] %v5542_v63  ;;  %v5544_v2 = vld [vmem:[#allocation11 + $0x2b0] sm:$0xff]  ;;  %v5546_v3 = vld [vmem:[#allocation11 + $0x2c8] sm:$0xff]  ;;  %v5552_v7 = vld [vmem:[#allocation11 + $0x2d8] sm:$0xff] }
 0x1c9   : > { %v1285_v11 = vmax.f32 %v1261_v6, 0.0  ;;  %v4578_v12 = vadd.f32 %v1092_v10, %v613_v28  ;;  %6322 = vst [vmem:[#allocation27_spill] sm:$0xff] %v5544_v2  ;;  %6323 = vst [vmem:[#allocation28_spill] sm:$0xff] %v5546_v3  ;;  %v5550_v6 = vrot.slane %v5466_v32, %v5499_v41 }
 0x1ca   : > { %v1264_v13 = vadd.f32 %v4577_v9, %v1231_v34  ;;  %6324 = vst [vmem:[#allocation29_spill] sm:$0xff] %v5552_v7  ;;  %v5556_v9 = vld [vmem:[#allocation11 + $0x2d0] sm:$0xff] }
 0x1cb   : > { %v5486_v14 = vcombine.low %v1284_v8, %v1285_v11  ;;  %v5488_v16 = vcombine.high %v1284_v8, %v1285_v11  ;;  %v1265_v17 = vadd.f32 %v4578_v12, %v1235_v52  ;;  %v1096_v18 = vpop.f32.mrb[10].mxu0  ;;  %v5554_v8 = vld [vmem:[#allocation11 + $0x2c0] sm:$0xff]  ;;  %6326 = vst [vmem:[#allocation31_spill] sm:$0xff] %v5556_v9  ;;  %v5562_v11 = vrot.slane %v5466_v32, %v1242_v58  ;;  %v5596_v58 = vld [vmem:[#allocation11 + $0x310] sm:$0xff]  ;;  %v5620_v12 = vld [vmem:[#allocation11 + $0x348] sm:$0xff] }
 0x1cc   : > { %v1288_v19 = vmax.f32 %v1264_v13, 0.0  ;;  %v4579_v20 = vadd.f32 %v1096_v18, %v617_v29  ;;  %v1098_v21 = vpop.f32.mrb[11].mxu0  ;;  %v5501_v29 = vld [vmem:[#allocation11 + $0x200] sm:$0xff]  ;;  %6325 = vst [vmem:[#allocation30_spill] sm:$0xff] %v5554_v8  ;;  %v5566_v13 = vld [vmem:[#allocation11 + $0x2e8] sm:$0xff]  ;;  %6334 = vst [vmem:[#allocation39_spill] sm:$0xff] %v5596_v58 }
 0x1cd   : > { %v1289_v22 = vmax.f32 %v1265_v17, 0.0  ;;  %v4580_v23 = vadd.f32 %v1098_v21, %v619_v31  ;;  %v5503_v31 = vld [vmem:[#allocation11 + $0x210] sm:$0xff]  ;;  %6327 = vst [vmem:[#allocation32_spill] sm:$0xff] %v5566_v13  ;;  %v5568_v17 = vld [vmem:[#allocation11 + $0x2f8] sm:$0xff]  ;;  %v5570_v18 = vld [vmem:[#allocation11 + $0x2e0] sm:$0xff] }
 0x1ce   : > { %v1268_v24 = vadd.f32 %v4579_v20, %v1231_v34  ;;  %v1326_v34 = vunpack.c.0.s8 %v1325_v40  ;;  %6328 = vst [vmem:[#allocation33_spill] sm:$0xff] %v5568_v17  ;;  %6329 = vst [vmem:[#allocation34_spill] sm:$0xff] %v5570_v18  ;;  %v5607_v21 = vld [vmem:[#allocation11 + $0x338] sm:$0xff]  ;;  %v5609_v40 = vld [vmem:[#allocation11 + $0x320] sm:$0xff] }
 0x1cf   : > { %v5490_v35 = vcombine.low %v1288_v19, %v1289_v22  ;;  %v5492_v36 = vcombine.high %v1288_v19, %v1289_v22  ;;  %v1269_v26 = vadd.f32 %v4580_v23, %v1235_v52  ;;  %v5508_v52 = vld [vmem:[#allocation11 + $0x238] sm:$0xff]  ;;  %v5580_v22 = vld [vmem:[#allocation11 + $0x2f0] sm:$0xff]  ;;  %v5582_v23 = vld [vmem:[#allocation11 + $0x308] sm:$0xff]  ;;  %6336 = vst [vmem:[#allocation41_spill] sm:$0xff] %v5607_v21 }
 0x1d0   : > { %v1292_v37 = vmax.f32 %v1268_v24, 0.0  ;;  %v5559_v10 = vsub.s32 %v1326_v34, %v5458_v27  ;;  %6330 = vst [vmem:[#allocation35_spill] sm:$0xff] %v5580_v22  ;;  %6331 = vst [vmem:[#allocation36_spill] sm:$0xff] %v5582_v23  ;;  %v5584_v24 = vld [vmem:[#allocation11 + $0x318] sm:$0xff]  ;;  %v5594_v34 = vld [vmem:[#allocation11 + $0x300] sm:$0xff] }
 0x1d1   : > { %v1293_v28 = vmax.f32 %v1269_v26, 0.0  ;;  %6332 = vst [vmem:[#allocation37_spill] sm:$0xff] %v5584_v24  ;;  %6333 = vst [vmem:[#allocation38_spill] sm:$0xff] %v5594_v34  ;;  %v5611_v20 = vld [vmem:[#allocation11 + $0x330] sm:$0xff] }
 0x1d2   : > { %6337 = vst [vmem:[#allocation42_spill] sm:$0xff] %v5609_v40  ;;  %6338 = vst [vmem:[#allocation43_spill] sm:$0xff] %v5611_v20  ;;  %v1330_v27 = vrot.slane %v5474_v43, %v5559_v10  ;;  %v1337_v3 = vrot.slane %v5476_v44, %v5559_v10  ;;  %v1366_v43 = vrot.slane %v5478_v55, %v5559_v10 }
 0x1d3   : > { %v5494_v38 = vcombine.low %v1292_v37, %v1293_v28  ;;  %v5496_v39 = vcombine.high %v1292_v37, %v1293_v28  ;;  %6339 = vst [vmem:[#allocation44_spill] sm:$0xff] %v5620_v12  ;;  %v5645_v37 = vrot.slane %v5482_v4, %v5559_v10  ;;  %v5650_v55 = vrot.slane %v5484_v5, %v5559_v10 }
 0x1d4   : > { %v5662_v4 = vrot.slane %v5490_v35, %v5559_v10  ;;  %v5668_v12 = vrot.slane %v5492_v36, %v5559_v10 }
 0x1e9   : > { %v1167_v26 = vpop.f32.mrb[12].mxu1 }
 0x1ea   : > { %v1250_v33 = vadd.f32 %v5550_v6, %v1167_v26  ;;  %v1169_v32 = vpop.f32.mrb[13].mxu1 }
 0x1eb   : > { %v1251_v19 = vadd.f32 %v5562_v11, %v1169_v32 }
 0x1ec   : > { %v1274_v32 = vmax.f32 %v1250_v33, 0.0  ;;  %v1373_v33 = vrot.slane %v5480_v56, %v5559_v10  ;;  %v5654_v56 = vrot.slane %v5486_v14, %v5559_v10  ;;  %v5672_v14 = vrot.slane %v5494_v38, %v5559_v10 }
 0x1ed   : > { %v1275_v8 = vmax.f32 %v1251_v19, 0.0  ;;  %v1173_v9 = vpop.f32.mrb[14].mxu1 }
 0x1ee   : > { %v1254_v44 = vadd.f32 %v5550_v6, %v1173_v9  ;;  %v1175_v26 = vpop.f32.mrb[15].mxu1  ;;  %v5658_v9 = vrot.slane %v5488_v16, %v5559_v10  ;;  %6341 = vst [vmem:[#allocation46_spill] sm:$0xff] %v5672_v14  ;;  %v5676_v16 = vrot.slane %v5496_v39, %v5559_v10 }
 0x1ef   : > { %v1322_v28 = vcombine.low %v1274_v32, %v1275_v8  ;;  %v1323_v0 = vcombine.high %v1274_v32, %v1275_v8  ;;  %v1255_v18 = vadd.f32 %v5562_v11, %v1175_v26 }
 0x1f0   : > { %v1278_v19 = vmax.f32 %v1254_v44, 0.0  ;;  %6342 = vst [vmem:[#allocation47_spill] sm:$0xff] %v5676_v16 }
 0x1f1   : > { %v1344_v8 = vrot.slane %v1322_v28, %v5559_v10  ;;  %v1351_v26 = vrot.slane %v1323_v0, %v5559_v10  ;;  %v1279_v32 = vmax.f32 %v1255_v18, 0.0  ;;  %v1179_v5 = vpop.f32.mrb[16].mxu1 }
 0x1f2   : > { %v5679_v35 = vadd.f32 %v5550_v6, %v1179_v5  ;;  %v1181_v28 = vpop.f32.mrb[17].mxu1 }
 0x1f3   : > { %v1352_v44 = vcombine.low %v1330_v27, %v1344_v8  ;;  %v1353_v0 = vcombine.high %v1330_v27, %v1344_v8  ;;  %v1354_v18 = vcombine.low %v1337_v3, %v1351_v26  ;;  %v1355_v47 = vcombine.high %v1337_v3, %v1351_v26 }
 0x1f4   : > { %v1358_v36 = vcombine.low %v1278_v19, %v1279_v32  ;;  %v1359_v40 = vcombine.high %v1278_v19, %v1279_v32  ;;  %v5683_v38 = vadd.f32 %v5562_v11, %v1181_v28 }
 0x1f5   : > { %v3847_v21 = vrot.slane %v1352_v44, 9  ;;  %v3848_v39 = vrot.slane %v1353_v0, 9  ;;  %v3849_v34 = vrot.slane %v1354_v18, 9  ;;  %v3850_v58 = vrot.slane %v1355_v47, 9  ;;  %v1185_v5 = vpop.f32.mrb[18].mxu1 }
 0x1f6   : > { %v1380_v27 = vrot.slane %v1358_v36, %v5559_v10  ;;  %v1387_v3 = vrot.slane %v1359_v40, %v5559_v10  ;;  %v1283_v8 = vmax.f32 %v5683_v38, 0.0  ;;  %v5689_v19 = vadd.f32 %v5550_v6, %v1185_v5  ;;  %v1187_v26 = vpop.f32.mrb[19].mxu1 }
 0x1f7   : > { %v1632_v32 = vmax.f32 %v1352_v44, %v3847_v21  ;;  %v1633_v28 = vmax.f32 %v1353_v0, %v3848_v39  ;;  %v1634_v20 = vmax.f32 %v1354_v18, %v3849_v34  ;;  %v1635_v23 = vmax.f32 %v1355_v47, %v3850_v58 }
 0x1f8   : > { %v1388_v24 = vcombine.low %v1366_v43, %v1380_v27  ;;  %v1389_v22 = vcombine.high %v1366_v43, %v1380_v27  ;;  %v1390_v13 = vcombine.low %v1373_v33, %v1387_v3  ;;  %v1391_v17 = vcombine.high %v1373_v33, %v1387_v3 }
 0x1f9   : > { %v1680_v7 = vrot.slane %v1632_v32, 4  ;;  %v1681_v63 = vrot.slane %v1633_v28, 4  ;;  %v1682_v2 = vrot.slane %v1634_v20, 4  ;;  %v1683_v36 = vrot.slane %v1635_v23, 4  ;;  %v5691_v16 = vpop.f32.mrb[20].mxu1 }
 0x1fa   : > { %v3851_v40 = vrot.slane %v1388_v24, 9  ;;  %v3852_v38 = vrot.slane %v1389_v22, 9  ;;  %v3853_v14 = vrot.slane %v1390_v13, 9  ;;  %v3854_v5 = vrot.slane %v1391_v17, 9  ;;  %v5693_v61 = vpop.f32.mrb[21].mxu1 }
 0x1fb   : > { %v1728_v21 = vmax.f32 %v1632_v32, %v1680_v7  ;;  %v1729_v34 = vmax.f32 %v1633_v28, %v1681_v63  ;;  %v1730_v47 = vmax.f32 %v1634_v20, %v1682_v2  ;;  %v1731_v58 = vmax.f32 %v1635_v23, %v1683_v36 }
 0x1fc   : > { %v1636_v43 = vmax.f32 %v1388_v24, %v3851_v40  ;;  %v1637_v33 = vmax.f32 %v1389_v22, %v3852_v38  ;;  %v1638_v44 = vmax.f32 %v1390_v13, %v3853_v14  ;;  %v5695_v0 = vmax.f32 %v1391_v17, %v3854_v5 }
 0x1fd   : > { %v1800_v18 = vrot.slane %v1728_v21, %v5461_v30  ;;  %v5699_v39 = vrot.slane %v1728_v21, %v5499_v41  ;;  %v1808_v27 = vrot.slane %v1729_v34, %v5461_v30  ;;  %v5703_v3 = vrot.slane %v1729_v34, %v5499_v41  ;;  %v5705_v63 = vpop.f32.mrb[22].mxu1 }
 0x1fe   : > { %v5708_v2 = vrot.slane %v1730_v47, %v5461_v30  ;;  %v5711_v7 = vrot.slane %v1730_v47, %v5499_v41  ;;  %v5714_v13 = vrot.slane %v1731_v58, %v5461_v30  ;;  %v5717_v17 = vrot.slane %v1731_v58, %v5499_v41  ;;  %v5719_v20 = vpop.f32.mrb[23].mxu1 }
 0x1ff   : > { %v1990_v22 = vsel %vm1989_vm3, %v1808_v27, %v1800_v18  ;;  %v2001_v23 = vsel %vm1989_vm3, %v5703_v3, %v5699_v39  ;;  %v5726_v24 = vsel %vm2273_vm4, %v1808_v27, %v1800_v18  ;;  %v1684_v14 = vrot.slane %v1636_v43, 4 }
 0x200   : > { %v1992_v32 = vsel %vm1991_vm5, %v5708_v2, %v1990_v22  ;;  %v2002_v28 = vsel %vm1991_vm5, %v5711_v7, %v2001_v23  ;;  %v1685_v36 = vrot.slane %v1637_v33, 4  ;;  %v1686_v40 = vrot.slane %v1638_v44, 4 }
 0x201   : > { %v1994_v38 = vsel %vm1993_vm6, %v5714_v13, %v1992_v32  ;;  %v2003_v5 = vsel %vm1993_vm6, %v5717_v17, %v2002_v28  ;;  %v1732_v21 = vmax.f32 %v1636_v43, %v1684_v14  ;;  %v6343_v34 = vmax.f32 %v5679_v35, 0.0 }
 0x202   : > { %v1733_v58 = vmax.f32 %v1637_v33, %v1685_v36  ;;  %v1734_v18 = vmax.f32 %v1638_v44, %v1686_v40  ;;  %v1286_v62 = vmax.f32 %v5689_v19, 0.0  ;;  %v1263_v43 = vadd.f32 %v5562_v11, %v1187_v26 }
 0x203   : > { %v1394_v47 = vcombine.low %v6343_v34, %v1283_v8  ;;  %v6344_v27 = vmov %v6343_v34  ;;  %v5742_v23 = vrot.slane %v1732_v21, %v5461_v30  ;;  %v5745_v59 = vrot.slane %v1732_v21, %v5499_v41 }
 0x204   : > { %v1395_v22 = vcombine.high %v6344_v27, %v1283_v8  ;;  %v5750_v14 = vrot.slane %v1733_v58, %v5461_v30  ;;  %v5753_v33 = vrot.slane %v1733_v58, %v5499_v41  ;;  %v5756_v35 = vrot.slane %v1734_v18, %v5461_v30 }
 0x205   : > { %6345 = vst [vmem:[#allocation48_spill] sm:$0xff] %v5742_v23  ;;  %v1416_v32 = vrot.slane %v1394_v47, %v5559_v10  ;;  %v5759_v8 = vrot.slane %v1734_v18, %v5499_v41  ;;  %v1996_v19 = vsel %vm1995_vm7, %v5742_v23, %v1994_v38  ;;  %v2004_v44 = vsel %vm1995_vm7, %v5745_v59, %v2003_v5 }
 0x206   : > { %6346 = vst [vmem:[#allocation49_spill] sm:$0xff] %v5750_v14  ;;  %6347 = vst [vmem:[#allocation50_spill] sm:$0xff] %v5753_v33  ;;  %v1423_v26 = vrot.slane %v1395_v22, %v5559_v10  ;;  %v1998_v36 = vsel %vm1997_vm8, %v5750_v14, %v1996_v19  ;;  %v2005_v40 = vsel %vm1997_vm8, %v5753_v33, %v2004_v44  ;;  %v1287_v34 = vmax.f32 %v1263_v43, 0.0 }
 0x207   : > { %6348 = vst [vmem:[#allocation51_spill] sm:$0xff] %v5756_v35  ;;  %6349 = vst [vmem:[#allocation52_spill] sm:$0xff] %v5759_v8  ;;  %v1424_v28 = vcombine.low %v5645_v37, %v1416_v32  ;;  %v1425_v21 = vcombine.high %v5645_v37, %v1416_v32  ;;  %v2000_v47 = vsel %vm1999_vm9, %v5756_v35, %v1998_v36 }
 0x208   : > { %v2006_v38 = vsel %vm1999_vm9, %v5759_v8, %v2005_v40  ;;  %v1426_v5 = vcombine.low %v5650_v55, %v1423_v26  ;;  %v1427_v58 = vcombine.high %v5650_v55, %v1423_v26  ;;  %2043 = vst [vmem:[#allocation3] sm:$0xfe] %v2000_v47  ;;  %v1430_v22 = vcombine.low %v1286_v62, %v1287_v34 }
 0x209   : > { %2044 = vst [vmem:[#allocation3 + $0x8] sm:$0xfe] %v2006_v38  ;;  %v3855_v18 = vrot.slane %v1424_v28, 9  ;;  %v3856_v27 = vrot.slane %v1425_v21, 9  ;;  %v1431_v19 = vcombine.high %v1286_v62, %v1287_v34  ;;  %v1266_v37 = vadd.f32 %v5550_v6, %v5691_v16 }
 0x20a   : > { %v3857_v44 = vrot.slane %v1426_v5, 9  ;;  %v3858_v14 = vrot.slane %v1427_v58, 9  ;;  %v1267_v32 = vadd.f32 %v5562_v11, %v5693_v61  ;;  %v1452_v40 = vrot.slane %v1430_v22, %v5559_v10 }
 0x20b   : > { %v1640_v43 = vmax.f32 %v1424_v28, %v3855_v18  ;;  %v1641_v36 = vmax.f32 %v1425_v21, %v3856_v27  ;;  %v1459_v55 = vrot.slane %v1431_v19, %v5559_v10  ;;  %v1290_v38 = vmax.f32 %v1266_v37, 0.0 }
 0x20c   : > { %v1642_v26 = vmax.f32 %v1426_v5, %v3857_v44  ;;  %v1643_v47 = vmax.f32 %v1427_v58, %v3858_v14  ;;  %v1291_v35 = vmax.f32 %v1267_v32, 0.0  ;;  %v1460_v34 = vcombine.low %v5654_v56, %v1452_v40 }
 0x20d   : > { %v1688_v8 = vrot.slane %v1640_v43, 4  ;;  %v1689_v62 = vrot.slane %v1641_v36, 4  ;;  %v1461_v23 = vcombine.high %v5654_v56, %v1452_v40  ;;  %v1462_v61 = vcombine.low %v5658_v9, %v1459_v55 }
 0x20e   : > { %v1690_v16 = vrot.slane %v1642_v26, 4  ;;  %v1691_v33 = vrot.slane %v1643_v47, 4  ;;  %v1463_v28 = vcombine.high %v5658_v9, %v1459_v55  ;;  %v3859_v27 = vrot.slane %v1460_v34, 9 }
 0x20f   : > { %v1736_v21 = vmax.f32 %v1640_v43, %v1688_v8  ;;  %v1737_v18 = vmax.f32 %v1641_v36, %v1689_v62  ;;  %v3860_v22 = vrot.slane %v1461_v23, 9  ;;  %v3861_v58 = vrot.slane %v1462_v61, 9  ;;  %v2120_v37 = vld [vmem:[#allocation3] sm:$0xff] }
 0x210   : > { %v1738_v5 = vmax.f32 %v1642_v26, %v1690_v16  ;;  %v1739_v14 = vmax.f32 %v1643_v47, %v1691_v33  ;;  %v3862_v19 = vrot.slane %v1463_v28, 9  ;;  %v2121_v44 = vld [vmem:[#allocation3 + $0x8] sm:$0xff]  ;;  %v1644_v47 = vmax.f32 %v1460_v34, %v3859_v27 }
 0x211   : > { %v5789_v32 = vrot.slane %v1736_v21, %v5461_v30  ;;  %v5792_v56 = vrot.slane %v1736_v21, %v5499_v41  ;;  %v5795_v40 = vrot.slane %v1737_v18, %v5461_v30  ;;  %v5798_v9 = vrot.slane %v1737_v18, %v5499_v41  ;;  %2254 = vmatprep.mubr.f32.mxu0 %v2121_v44 }
 0x212   : > { %v5801_v8 = vrot.slane %v1738_v5, %v5461_v30  ;;  %v5804_v33 = vrot.slane %v1738_v5, %v5499_v41  ;;  %v5807_v43 = vrot.slane %v1739_v14, %v5461_v30  ;;  %v5810_v36 = vrot.slane %v1739_v14, %v5499_v41  ;;  %2255 = vmatmul.mubr.f32.vlgmr.msra.gmra.mrb[12].mxu0 %v2120_v37 }
 0x213   : > { %v2007_v55 = vsel %vm1989_vm3, %v5795_v40, %v5789_v32  ;;  %v2013_v26 = vsel %vm1989_vm3, %v5798_v9, %v5792_v56  ;;  %v1645_v62 = vmax.f32 %v1461_v23, %v3860_v22  ;;  %v6350_v16 = vpack.c.bf16 %v5503_v31, %v5501_v29 }
 0x214   : > { %v2008_v21 = vsel %vm1991_vm5, %v5801_v8, %v2007_v55  ;;  %v2014_v18 = vsel %vm1991_vm5, %v5804_v33, %v2013_v26  ;;  %v1646_v5 = vmax.f32 %v1462_v61, %v3861_v58  ;;  %v5825_v14 = vmax.f32 %v1463_v28, %v3862_v19 }
 0x215   : > { %4312 = vmatpush1.bf16.msra.mxu0 %v6350_v16  ;;  %v6351_v44 = vpack.c.bf16 %v5508_v52, %v5506_v1  ;;  %v2009_v23 = vsel %vm1993_vm6, %v5807_v43, %v2008_v21  ;;  %v2015_v29 = vsel %vm1993_vm6, %v5810_v36, %v2014_v18  ;;  %v1692_v31 = vrot.slane %v1644_v47, 4 }
 0x216   : > { %v1693_v34 = vrot.slane %v1645_v62, 4  ;;  %v1694_v27 = vrot.slane %v1646_v5, 4  ;;  %v1466_v22 = vcombine.low %v1290_v38, %v1291_v35  ;;  %v1467_v37 = vcombine.high %v1290_v38, %v1291_v35 }
 0x217   : > { %4314 = vmatprep.subr.bf16.mxu0 %v6351_v44  ;;  %v1270_v61 = vadd.f32 %v5550_v6, %v5705_v63  ;;  %v1740_v28 = vmax.f32 %v1644_v47, %v1692_v31  ;;  %v1271_v1 = vadd.f32 %v5562_v11, %v5719_v20  ;;  %v6352_v52 = vpack.c.bf16 %v5512_v25, %v5510_v15 }
 0x218   : > { %v1741_v58 = vmax.f32 %v1645_v62, %v1693_v34  ;;  %v1687_v19 = vrot.slane %v5695_v0, 4  ;;  %v1742_v55 = vmax.f32 %v1646_v5, %v1694_v27  ;;  %v1488_v26 = vrot.slane %v1466_v22, %v5559_v10 }
 0x219   : > { %4316 = vmatpush1.bf16.msra.mxu0 %v6352_v52  ;;  %v1495_v16 = vrot.slane %v1467_v37, %v5559_v10  ;;  %v1294_v35 = vmax.f32 %v1270_v61, 0.0  ;;  %v6353_v6 = vpack.c.bf16 %v5516_v45, %v5514_v42  ;;  %v5848_v63 = vrot.slane %v1740_v28, %v5461_v30 }
 0x21a   : > { %v5851_v11 = vrot.slane %v1740_v28, %v5499_v41  ;;  %v5854_v15 = vrot.slane %v1741_v58, %v5461_v30  ;;  %v5857_v25 = vrot.slane %v1741_v58, %v5499_v41  ;;  %v5860_v20 = vrot.slane %v1742_v55, %v5461_v30 }
 0x21b   : > { %4318 = vmatprep.subr.bf16.mxu0 %v6353_v6  ;;  %v5863_v38 = vrot.slane %v1742_v55, %v5499_v41  ;;  %v1496_v42 = vcombine.low %v5662_v4, %v1488_v26  ;;  %v1497_v45 = vcombine.high %v5662_v4, %v1488_v26  ;;  %v2010_v47 = vsel %vm1995_vm7, %v5848_v63, %v2009_v23 }
 0x21c   : > { %v2016_v62 = vsel %vm1995_vm7, %v5851_v11, %v2015_v29  ;;  %v1498_v21 = vcombine.low %v5668_v12, %v1495_v16  ;;  %v1499_v18 = vcombine.high %v5668_v12, %v1495_v16  ;;  %v6354_v5 = vpack.c.bf16 %v5520_v48, %v5518_v46 }
 0x21d   : > { %v2011_v44 = vsel %vm1997_vm8, %v5854_v15, %v2010_v47  ;;  %v2017_v4 = vsel %vm1997_vm8, %v5857_v25, %v2016_v62  ;;  %v3863_v31 = vrot.slane %v1496_v42, 9  ;;  %v3864_v34 = vrot.slane %v1497_v45, 9 }
 0x21e   : > { %4320 = vmatpush1.bf16.msra.mxu0 %v6354_v5  ;;  %v6355_v23 = vpack.c.bf16 %v5524_v50, %v5522_v49  ;;  %v2012_v29 = vsel %vm1999_vm9, %v5860_v20, %v2011_v44  ;;  %v2018_v12 = vsel %vm1999_vm9, %v5863_v38, %v2017_v4  ;;  %v3865_v46 = vrot.slane %v1498_v21, 9  ;;  %v6361_v5 = vld [vmem:[#allocation24_spill] sm:$0xff] }
 0x21f   : > { %v3866_v48 = vrot.slane %v1499_v18, 9  ;;  %2047 = vst [vmem:[#allocation3 + $0x20] sm:$0xfe] %v2012_v29  ;;  %2048 = vst [vmem:[#allocation3 + $0x28] sm:$0xfe] %v2018_v12  ;;  %v1648_v27 = vmax.f32 %v1496_v42, %v3863_v31  ;;  %v1649_v22 = vmax.f32 %v1497_v45, %v3864_v34  ;;  %v1295_v37 = vmax.f32 %v1271_v1, 0.0 }
 0x220   : > { %4322 = vmatprep.subr.bf16.mxu0 %v6355_v23  ;;  %v1735_v61 = vmax.f32 %v5695_v0, %v1687_v19  ;;  %v1650_v28 = vmax.f32 %v1498_v21, %v3865_v46  ;;  %v6356_v49 = vpack.c.bf16 %v5528_v53, %v5526_v51  ;;  %v2281_v50 = vsel %vm2273_vm4, %v5703_v3, %v5699_v39 }
 0x221   : > { %v1651_v58 = vmax.f32 %v1499_v18, %v3866_v48  ;;  %v2275_v52 = vsel %vm1989_vm3, %v5708_v2, %v5726_v24  ;;  %v1696_v55 = vrot.slane %v1648_v27, 4  ;;  %v1697_v26 = vrot.slane %v1649_v22, 4  ;;  %v6363_v48 = vld [vmem:[#allocation46_spill] sm:$0xff] }
 0x222   : > { %4324 = vmatpush1.bf16.msra.mxu0 %v6356_v49  ;;  %v1502_v16 = vcombine.low %v1294_v35, %v1295_v37  ;;  %v1503_v1 = vcombine.high %v1294_v35, %v1295_v37  ;;  %v6357_v0 = vpack.c.bf16 %v5532_v57, %v5530_v54  ;;  %v1698_v19 = vrot.slane %v1650_v28, 4  ;;  %v6358_v35 = vld [vmem:[#allocation23_spill] sm:$0xff] }
 0x223   : > { %v1699_v6 = vrot.slane %v1651_v58, 4  ;;  %v1860_v51 = vrot.slane %v1735_v61, %v5499_v41  ;;  %v2282_v53 = vsel %vm1989_vm3, %v5711_v7, %v2281_v50  ;;  %v1744_v39 = vmax.f32 %v1648_v27, %v1696_v55 }
 0x224   : > { %4326 = vmatprep.subr.bf16.mxu0 %v6357_v0  ;;  %v1745_v3 = vmax.f32 %v1649_v22, %v1697_v26  ;;  %v1524_v42 = vrot.slane %v1502_v16, %v5559_v10  ;;  %v1531_v2 = vrot.slane %v1503_v1, %v5559_v10  ;;  %v1746_v24 = vmax.f32 %v1650_v28, %v1698_v19  ;;  %v6364_v28 = vld [vmem:[#allocation47_spill] sm:$0xff]  ;;  %v6366_v0 = vld [vmem:[#allocation26_spill] sm:$0xff] }
 0x225   : > { %v1747_v45 = vmax.f32 %v1651_v58, %v1699_v6  ;;  %v6359_v47 = vpack.c.bf16 %v5536_v60, %v6358_v35  ;;  %2046 = vst [vmem:[#allocation3 + $0x18] sm:$0x1] %v1860_v51  ;;  %v2283_v54 = vsel %vm1991_vm5, %v5717_v17, %v2282_v53  ;;  %v1856_v57 = vrot.slane %v1735_v61, %v5461_v30  ;;  %v6360_v60 = vld [vmem:[#allocation25_spill] sm:$0xff]  ;;  %v6365_v1 = vld [vmem:[#allocation27_spill] sm:$0xff] }
 0x226   : > { %v5912_v7 = vrot.slane %v1744_v39, %v5461_v30  ;;  %v5915_v62 = vrot.slane %v1744_v39, %v5499_v41  ;;  %v5918_v21 = vrot.slane %v1745_v3, %v5461_v30  ;;  %v5921_v18 = vrot.slane %v1745_v3, %v5499_v41  ;;  %v2123_v23 = vld [vmem:[#allocation3 + $0x28] sm:$0xff]  ;;  %v2122_v29 = vld [vmem:[#allocation3 + $0x20] sm:$0xff] }
 0x227   : > { %4328 = vmatpush1.bf16.msra.mxu0 %v6359_v47  ;;  %v6362_v44 = vpack.c.bf16 %v6360_v60, %v6361_v5  ;;  %v5927_v17 = vrot.slane %v1746_v24, %v5461_v30  ;;  %v5930_v4 = vrot.slane %v1746_v24, %v5499_v41  ;;  %v5933_v31 = vrot.slane %v1747_v45, %v5461_v30  ;;  %v6368_v3 = vld [vmem:[#allocation29_spill] sm:$0xff]  ;;  %v6371_v47 = vld [vmem:[#allocation50_spill] sm:$0xff]  ;;  %v6372_v5 = vld [vmem:[#allocation48_spill] sm:$0xff] }
 0x228   : > { %v5936_v34 = vrot.slane %v1747_v45, %v5499_v41  ;;  %2045 = vst [vmem:[#allocation3 + $0x10] sm:$0x1] %v1856_v57  ;;  %v2019_v12 = vsel %vm1989_vm3, %v5918_v21, %v5912_v7  ;;  %v2025_v46 = vsel %vm1989_vm3, %v5921_v18, %v5915_v62  ;;  %v1532_v27 = vcombine.low %v6363_v48, %v1524_v42 }
 0x229   : > { %4330 = vmatprep.subr.bf16.mxu0 %v6362_v44  ;;  %v1533_v22 = vcombine.high %v6363_v48, %v1524_v42  ;;  %2260 = vmatprep.mubr.f32.mxu0 %v2123_v23  ;;  %v2020_v37 = vsel %vm1991_vm5, %v5927_v17, %v2019_v12  ;;  %v2026_v61 = vsel %vm1991_vm5, %v5930_v4, %v2025_v46  ;;  %v6369_v42 = vld [vmem:[#allocation28_spill] sm:$0xff] }
 0x22a   : > { %v1534_v58 = vcombine.low %v6364_v28, %v1531_v2  ;;  %v1535_v49 = vcombine.high %v6364_v28, %v1531_v2  ;;  %2261 = vmatmul.mubr.f32.gmra.mrb[14].mxu0 %v2122_v29  ;;  %v2021_v50 = vsel %vm1993_vm6, %v5933_v31, %v2020_v37  ;;  %v2027_v55 = vsel %vm1993_vm6, %v5936_v34, %v2026_v61  ;;  %v6373_v12 = vld [vmem:[#allocation52_spill] sm:$0xff]  ;;  %v6378_v61 = vld [vmem:[#allocation51_spill] sm:$0xff] }
 0x22b   : > { %v3867_v26 = vrot.slane %v1532_v27, 9  ;;  %v3868_v16 = vrot.slane %v1533_v22, 9  ;;  %v6367_v19 = vpack.c.bf16 %v6365_v1, %v6366_v0  ;;  %v2284_v39 = vsel %vm1993_vm6, %v5745_v59, %v2283_v54  ;;  %v6374_v54 = vld [vmem:[#allocation49_spill] sm:$0xff] }
 0x22c   : > { %v3869_v6 = vrot.slane %v1534_v58, 9  ;;  %v3870_v53 = vrot.slane %v1535_v49, 9  ;;  %v6370_v2 = vpack.c.bf16 %v6368_v3, %v6369_v42  ;;  %v2276_v24 = vsel %vm1991_vm5, %v5714_v13, %v2275_v52  ;;  %v6375_v52 = vld [vmem:[#allocation31_spill] sm:$0xff] }
 0x22d   : > { %4332 = vmatpush1.bf16.msra.mxu0 %v6367_v19  ;;  %v1652_v45 = vmax.f32 %v1532_v27, %v3867_v26  ;;  %v1653_v35 = vmax.f32 %v1533_v22, %v3868_v16  ;;  %v2285_v60 = vsel %vm1995_vm7, %v6371_v47, %v2284_v39  ;;  %v2277_v44 = vsel %vm1993_vm6, %v6372_v5, %v2276_v24  ;;  %v6376_v27 = vld [vmem:[#allocation30_spill] sm:$0xff]  ;;  %v6380_v26 = vld [vmem:[#allocation32_spill] sm:$0xff] }
 0x22e   : > { %4334 = vmatprep.subr.bf16.mxu0 %v6370_v2  ;;  %v1654_v23 = vmax.f32 %v1534_v58, %v3869_v6  ;;  %v1655_v29 = vmax.f32 %v1535_v49, %v3870_v53  ;;  %v2286_v59 = vsel %vm1997_vm8, %v6373_v12, %v2285_v60  ;;  %v2278_v46 = vsel %vm1995_vm7, %v6374_v54, %v2277_v44  ;;  %v6379_v49 = vld [vmem:[#allocation33_spill] sm:$0xff]  ;;  %v6386_v47 = vld [vmem:[#allocation36_spill] sm:$0xff] }
 0x22f   : > { %v1700_v48 = vrot.slane %v1652_v45, 4  ;;  %v1701_v37 = vrot.slane %v1653_v35, 4  ;;  %v5975_v13 = vsel %vm1999_vm9, %v1860_v51, %v2286_v59  ;;  %v6377_v22 = vpack.c.bf16 %v6375_v52, %v6376_v27  ;;  %v6389_v52 = vld [vmem:[#allocation38_spill] sm:$0xff] }
 0x230   : > { %v2279_v28 = vsel %vm1997_vm8, %v6378_v61, %v2278_v46  ;;  %v1702_v58 = vrot.slane %v1654_v23, 4  ;;  %v6381_v16 = vpack.c.bf16 %v6379_v49, %v6380_v26  ;;  %v1695_v0 = vrot.slane %v5825_v14, 4  ;;  %v2096_v27 = vld [vmem:[#allocation11 + $0x340] sm:$0xff]  ;;  %v2101_v49 = vld [vmem:[#allocation11 + $0x368] sm:$0xff]  ;;  %v2103_v26 = vld [vmem:[#allocation11 + $0x378] sm:$0xff] }
 0x231   : > { %4336 = vmatpush1.bf16.msra.mxu0 %v6377_v22  ;;  %v5986_v1 = vsel %vm1999_vm9, %v1856_v57, %v2279_v28  ;;  %v2295_v51 = vsel %vm2273_vm4, %v5798_v9, %v5792_v56  ;;  %v1748_v19 = vmax.f32 %v1652_v45, %v1700_v48  ;;  %v1749_v6 = vmax.f32 %v1653_v35, %v1701_v37  ;;  %v6382_v45 = vld [vmem:[#allocation35_spill] sm:$0xff]  ;;  %v6383_v35 = vld [vmem:[#allocation34_spill] sm:$0xff] }
 0x232   : > { %4338 = vmatprep.subr.bf16.mxu0 %v6381_v16  ;;  %v2296_v53 = vsel %vm1989_vm3, %v5804_v33, %v2295_v51  ;;  %v2288_v39 = vsel %vm2273_vm4, %v5795_v40, %v5789_v32  ;;  %v1750_v3 = vmax.f32 %v1654_v23, %v1702_v58  ;;  %v1743_v42 = vmax.f32 %v5825_v14, %v1695_v0  ;;  %v6388_v37 = vld [vmem:[#allocation39_spill] sm:$0xff] }
 0x233   : > { %v2297_v57 = vsel %vm1991_vm5, %v5810_v36, %v2296_v53  ;;  %v2289_v2 = vsel %vm1989_vm3, %v5801_v8, %v2288_v39  ;;  %v1960_v56 = vrot.slane %v1748_v19, %v5461_v30  ;;  %v1964_v9 = vrot.slane %v1748_v19, %v5499_v41  ;;  %v6385_v36 = vld [vmem:[#allocation37_spill] sm:$0xff]  ;;  %v2098_v58 = vld [vmem:[#allocation11 + $0x350] sm:$0xff] }
 0x234   : > { %v1968_v24 = vrot.slane %v1749_v6, %v5461_v30  ;;  %v1972_v33 = vrot.slane %v1749_v6, %v5499_v41  ;;  %v6384_v32 = vpack.c.bf16 %v6382_v45, %v6383_v35  ;;  %v1976_v40 = vrot.slane %v1750_v3, %v5461_v30  ;;  %v2102_v35 = vld [vmem:[#allocation11 + $0x370] sm:$0xff] }
 0x235   : > { %v1980_v14 = vrot.slane %v1750_v3, %v5499_v41  ;;  %v6387_v60 = vpack.c.bf16 %v6385_v36, %v6386_v47  ;;  %v1924_v8 = vrot.slane %v1743_v42, %v5499_v41  ;;  %v2298_v5 = vsel %vm1993_vm6, %v5851_v11, %v2297_v57  ;;  %v6397_v57 = vld [vmem:[#allocation45_spill] sm:$0xff]  ;;  %v2105_v47 = vld [vmem:[#allocation11 + $0x388] sm:$0xff] }
 0x236   : > { %4340 = vmatpush1.bf16.msra.mxu0 %v6384_v32  ;;  %v2022_v44 = vsel %vm1995_vm7, %v1960_v56, %v2021_v50  ;;  %v2028_v23 = vsel %vm1995_vm7, %v1964_v9, %v2027_v55  ;;  %v2299_v12 = vsel %vm1995_vm7, %v5857_v25, %v2298_v5  ;;  %v1920_v59 = vrot.slane %v1743_v42, %v5461_v30 }
 0x237   : > { %4342 = vmatprep.subr.bf16.mxu0 %v6387_v60  ;;  %v2023_v54 = vsel %vm1997_vm8, %v1968_v24, %v2022_v44  ;;  %v2029_v46 = vsel %vm1997_vm8, %v1972_v33, %v2028_v23  ;;  %2050 = vst [vmem:[#allocation3 + $0x38] sm:$0x1] %v1924_v8  ;;  %v2300_v48 = vsel %vm1997_vm8, %v5863_v38, %v2299_v12  ;;  %v6391_v38 = vld [vmem:[#allocation41_spill] sm:$0xff]  ;;  %v1703_v0 = vrot.slane %v1655_v29, 4  ;;  %v2106_v12 = vld [vmem:[#allocation11 + $0x390] sm:$0xff] }
 0x238   : > { %v2290_v11 = vsel %vm1991_vm5, %v5807_v43, %v2289_v2  ;;  %v2024_v50 = vsel %vm1999_vm9, %v1976_v40, %v2023_v54  ;;  %v2030_v55 = vsel %vm1999_vm9, %v1980_v14, %v2029_v46  ;;  %v6390_v25 = vpack.c.bf16 %v6388_v37, %v6389_v52  ;;  %2049 = vst [vmem:[#allocation3 + $0x30] sm:$0x1] %v1920_v59  ;;  %v6392_v43 = vld [vmem:[#allocation40_spill] sm:$0xff]  ;;  %v2104_v23 = vld [vmem:[#allocation11 + $0x380] sm:$0xff] }
 0x239   : > { %v6034_v22 = vsel %vm1999_vm9, %v1924_v8, %v2300_v48  ;;  %v2291_v61 = vsel %vm1993_vm6, %v5848_v63, %v2290_v11  ;;  %2051 = vst [vmem:[#allocation3 + $0x40] sm:$0xfe] %v2024_v50  ;;  %2052 = vst [vmem:[#allocation3 + $0x48] sm:$0xfe] %v2030_v55  ;;  %v6393_v28 = vpack.c.bf16 %v6391_v38, %v6392_v43  ;;  %v6398_v2 = vld [vmem:[#allocation44_spill] sm:$0xff]  ;;  %v2108_v46 = vld [vmem:[#allocation11 + $0x3a0] sm:$0xff] }
 0x23a   : > { %4344 = vmatpush1.bf16.msra.mxu0 %v6390_v25  ;;  %v2292_v16 = vsel %vm1995_vm7, %v5854_v15, %v2291_v61  ;;  %v2309_v51 = vsel %vm2273_vm4, %v5921_v18, %v5915_v62  ;;  %v2302_v63 = vsel %vm2273_vm4, %v5918_v21, %v5912_v7  ;;  %v1751_v39 = vmax.f32 %v1655_v29, %v1703_v0  ;;  %v6394_v7 = vld [vmem:[#allocation43_spill] sm:$0xff]  ;;  %v6395_v21 = vld [vmem:[#allocation42_spill] sm:$0xff]  ;;  %v2107_v60 = vld [vmem:[#allocation11 + $0x398] sm:$0xff] }
 0x23b   : > { %4346 = vmatprep.subr.bf16.mxu0 %v6393_v28  ;;  %v2293_v19 = vsel %vm1997_vm8, %v5860_v20, %v2292_v16  ;;  %v2310_v6 = vsel %vm1989_vm3, %v5930_v4, %v2309_v51  ;;  %v2303_v53 = vsel %vm1989_vm3, %v5927_v17, %v2302_v63  ;;  %v6396_v3 = vpack.c.bf16 %v6394_v7, %v6395_v21  ;;  %v2100_v29 = vld [vmem:[#allocation11 + $0x360] sm:$0xff]  ;;  %v2110_v48 = vld [vmem:[#allocation11 + $0x3b0] sm:$0xff]  ;;  %v2113_v11 = vld [vmem:[#allocation11 + $0x3c8] sm:$0xff] }
 0x23c   : > { %v6056_v15 = vsel %vm1999_vm9, %v1920_v59, %v2293_v19  ;;  %v2311_v62 = vsel %vm1991_vm5, %v5936_v34, %v2310_v6  ;;  %v2304_v18 = vsel %vm1991_vm5, %v5933_v31, %v2303_v53  ;;  %v4351_v20 = vpack.c.bf16 %v2098_v58, %v2096_v27  ;;  %v2115_v50 = vld [vmem:[#allocation11 + $0x3d8] sm:$0xff]  ;;  %v2112_v52 = vld [vmem:[#allocation11 + $0x3c0] sm:$0xff]  ;;  %v2114_v25 = vld [vmem:[#allocation11 + $0x3d0] sm:$0xff] }
 0x23d   : > { %v4353_v42 = vpack.c.bf16 %v2103_v26, %v2101_v49  ;;  %v2312_v4 = vsel %vm1993_vm6, %v1964_v9, %v2311_v62  ;;  %v2305_v17 = vsel %vm1993_vm6, %v1960_v56, %v2304_v18  ;;  %v6399_v45 = vpack.c.bf16 %v6397_v57, %v6398_v2  ;;  %v2117_v27 = vld [vmem:[#allocation11 + $0x3e8] sm:$0xff]  ;;  %v2119_v61 = vld [vmem:[#allocation11 + $0x3f8] sm:$0xff]  ;;  %v2116_v43 = vld [vmem:[#allocation11 + $0x3e0] sm:$0xff] }
 0x23e   : > { %4348 = vmatpush1.bf16.msra.mxu0 %v6396_v3  ;;  %v1988_v34 = vrot.slane %v1751_v39, %v5499_v41  ;;  %v2313_v31 = vsel %vm1995_vm7, %v1972_v33, %v2312_v4  ;;  %v1984_v32 = vrot.slane %v1751_v39, %v5461_v30  ;;  %v2306_v36 = vsel %vm1995_vm7, %v1968_v24, %v2305_v17  ;;  %v2118_v28 = vld [vmem:[#allocation11 + $0x3f0] sm:$0xff]  ;;  %v2456_v58 = vld [vmem:[#allocation11 + $0x408] sm:$0xff]  ;;  %v2458_v49 = vld [vmem:[#allocation11 + $0x418] sm:$0xff] }
 0x23f   : > { %4350 = vmatprep.subr.bf16.mxu0 %v6399_v45  ;;  %v2314_v9 = vsel %vm1997_vm8, %v1980_v14, %v2313_v31  ;;  %v2307_v56 = vsel %vm1997_vm8, %v1976_v40, %v2306_v36  ;;  %v4355_v44 = vpack.c.bf16 %v2102_v35, %v2100_v29  ;;  %v4357_v24 = vpack.c.bf16 %v2107_v60, %v2105_v47  ;;  %v2109_v14 = vld [vmem:[#allocation11 + $0x3a8] sm:$0xff]  ;;  %v2111_v40 = vld [vmem:[#allocation11 + $0x3b8] sm:$0xff]  ;;  %v2455_v0 = vld [vmem:[#allocation11 + $0x400] sm:$0xff] }
 0x240   : > { %2054 = vst [vmem:[#allocation3 + $0x58] sm:$0x1] %v1988_v34  ;;  %v6077_v8 = vsel %vm1999_vm9, %v1988_v34, %v2314_v9  ;;  %2053 = vst [vmem:[#allocation3 + $0x50] sm:$0x1] %v1984_v32  ;;  %v6080_v5 = vsel %vm1999_vm9, %v1984_v32, %v2307_v56  ;;  %v2125_v41 = vld [vmem:[#allocation3 + $0x48] sm:$0xff]  ;;  %v2124_v33 = vld [vmem:[#allocation3 + $0x40] sm:$0xff]  ;;  %v4359_v59 = vpack.c.bf16 %v2106_v12, %v2104_v23 }
 0x241   : > { %2266 = vmatprep.mubr.f32.mxu0 %v2125_v41  ;;  %v4361_v54 = vpack.c.bf16 %v2111_v40, %v2109_v14  ;;  %v4363_v55 = vpack.c.bf16 %v2110_v48, %v2108_v46  ;;  %v4365_v37 = vpack.c.bf16 %v2115_v50, %v2113_v11  ;;  %v4367_v38 = vpack.c.bf16 %v2114_v25, %v2112_v52  ;;  %v2457_v51 = vld [vmem:[#allocation11 + $0x410] sm:$0xff]  ;;  %v2460_v63 = vld [vmem:[#allocation11 + $0x428] sm:$0xff]  ;;  %v2462_v19 = vld [vmem:[#allocation11 + $0x438] sm:$0xff] }
 0x242   : > { %4352 = vmatpush1.bf16.msra.mxu0 %v4351_v20  ;;  %v4371_v26 = vpack.c.bf16 %v2118_v28, %v2116_v43  ;;  %v4373_v16 = vpack.c.bf16 %v2458_v49, %v2456_v58  ;;  %v4375_v6 = vpack.c.bf16 %v2457_v51, %v2455_v0  ;;  %v4377_v53 = vpack.c.bf16 %v2462_v19, %v2460_v63  ;;  %v2459_v39 = vld [vmem:[#allocation11 + $0x420] sm:$0xff]  ;;  %v2461_v62 = vld [vmem:[#allocation11 + $0x430] sm:$0xff]  ;;  %v2464_v18 = vld [vmem:[#allocation11 + $0x448] sm:$0xff] }
 0x243   : > { %4354 = vmatprep.subr.bf16.mxu0 %v4353_v42  ;;  %2267 = vmatmul.mubr.f32.gmra.mrb[16].mxu0 %v2124_v33  ;;  %v2466_v7 = vld [vmem:[#allocation11 + $0x458] sm:$0xff]  ;;  %v4379_v21 = vpack.c.bf16 %v2461_v62, %v2459_v39  ;;  %v2406_v3 = vld [vmem:[#allocation3 + $0x8] sm:$0xfc]  ;;  %v2465_v4 = vld [vmem:[#allocation11 + $0x450] sm:$0xff] }
 0x244   : > { %2386 = vmatprep.mubr.f32.mxu0 %v5975_v13  ;;  %v4369_v13 = vpack.c.bf16 %v2119_v61, %v2117_v27  ;;  %v4381_v20 = vpack.c.bf16 %v2466_v7, %v2464_v18  ;;  %v2463_v42 = vld [vmem:[#allocation11 + $0x440] sm:$0xff]  ;;  %v2408_v17 = vld [vmem:[#allocation3 + $0x18] sm:$0x3]  ;;  %v2468_v57 = vld [vmem:[#allocation11 + $0x468] sm:$0xff]  ;;  %v2433_v45 = vrot.slane %v2406_v3, 2 }
 0x245   : > { %v2470_v2 = vld [vmem:[#allocation11 + $0x478] sm:$0xff]  ;;  %v4383_v29 = vpack.c.bf16 %v2465_v4, %v2463_v42  ;;  %v2467_v35 = vld [vmem:[#allocation11 + $0x460] sm:$0xff]  ;;  %v2469_v34 = vld [vmem:[#allocation11 + $0x470] sm:$0xff] }
 0x246   : > { %4356 = vmatpush1.bf16.msra.mxu0 %v4355_v44  ;;  %v2472_v31 = vld [vmem:[#allocation11 + $0x488] sm:$0xff]  ;;  %v2474_v32 = vld [vmem:[#allocation11 + $0x498] sm:$0xff]  ;;  %v2471_v60 = vld [vmem:[#allocation11 + $0x480] sm:$0xff] }
 0x247   : > { %4358 = vmatprep.subr.bf16.mxu0 %v4357_v24  ;;  %v4389_v47 = vpack.c.bf16 %v2474_v32, %v2472_v31  ;;  %v2473_v9 = vld [vmem:[#allocation11 + $0x490] sm:$0xff]  ;;  %v2476_v56 = vld [vmem:[#allocation11 + $0x4a8] sm:$0xff]  ;;  %v2475_v44 = vld [vmem:[#allocation11 + $0x4a0] sm:$0xff] }
 0x248   : > { %v4391_v41 = vpack.c.bf16 %v2473_v9, %v2471_v60  ;;  %v2477_v24 = vld [vmem:[#allocation11 + $0x4b0] sm:$0xff]  ;;  %v2480_v23 = vld [vmem:[#allocation11 + $0x4c8] sm:$0xff]  ;;  %v2482_v12 = vld [vmem:[#allocation11 + $0x4d8] sm:$0xff] }
 0x249   : > { %v4397_v14 = vpack.c.bf16 %v2482_v12, %v2480_v23  ;;  %v2479_v40 = vld [vmem:[#allocation11 + $0x4c0] sm:$0xff]  ;;  %v2486_v46 = vld [vmem:[#allocation11 + $0x4f8] sm:$0xff]  ;;  %v2504_v3 = vld [vmem:[#allocation11 + $0x588] sm:$0xff] }
 0x24a   : > { %4360 = vmatpush1.bf16.msra.mxu0 %v4359_v59  ;;  %v2481_v59 = vld [vmem:[#allocation11 + $0x4d0] sm:$0xff]  ;;  %v2483_v50 = vld [vmem:[#allocation11 + $0x4e0] sm:$0xff]  ;;  %v2490_v52 = vld [vmem:[#allocation11 + $0x518] sm:$0xff] }
 0x24b   : > { %4362 = vmatprep.subr.bf16.mxu0 %v4361_v54  ;;  %v2484_v54 = vld [vmem:[#allocation11 + $0x4e8] sm:$0xff]  ;;  %v4399_v48 = vpack.c.bf16 %v2481_v59, %v2479_v40  ;;  %v2487_v61 = vld [vmem:[#allocation11 + $0x500] sm:$0xff]  ;;  %v2494_v43 = vld [vmem:[#allocation11 + $0x538] sm:$0xff] }
 0x24c   : > { %v4401_v11 = vpack.c.bf16 %v2486_v46, %v2484_v54  ;;  %v2491_v49 = vld [vmem:[#allocation11 + $0x520] sm:$0xff]  ;;  %v2498_v0 = vld [vmem:[#allocation11 + $0x558] sm:$0xff]  ;;  %v2516_v60 = vld [vmem:[#allocation11 + $0x5e8] sm:$0xff] }
 0x24d   : > { %v2495_v19 = vld [vmem:[#allocation11 + $0x540] sm:$0xff]  ;;  %v2502_v39 = vld [vmem:[#allocation11 + $0x578] sm:$0xff]  ;;  %v2407_v12 = vld [vmem:[#allocation3 + $0x10] sm:$0x3] }
 0x24e   : > { %4364 = vmatpush1.bf16.msra.mxu0 %v4363_v55  ;;  %v2485_v55 = vld [vmem:[#allocation11 + $0x4f0] sm:$0xff]  ;;  %v2499_v7 = vld [vmem:[#allocation11 + $0x560] sm:$0xff]  ;;  %v2514_v31 = vld [vmem:[#allocation11 + $0x5d8] sm:$0xff]  ;;  %v2431_v54 = vrot.slane %v2407_v12, 2 }
 0x24f   : > { %4366 = vmatprep.subr.bf16.mxu0 %v4365_v37  ;;  %v2488_v37 = vld [vmem:[#allocation11 + $0x508] sm:$0xff]  ;;  %v4403_v25 = vpack.c.bf16 %v2485_v55, %v2483_v50  ;;  %v2518_v9 = vld [vmem:[#allocation11 + $0x5f8] sm:$0xff] }
 0x250   : > { %v4405_v27 = vpack.c.bf16 %v2490_v52, %v2488_v37  ;;  %v2410_v23 = vld [vmem:[#allocation3 + $0x28] sm:$0xfc]  ;;  %v2409_v59 = vld [vmem:[#allocation3 + $0x20] sm:$0xfc]  ;;  %v2416_v37 = vld [vmem:[#allocation3 + $0x58] sm:$0x3] }
 0x251   : > { %v2439_v40 = vrot.slane %v2410_v23, 2  ;;  %v2414_v46 = vld [vmem:[#allocation3 + $0x48] sm:$0xfc]  ;;  %v2436_v55 = vrot.slane %v2409_v59, 2 }
 0x252   : > { %4368 = vmatpush1.bf16.msra.mxu0 %v4367_v38  ;;  %v2489_v38 = vld [vmem:[#allocation11 + $0x510] sm:$0xff] }
 0x253   : > { %4370 = vmatprep.subr.bf16.mxu0 %v4369_v13  ;;  %v2492_v13 = vld [vmem:[#allocation11 + $0x528] sm:$0xff]  ;;  %v4407_v28 = vpack.c.bf16 %v2489_v38, %v2487_v61  ;;  %v2446_v38 = vrot.slane %v2416_v37, 2 }
 0x254   : > { %v4409_v58 = vpack.c.bf16 %v2494_v43, %v2492_v13  ;;  %v2415_v13 = vld [vmem:[#allocation3 + $0x50] sm:$0x3] }
 0x256   : > { %4372 = vmatpush1.bf16.msra.mxu0 %v4371_v26  ;;  %v2493_v26 = vld [vmem:[#allocation11 + $0x530] sm:$0xff] }
 0x257   : > { %4374 = vmatprep.subr.bf16.mxu0 %v4373_v16  ;;  %v2496_v16 = vld [vmem:[#allocation11 + $0x548] sm:$0xff]  ;;  %v4411_v51 = vpack.c.bf16 %v2493_v26, %v2491_v49  ;;  %v2443_v49 = vrot.slane %v2415_v13, 2 }
 0x258   : > { %v4413_v63 = vpack.c.bf16 %v2498_v0, %v2496_v16  ;;  %v2901_v16 = vld [vmem:[#allocation12] sm:$0xff]  ;;  %v2902_v0 = vld [vmem:[#allocation12 + $0x8] sm:$0xff] }
 0x259   : > { %2387 = vmatmul.mubr.f32.vlgmr.msra.gmra.mrb[12].mxu0 %v5986_v1  ;;  %v2434_v1 = vrot.slane %v2408_v17, 2  ;;  %v2503_v17 = vld [vmem:[#allocation11 + $0x580] sm:$0xff] }
 0x25a   : > { %2392 = vmatprep.mubr.f32.mxu0 %v6034_v22  ;;  %4376 = vmatpush1.bf16.msra.mxu0 %v4375_v6  ;;  %v4385_v22 = vpack.c.bf16 %v2470_v2, %v2468_v57  ;;  %v2497_v6 = vld [vmem:[#allocation11 + $0x550] sm:$0xff]  ;;  %v2508_v2 = vld [vmem:[#allocation11 + $0x5a8] sm:$0xff] }
 0x25b   : > { %4378 = vmatprep.subr.bf16.mxu0 %v4377_v53  ;;  %v2435_v36 = vsel %vm2429_vm10, %v2433_v45, %v2434_v1  ;;  %v2500_v53 = vld [vmem:[#allocation11 + $0x568] sm:$0xff]  ;;  %v4415_v62 = vpack.c.bf16 %v2497_v6, %v2495_v19  ;;  %v2505_v57 = vld [vmem:[#allocation11 + $0x590] sm:$0xff]  ;;  %v2510_v45 = vld [vmem:[#allocation11 + $0x5b8] sm:$0xff] }
 0x25c   : > { %v4417_v18 = vpack.c.bf16 %v2502_v39, %v2500_v53  ;;  %v4425_v1 = vpack.c.bf16 %v2510_v45, %v2508_v2  ;;  %v2904_v19 = vld [vmem:[#allocation12 + $0x18] sm:$0xff]  ;;  %v2905_v6 = vld [vmem:[#allocation12 + $0x20] sm:$0xff]  ;;  %v2906_v39 = vld [vmem:[#allocation12 + $0x28] sm:$0xff] }
 0x25d   : > { %2393 = vmatmul.mubr.f32.gmra.mrb[14].mxu0 %v6056_v15  ;;  %v4387_v15 = vpack.c.bf16 %v2469_v34, %v2467_v35  ;;  %v2509_v35 = vld [vmem:[#allocation11 + $0x5b0] sm:$0xff]  ;;  %v2512_v34 = vld [vmem:[#allocation11 + $0x5c8] sm:$0xff]  ;;  %v2913_v2 = vld [vmem:[#allocation12 + $0x60] sm:$0xff] }
 0x25e   : > { %2398 = vmatprep.mubr.f32.mxu0 %v6077_v8  ;;  %4380 = vmatpush1.bf16.msra.mxu0 %v4379_v21  ;;  %v2478_v8 = vld [vmem:[#allocation11 + $0x4b8] sm:$0xff]  ;;  %v2501_v21 = vld [vmem:[#allocation11 + $0x570] sm:$0xff]  ;;  %v2914_v45 = vld [vmem:[#allocation12 + $0x68] sm:$0xff] }
 0x25f   : > { %4382 = vmatprep.subr.bf16.mxu0 %v4381_v20  ;;  %v4393_v33 = vpack.c.bf16 %v2478_v8, %v2476_v56  ;;  %v2506_v20 = vld [vmem:[#allocation11 + $0x598] sm:$0xff]  ;;  %v4419_v42 = vpack.c.bf16 %v2501_v21, %v2499_v7  ;;  %v4433_v8 = vpack.c.bf16 %v2518_v9, %v2516_v60 }
 0x260   : > { %v4421_v4 = vpack.c.bf16 %v2506_v20, %v2504_v3  ;;  %v2908_v7 = vld [vmem:[#allocation12 + $0x38] sm:$0xff]  ;;  %v2909_v3 = vld [vmem:[#allocation12 + $0x40] sm:$0xff]  ;;  %v2910_v20 = vld [vmem:[#allocation12 + $0x48] sm:$0xff] }
 0x261   : > { %2399 = vmatmul.mubr.f32.gmra.mrb[16].mxu0 %v6080_v5  ;;  %v4395_v5 = vpack.c.bf16 %v2477_v24, %v2475_v44  ;;  %v2405_v44 = vld [vmem:[#allocation3] sm:$0xfc] }
 0x262   : > { %4384 = vmatpush1.bf16.msra.mxu0 %v4383_v29  ;;  %2583 = vmatprep.mubr.f32.mxu0 %v2435_v36  ;;  %v4423_v29 = vpack.c.bf16 %v2505_v57, %v2503_v17  ;;  %v4429_v36 = vpack.c.bf16 %v2514_v31, %v2512_v34  ;;  %v2912_v17 = vld [vmem:[#allocation12 + $0x58] sm:$0xff]  ;;  %v2882_v34 = vld [vmem:[#allocation12 + $0x80] sm:$0xff]  ;;  %v2883_v31 = vld [vmem:[#allocation12 + $0x88] sm:$0xff] }
 0x263   : > { %4386 = vmatprep.subr.bf16.mxu0 %v4385_v22  ;;  %v2507_v22 = vld [vmem:[#allocation11 + $0x5a0] sm:$0xff] }
 0x264   : > { %v4427_v32 = vpack.c.bf16 %v2509_v35, %v2507_v22  ;;  %v2916_v22 = vld [vmem:[#allocation12 + $0x78] sm:$0xff] }
 0x266   : > { %4388 = vmatpush1.bf16.msra.mxu0 %v4387_v15  ;;  %v2511_v15 = vld [vmem:[#allocation11 + $0x5c0] sm:$0xff] }
 0x267   : > { %4390 = vmatprep.subr.bf16.mxu0 %v4389_v47  ;;  %v2513_v47 = vld [vmem:[#allocation11 + $0x5d0] sm:$0xff] }
 0x268   : > { %v4431_v56 = vpack.c.bf16 %v2513_v47, %v2511_v15  ;;  %v6400_v47 = vld [vmem:[#allocation22_spill] sm:$0xff] }
 0x269   : > { %v6401_v60 = vsub.s32 1, %v6400_v47 }
 0x26a   : > { %4392 = vmatpush1.bf16.msra.mxu0 %v4391_v41  ;;  %v2515_v41 = vld [vmem:[#allocation11 + $0x5e0] sm:$0xff] }
 0x26b   : > { %4394 = vmatprep.subr.bf16.mxu0 %v4393_v33  ;;  %v2517_v33 = vld [vmem:[#allocation11 + $0x5f0] sm:$0xff] }
 0x26c   : > { %v4435_v24 = vpack.c.bf16 %v2517_v33, %v2515_v41 }
 0x26e   : > { %4396 = vmatpush1.bf16.msra.mxu0 %v4395_v5  ;;  %v2430_v5 = vrot.slane %v2405_v44, 2 }
 0x26f   : > { %4398 = vmatprep.subr.bf16.mxu0 %v4397_v14  ;;  %v2412_v14 = vld [vmem:[#allocation3 + $0x38] sm:$0x3] }
 0x270   : > { %v2432_v50 = vsel %vm2429_vm10, %v2430_v5, %v2431_v54 }
 0x272   : > { %4400 = vmatpush1.bf16.msra.mxu0 %v4399_v48  ;;  %v2440_v48 = vrot.slane %v2412_v14, 2 }
 0x273   : > { %4402 = vmatprep.subr.bf16.mxu0 %v4401_v11  ;;  %v2411_v11 = vld [vmem:[#allocation3 + $0x30] sm:$0x3] }
 0x274   : > { %v2441_v52 = vsel %vm2429_vm10, %v2439_v40, %v2440_v48  ;;  %v2437_v61 = vrot.slane %v2411_v11, 2 }
 0x276   : > { %4404 = vmatpush1.bf16.msra.mxu0 %v4403_v25  ;;  %v2445_v25 = vrot.slane %v2414_v46, 2  ;;  %v2438_v43 = vsel %vm2429_vm10, %v2436_v55, %v2437_v61 }
 0x277   : > { %4406 = vmatprep.subr.bf16.mxu0 %v4405_v27  ;;  %v2413_v27 = vld [vmem:[#allocation3 + $0x40] sm:$0xfc] }
 0x27a   : > { %4408 = vmatpush1.bf16.msra.mxu0 %v4407_v28  ;;  %v2442_v28 = vrot.slane %v2413_v27, 2 }
 0x27b   : > { %4410 = vmatprep.subr.bf16.mxu0 %v4409_v58  ;;  %v2447_v58 = vsel %vm2429_vm10, %v2445_v25, %v2446_v38 }
 0x27c   : > { %v2444_v26 = vsel %vm2429_vm10, %v2442_v28, %v2443_v49 }
 0x27e   : > { %4412 = vmatpush1.bf16.msra.mxu0 %v4411_v51  ;;  %v4437_v51 = vpack.c.bf16 %v2902_v0, %v2901_v16 }
 0x27f   : > { %4414 = vmatprep.subr.bf16.mxu0 %v4413_v63  ;;  %v2903_v63 = vld [vmem:[#allocation12 + $0x10] sm:$0xff] }
 0x280   : > { %4438 = vmatprep.subr.bf16.mxu1 %v4437_v51  ;;  %v4441_v53 = vpack.c.bf16 %v2904_v19, %v2903_v63 }
 0x281   : > { %4440 = vmatpush3.bf16.msra.mxu1 %v4437_v51 }
 0x282   : > { %4416 = vmatpush1.bf16.msra.mxu0 %v4415_v62  ;;  %v4445_v62 = vpack.c.bf16 %v2906_v39, %v2905_v6  ;;  %4442 = vmatprep.subr.bf16.mxu1 %v4441_v53 }
 0x283   : > { %4418 = vmatprep.subr.bf16.mxu0 %v4417_v18  ;;  %v2907_v18 = vld [vmem:[#allocation12 + $0x30] sm:$0xff] }
 0x284   : > { %v4449_v21 = vpack.c.bf16 %v2908_v7, %v2907_v18 }
 0x285   : > { %4444 = vmatpush3.bf16.msra.mxu1 %v4441_v53 }
 0x286   : > { %4420 = vmatpush1.bf16.msra.mxu0 %v4419_v42  ;;  %4446 = vmatprep.subr.bf16.mxu1 %v4445_v62  ;;  %v4453_v42 = vpack.c.bf16 %v2910_v20, %v2909_v3 }
 0x287   : > { %4422 = vmatprep.subr.bf16.mxu0 %v4421_v4  ;;  %v2911_v4 = vld [vmem:[#allocation12 + $0x50] sm:$0xff] }
 0x288   : > { %v4457_v57 = vpack.c.bf16 %v2912_v17, %v2911_v4 }
 0x289   : > { %4448 = vmatpush3.bf16.msra.mxu1 %v4445_v62 }
 0x28a   : > { %4424 = vmatpush1.bf16.msra.mxu0 %v4423_v29  ;;  %4450 = vmatprep.subr.bf16.mxu1 %v4449_v21  ;;  %v4461_v29 = vpack.c.bf16 %v2914_v45, %v2913_v2 }
 0x28b   : > { %4426 = vmatprep.subr.bf16.mxu0 %v4425_v1  ;;  %v2915_v1 = vld [vmem:[#allocation12 + $0x70] sm:$0xff] }
 0x28c   : > { %v4465_v35 = vpack.c.bf16 %v2916_v22, %v2915_v1 }
 0x28d   : > { %4452 = vmatpush3.bf16.msra.mxu1 %v4449_v21 }
 0x28e   : > { %4428 = vmatpush1.bf16.msra.mxu0 %v4427_v32  ;;  %4454 = vmatprep.subr.bf16.mxu1 %v4453_v42  ;;  %v6094_v32 = vpack.c.bf16 %v2883_v31, %v2882_v34 }
 0x28f   : > { %4430 = vmatprep.subr.bf16.mxu0 %v4429_v36  ;;  %v2608_v36 = vld [vmem:[%s6244_s4] sm:$0x3] }
 0x290   : > { %v2613_v15 = vrot.slane %v2608_v36, %v5461_v30  ;;  %v2617_v9 = vrot.slane %v2608_v36, %v6401_v60 }
 0x291   : > { %4456 = vmatpush3.bf16.msra.mxu1 %v4453_v42 }
 0x292   : > { %4432 = vmatpush1.bf16.msra.mxu0 %v4431_v56  ;;  %4458 = vmatprep.subr.bf16.mxu1 %v4457_v57 }
 0x293   : > { %4434 = vmatprep.subr.bf16.mxu0 %v4433_v8 }
 0x295   : > { %4460 = vmatpush3.bf16.msra.mxu1 %v4457_v57 }
 0x296   : > { %4436 = vmatpush1.bf16.msra.mxu0 %v4435_v24  ;;  %4462 = vmatprep.subr.bf16.mxu1 %v4461_v29 }
 0x299   : > { %2584 = vmatmul.mubr.f32.vlgmr.msra.gmra.mrb[12].mxu0 %v2432_v50  ;;  %4464 = vmatpush3.bf16.msra.mxu1 %v4461_v29 }
 0x29a   : > { %2589 = vmatprep.mubr.f32.mxu0 %v2441_v52  ;;  %4466 = vmatprep.subr.bf16.mxu1 %v4465_v35 }
 0x29d   : > { %2590 = vmatmul.mubr.f32.gmra.mrb[14].mxu0 %v2438_v43  ;;  %4468 = vmatpush3.bf16.msra.mxu1 %v4465_v35 }
 0x29e   : > { %2595 = vmatprep.mubr.f32.mxu0 %v2447_v58  ;;  %4470 = vmatprep.subr.bf16.mxu1 %v6094_v32 }
 0x2a1   : > { %2596 = vmatmul.mubr.f32.gmra.mrb[16].mxu0 %v2444_v26 }
 0x36c   : > { %v2585_v56 = vpop.f32.mrb[12].mxu0 }
 0x36d   : > { %v2620_v8 = vadd.f32 %v2613_v15, %v2585_v56  ;;  %v2587_v41 = vpop.f32.mrb[13].mxu0 }
 0x36e   : > { %v2621_v33 = vadd.f32 %v2617_v9, %v2587_v41 }
 0x36f   : > { %v2626_v44 = vmax.f32 %v2620_v8, 0.0 }
 0x370   : > { %v2627_v24 = vmax.f32 %v2621_v33, 0.0  ;;  %v2591_v23 = vpop.f32.mrb[14].mxu0 }
 0x371   : > { %v2622_v12 = vadd.f32 %v2613_v15, %v2591_v23  ;;  %v2593_v5 = vpop.f32.mrb[15].mxu0 }
 0x372   : > { %v2638_v14 = vcombine.low %v2626_v44, %v2627_v24  ;;  %v2639_v40 = vcombine.high %v2626_v44, %v2627_v24  ;;  %v2623_v59 = vadd.f32 %v2617_v9, %v2593_v5 }
 0x373   : > { %v2628_v54 = vmax.f32 %v2622_v12, 0.0 }
 0x374   : > { %v2646_v46 = vrot.slane %v2638_v14, %v5559_v10  ;;  %v2653_v48 = vrot.slane %v2639_v40, %v5559_v10  ;;  %v2629_v11 = vmax.f32 %v2623_v59, 0.0  ;;  %v2597_v50 = vpop.f32.mrb[16].mxu0 }
 0x375   : > { %v2624_v55 = vadd.f32 %v2613_v15, %v2597_v50  ;;  %v2599_v37 = vpop.f32.mrb[17].mxu0 }
 0x376   : > { %v2654_v52 = vcombine.high %v2646_v46, %v2646_v46  ;;  %v2655_v25 = vcombine.high %v2653_v48, %v2653_v48  ;;  %v3871_v27 = vrot.slane %v2646_v46, 9  ;;  %v3873_v61 = vrot.slane %v2653_v48, 9 }
 0x377   : > { %v2656_v38 = vcombine.low %v2628_v54, %v2629_v11  ;;  %v2657_v13 = vcombine.high %v2628_v54, %v2629_v11  ;;  %v2625_v43 = vadd.f32 %v2617_v9, %v2599_v37  ;;  %v2630_v51 = vmax.f32 %v2624_v55, 0.0 }
 0x378   : > { %v3872_v28 = vrot.slane %v2654_v52, 9  ;;  %v3874_v58 = vrot.slane %v2655_v25, 9  ;;  %v2740_v49 = vmax.f32 %v2646_v46, %v3871_v27  ;;  %v2742_v26 = vmax.f32 %v2653_v48, %v3873_v61 }
 0x379   : > { %v2664_v16 = vrot.slane %v2656_v38, %v5559_v10  ;;  %v2671_v0 = vrot.slane %v2657_v13, %v5559_v10  ;;  %v2631_v63 = vmax.f32 %v2625_v43, 0.0 }
 0x37a   : > { %v2741_v19 = vmax.f32 %v2654_v52, %v3872_v28  ;;  %v2743_v6 = vmax.f32 %v2655_v25, %v3874_v58  ;;  %v2764_v53 = vrot.slane %v2740_v49, 2  ;;  %v2766_v39 = vrot.slane %v2742_v26, 2 }
 0x37b   : > { %v2672_v62 = vcombine.high %v2664_v16, %v2664_v16  ;;  %v2673_v18 = vcombine.high %v2671_v0, %v2671_v0  ;;  %v3875_v7 = vrot.slane %v2664_v16, 9  ;;  %v3877_v21 = vrot.slane %v2671_v0, 9 }
 0x37c   : > { %v2765_v3 = vrot.slane %v2741_v19, 2  ;;  %v2767_v20 = vrot.slane %v2743_v6, 2  ;;  %v2788_v42 = vmax.f32 %v2740_v49, %v2764_v53  ;;  %v2790_v4 = vmax.f32 %v2742_v26, %v2766_v39 }
 0x37d   : > { %v3876_v17 = vrot.slane %v2672_v62, 9  ;;  %v3878_v57 = vrot.slane %v2673_v18, 9  ;;  %v2744_v2 = vmax.f32 %v2664_v16, %v3875_v7  ;;  %v2746_v45 = vmax.f32 %v2671_v0, %v3877_v21 }
 0x37e   : > { %v2789_v29 = vmax.f32 %v2741_v19, %v2765_v3  ;;  %v2791_v1 = vmax.f32 %v2743_v6, %v2767_v20  ;;  %v2821_v22 = vrot.slane %v2788_v42, %v5461_v30  ;;  %v2829_v47 = vrot.slane %v2790_v4, %v5461_v30 }
 0x37f   : > { %v2745_v35 = vmax.f32 %v2672_v62, %v3876_v17  ;;  %v2747_v34 = vmax.f32 %v2673_v18, %v3878_v57  ;;  %v2768_v31 = vrot.slane %v2744_v2, 2  ;;  %v2770_v36 = vrot.slane %v2746_v45, 2 }
 0x380   : > { %v2825_v15 = vrot.slane %v2789_v29, %v5461_v30  ;;  %v2674_v60 = vcombine.low %v2630_v51, %v2631_v63  ;;  %v2675_v9 = vcombine.high %v2630_v51, %v2631_v63  ;;  %v2833_v44 = vrot.slane %v2791_v1, %v5461_v30  ;;  %v2885_v29 = vld [vmem:[#allocation12 + $0x98] sm:$0xff] }
 0x381   : > { %v2769_v56 = vrot.slane %v2745_v35, 2  ;;  %v2771_v8 = vrot.slane %v2747_v34, 2  ;;  %v2792_v41 = vmax.f32 %v2744_v2, %v2768_v31  ;;  %v2794_v33 = vmax.f32 %v2746_v45, %v2770_v36  ;;  %v2884_v45 = vld [vmem:[#allocation12 + $0x90] sm:$0xff] }
 0x382   : > { %v2866_v24 = vsel %vm2273_vm4, %v2825_v15, %v2821_v22  ;;  %v2682_v23 = vrot.slane %v2674_v60, %v5559_v10  ;;  %v2689_v12 = vrot.slane %v2675_v9, %v5559_v10  ;;  %v4473_v1 = vpack.c.bf16 %v2885_v29, %v2884_v45  ;;  %v2888_v36 = vld [vmem:[#allocation12 + $0xb0] sm:$0xff]  ;;  %v2889_v15 = vld [vmem:[#allocation12 + $0xb8] sm:$0xff]  ;;  %v2890_v60 = vld [vmem:[#allocation12 + $0xc0] sm:$0xff] }
 0x383   : > { %v2867_v5 = vsel %vm1989_vm3, %v2829_v47, %v2866_v24  ;;  %v2793_v14 = vmax.f32 %v2745_v35, %v2769_v56  ;;  %v2795_v40 = vmax.f32 %v2747_v34, %v2771_v8  ;;  %v2837_v59 = vrot.slane %v2792_v41, %v5461_v30  ;;  %v2886_v35 = vld [vmem:[#allocation12 + $0xa0] sm:$0xff]  ;;  %v2887_v34 = vld [vmem:[#allocation12 + $0xa8] sm:$0xff]  ;;  %v2892_v8 = vld [vmem:[#allocation12 + $0xd0] sm:$0xff] }
 0x384   : > { %v2868_v54 = vsel %vm1991_vm5, %v2833_v44, %v2867_v5  ;;  %v2690_v46 = vcombine.high %v2682_v23, %v2682_v23  ;;  %v2691_v48 = vcombine.high %v2689_v12, %v2689_v12  ;;  %v2845_v50 = vrot.slane %v2794_v33, %v5461_v30  ;;  %v2891_v9 = vld [vmem:[#allocation12 + $0xc8] sm:$0xff]  ;;  %v2893_v41 = vld [vmem:[#allocation12 + $0xd8] sm:$0xff]  ;;  %v2894_v44 = vld [vmem:[#allocation12 + $0xe0] sm:$0xff] }
 0x385   : > { %2878 = vst [vmem:[#allocation4 + $0x1] sm:$0xf] %v2868_v54  ;;  %v2841_v11 = vrot.slane %v2793_v14, %v5461_v30  ;;  %v3879_v55 = vrot.slane %v2682_v23, 9  ;;  %v3881_v37 = vrot.slane %v2689_v12, 9  ;;  %v2849_v52 = vrot.slane %v2795_v40, %v5461_v30  ;;  %v3080_v14 = vld [vmem:[#allocation12 + $0x100] sm:$0xff]  ;;  %v3081_v40 = vld [vmem:[#allocation12 + $0x108] sm:$0xff] }
 0x386   : > { %v3880_v25 = vrot.slane %v2690_v46, 9  ;;  %v3882_v27 = vrot.slane %v2691_v48, 9  ;;  %v2996_v61 = vsel %vm1993_vm6, %v2837_v59, %v2868_v54  ;;  %v4477_v31 = vpack.c.bf16 %v2887_v34, %v2886_v35  ;;  %v3082_v54 = vld [vmem:[#allocation12 + $0x110] sm:$0xff]  ;;  %v3334_v35 = vld [vmem:[#allocation14 + $0x8] sm:$0xff] }
 0x387   : > { %v2869_v38 = vsel %vm2273_vm4, %v2841_v11, %v2837_v59  ;;  %v2748_v13 = vmax.f32 %v2682_v23, %v3879_v55  ;;  %v2750_v43 = vmax.f32 %v2689_v12, %v3881_v37  ;;  %v2997_v28 = vsel %vm1995_vm7, %v2841_v11, %v2996_v61  ;;  %v2896_v23 = vld [vmem:[#allocation12 + $0xf0] sm:$0xff]  ;;  %v2897_v12 = vld [vmem:[#allocation12 + $0xf8] sm:$0xff]  ;;  %v3085_v55 = vld [vmem:[#allocation12 + $0x128] sm:$0xff] }
 0x388   : > { %v2870_v58 = vsel %vm1989_vm3, %v2845_v50, %v2869_v38  ;;  %v2749_v49 = vmax.f32 %v2690_v46, %v3880_v25  ;;  %v2751_v26 = vmax.f32 %v2691_v48, %v3882_v27  ;;  %v2998_v16 = vsel %vm1997_vm8, %v2845_v50, %v2997_v28  ;;  %v3083_v46 = vld [vmem:[#allocation12 + $0x118] sm:$0xff]  ;;  %v3084_v50 = vld [vmem:[#allocation12 + $0x120] sm:$0xff]  ;;  %v3089_v38 = vld [vmem:[#allocation12 + $0x148] sm:$0xff] }
 0x389   : > { %v2871_v0 = vsel %vm1991_vm5, %v2849_v52, %v2870_v58  ;;  %v2772_v51 = vrot.slane %v2748_v13, 2  ;;  %v2774_v63 = vrot.slane %v2750_v43, 2  ;;  %v2999_v19 = vsel %vm1999_vm9, %v2849_v52, %v2998_v16  ;;  %v3086_v52 = vld [vmem:[#allocation12 + $0x130] sm:$0xff]  ;;  %v3087_v25 = vld [vmem:[#allocation12 + $0x138] sm:$0xff]  ;;  %v3088_v61 = vld [vmem:[#allocation12 + $0x140] sm:$0xff] }
 0x38a   : > { %2879 = vst [vmem:[#allocation4 + $0x9] sm:$0xf] %v2871_v0  ;;  %v2773_v6 = vrot.slane %v2749_v49, 2  ;;  %v2775_v53 = vrot.slane %v2751_v26, 2  ;;  %v4481_v47 = vpack.c.bf16 %v2889_v15, %v2888_v36  ;;  %v4485_v56 = vpack.c.bf16 %v2891_v9, %v2890_v60  ;;  %v3091_v28 = vld [vmem:[#allocation12 + $0x158] sm:$0xff]  ;;  %v3094_v0 = vld [vmem:[#allocation12 + $0x170] sm:$0xff] }
 0x38b   : > { %v2796_v39 = vmax.f32 %v2748_v13, %v2772_v51  ;;  %v2798_v62 = vmax.f32 %v2750_v43, %v2774_v63  ;;  %v4489_v33 = vpack.c.bf16 %v2893_v41, %v2892_v8  ;;  %v4497_v5 = vpack.c.bf16 %v2897_v12, %v2896_v23  ;;  %v3090_v43 = vld [vmem:[#allocation12 + $0x150] sm:$0xff]  ;;  %v3095_v51 = vld [vmem:[#allocation12 + $0x178] sm:$0xff] }
 0x38c   : > { %v2797_v18 = vmax.f32 %v2749_v49, %v2773_v6  ;;  %v2799_v7 = vmax.f32 %v2751_v26, %v2775_v53  ;;  %v4501_v59 = vpack.c.bf16 %v3081_v40, %v3080_v14  ;;  %v4505_v48 = vpack.c.bf16 %v3083_v46, %v3082_v54  ;;  %v3092_v49 = vld [vmem:[#allocation12 + $0x160] sm:$0xff]  ;;  %v3093_v26 = vld [vmem:[#allocation12 + $0x168] sm:$0xff]  ;;  %v3883_v6 = vld [vmem:[%s6246_s6] ss:$0 sm:$0xff] }
 0x38d   : > { %v2853_v21 = vrot.slane %v2796_v39, %v5461_v30  ;;  %v2861_v20 = vrot.slane %v2798_v62, %v5461_v30  ;;  %v4509_v37 = vpack.c.bf16 %v3085_v55, %v3084_v50  ;;  %v4513_v27 = vpack.c.bf16 %v3087_v25, %v3086_v52  ;;  %v3336_v8 = vld [vmem:[#allocation14 + $0x18] sm:$0xff]  ;;  %v3339_v14 = vld [vmem:[#allocation14 + $0x30] sm:$0xff] }
 0x38e   : > { %v2857_v3 = vrot.slane %v2797_v18, %v5461_v30  ;;  %v2865_v42 = vrot.slane %v2799_v7, %v5461_v30  ;;  %v4517_v13 = vpack.c.bf16 %v3089_v38, %v3088_v61  ;;  %v4521_v58 = vpack.c.bf16 %v3091_v28, %v3090_v43  ;;  %v3340_v40 = vld [vmem:[#allocation14 + $0x38] sm:$0xff] }
 0x38f   : > { %v4525_v16 = vpack.c.bf16 %v3093_v26, %v3092_v49  ;;  %v4529_v63 = vpack.c.bf16 %v3095_v51, %v3094_v0  ;;  %v4975_v15 = vmov 0.0|0.0   ;;  %v4543_v54 = vpack.c.bf16 %v3340_v40, %v3339_v14 }
 0x390   : > { %v2872_v4 = vsel %vm2273_vm4, %v2857_v3, %v2853_v21 }
 0x391   : > { %v2873_v17 = vsel %vm1989_vm3, %v2861_v20, %v2872_v4  ;;  %v4737_v57 = vld [vmem:[#allocation4] ss:$8 sps:$4 sm:$0xff]  }
 0x392   : > { %v2874_v2 = vsel %vm1991_vm5, %v2865_v42, %v2873_v17  ;;  %4019 = vmatprep.mubr.f32.mxu1 %v4737_v57  ;;  %v4738_v11 = vld [vmem:[#allocation4 + $0x2] ss:$8 sps:$4 sm:$0xff]  }
 0x393   : > { %2880 = vst [vmem:[#allocation4 + $0x11] sm:$0xf] %v2874_v2 }
 0x39a   : > { %v2900_v22 = vld [vmem:[#allocation4 + $0x10] sm:$0xf] }
 0x39b   : > { %4020 = vmatmul.mubr.f32.vlgmr.msra.gmra.mrb[24].mxu1 %v2900_v22  ;;  %v3333_v22 = vld [vmem:[#allocation14] sm:$0xff] }
 0x39c   : > { %4472 = vmatpush3.bf16.msra.mxu1 %v6094_v32  ;;  %4054 = vmatprep.mubr.f32.mxu1 %v2999_v19  ;;  %v2895_v32 = vld [vmem:[#allocation12 + $0xe8] sm:$0xff] }
 0x39d   : > { %4474 = vmatprep.subr.bf16.mxu1 %v4473_v1  ;;  %v4493_v24 = vpack.c.bf16 %v2895_v32, %v2894_v44  ;;  %v3078_v19 = vld [vmem:[#allocation4 + $0x12] sm:$0xf]  ;;  %v6402_v32 = vmov 0.0  }
 0x39e   : > { %v3338_v44 = vld [vmem:[#allocation14 + $0x28] sm:$0xff] }
 0x3a0   : > { %4476 = vmatpush3.bf16.msra.mxu1 %v4473_v1 }
 0x3a1   : > { %4478 = vmatprep.subr.bf16.mxu1 %v4477_v31 }
 0x3a4   : > { %4480 = vmatpush3.bf16.msra.mxu1 %v4477_v31 }
 0x3a5   : > { %4482 = vmatprep.subr.bf16.mxu1 %v4481_v47 }
 0x3a8   : > { %4484 = vmatpush3.bf16.msra.mxu1 %v4481_v47  ;;  %v4534_v47 = vpack.c.bf16 %v3334_v35, %v3333_v22 }
 0x3a9   : > { %4486 = vmatprep.subr.bf16.mxu1 %v4485_v56 }
 0x3ac   : > { %4488 = vmatpush3.bf16.msra.mxu1 %v4485_v56  ;;  %v3335_v56 = vld [vmem:[#allocation14 + $0x10] sm:$0xff] }
 0x3ad   : > { %4490 = vmatprep.subr.bf16.mxu1 %v4489_v33  ;;  %v4537_v41 = vpack.c.bf16 %v3336_v8, %v3335_v56  ;;  %v3518_v8 = vld [vmem:[#allocation14 + $0xb0] sm:$0xff] }
 0x3b0   : > { %4492 = vmatpush3.bf16.msra.mxu1 %v4489_v33  ;;  %v3337_v33 = vld [vmem:[#allocation14 + $0x20] sm:$0xff] }
 0x3b1   : > { %4494 = vmatprep.subr.bf16.mxu1 %v4493_v24 }
 0x3b4   : > { %4496 = vmatpush3.bf16.msra.mxu1 %v4493_v24 }
 0x3b5   : > { %4498 = vmatprep.subr.bf16.mxu1 %v4497_v5 }
 0x3b8   : > { %4500 = vmatpush3.bf16.msra.mxu1 %v4497_v5  ;;  %v4540_v5 = vpack.c.bf16 %v3338_v44, %v3337_v33 }
 0x3b9   : > { %4502 = vmatprep.subr.bf16.mxu1 %v4501_v59 }
 0x3bb   : > { %4055 = vmatmul.mubr.f32.vlgmr.msra.gmra.mrb[24].mxu1 %v2874_v2 }
 0x3bc   : > { %4504 = vmatpush3.bf16.msra.mxu1 %v4501_v59  ;;  %4089 = vmatprep.mubr.f32.mxu1 %v4738_v11 }
 0x3bd   : > { %4506 = vmatprep.subr.bf16.mxu1 %v4505_v48 }
 0x3c0   : > { %4508 = vmatpush3.bf16.msra.mxu1 %v4505_v48 }
 0x3c1   : > { %4510 = vmatprep.subr.bf16.mxu1 %v4509_v37 }
 0x3c4   : > { %4512 = vmatpush3.bf16.msra.mxu1 %v4509_v37 }
 0x3c5   : > { %4514 = vmatprep.subr.bf16.mxu1 %v4513_v27 }
 0x3c8   : > { %4516 = vmatpush3.bf16.msra.mxu1 %v4513_v27 }
 0x3c9   : > { %4518 = vmatprep.subr.bf16.mxu1 %v4517_v13 }
 0x3cc   : > { %4520 = vmatpush3.bf16.msra.mxu1 %v4517_v13 }
 0x3cd   : > { %4522 = vmatprep.subr.bf16.mxu1 %v4521_v58 }
 0x3d0   : > { %4524 = vmatpush3.bf16.msra.mxu1 %v4521_v58 }
 0x3d1   : > { %4526 = vmatprep.subr.bf16.mxu1 %v4525_v16 }
 0x3d4   : > { %4528 = vmatpush3.bf16.msra.mxu1 %v4525_v16 }
 0x3d5   : > { %4530 = vmatprep.subr.bf16.mxu1 %v4529_v63 }
 0x3d8   : > { %4532 = vmatpush3.bf16.msra.mxu1 %v4529_v63 }
 0x3d9   : > { %4533 = vmatprep.subr.bf16.mxu1 %v4975_v15 }
 0x3db   : > { %4090 = vmatmul.mubr.f32.vlgmr.msra.gmra.mrb[24].mxu1 %v3078_v19 }
 0x3dc   : > { %4535 = vmatpush3.bf16.msra.mxu1 %v4534_v47  ;;  %4108 = vmatprep.mubr.msk.f32.mxu1 %vm4976_vm11, %v6402_v32 }
 0x3dd   : > { %4536 = vmatprep.subr.bf16.mxu1 %v4975_v15 }
 0x3e0   : > { %4538 = vmatpush3.bf16.msra.mxu1 %v4537_v41  ;;  %v3519_v41 = vld [vmem:[#allocation14 + $0xb8] sm:$0xff] }
 0x3e1   : > { %4539 = vmatprep.subr.bf16.mxu1 %v4975_v15  ;;  %v4567_v44 = vpack.c.bf16 %v3519_v41, %v3518_v8 }
 0x3e4   : > { %4541 = vmatpush3.bf16.msra.mxu1 %v4540_v5 }
 0x3e5   : > { %4542 = vmatprep.subr.bf16.mxu1 %v4975_v15 }
 0x3e8   : > { %4544 = vmatpush3.bf16.msra.mxu1 %v4543_v54  ;;  %v3895_v54 = vld [vmem:[%s6248_s8] ss:$0 sm:$0xff] }
 0x3e9   : > { %4545 = vmatprep.subr.bf16.mxu1 %v4975_v15 }
 0x4ae   : > { %v4091_v53 = vpop.f32.mrb[24].mxu1 }
 0x4af   : > { %v3185_v39 = vadd.f32 %v4091_v53, %v3883_v6  ;;  %v3166_v62 = vpop.f32.mrb[25].mxu1  ;;  %v3323_v53 = vld [vmem:[#allocation14 + $0x48] sm:$0xff] }
 0x4b0   : > { %v3184_v18 = vadd.f32 %v3883_v6, %v3166_v62  ;;  %v3322_v6 = vld [vmem:[#allocation14 + $0x40] sm:$0xff] }
 0x4b1   : > { %v3187_v7 = vmax.f32 %v3185_v39, 0.0  ;;  %v4546_v62 = vpack.c.bf16 %v3323_v53, %v3322_v6 }
 0x4b2   : > { %v3186_v21 = vmax.f32 %v3184_v18, 0.0 }
 0x4b3   : > { %v3213_v42 = vrot.slane %v3187_v7, %v5559_v10  ;;  %v3324_v7 = vld [vmem:[#allocation14 + $0x50] sm:$0xff] }
 0x4b4   : > { %v3190_v3 = vcombine.high %v3186_v21, %v3186_v21  ;;  %v3197_v20 = vrot.slane %v3186_v21, %v5559_v10  ;;  %v3325_v21 = vld [vmem:[#allocation14 + $0x58] sm:$0xff] }
 0x4b5   : > { %v3214_v36 = vcombine.high %v3213_v42, %v3213_v42  ;;  %v3888_v9 = vrot.slane %v3213_v42, 9 }
 0x4b6   : > { %v3204_v4 = vrot.slane %v3190_v3, %v5559_v10  ;;  %v3884_v17 = vrot.slane %v3197_v20, 9  ;;  %v3205_v57 = vcombine.high %v3197_v20, %v3197_v20  ;;  %v4549_v3 = vpack.c.bf16 %v3325_v21, %v3324_v7 }
 0x4b7   : > { %v3889_v23 = vrot.slane %v3214_v36, 9  ;;  %v3243_v12 = vmax.f32 %v3213_v42, %v3888_v9  ;;  %v3517_v9 = vld [vmem:[#allocation14 + $0xa8] sm:$0xff] }
 0x4b8   : > { %v3239_v2 = vmax.f32 %v3197_v20, %v3884_v17  ;;  %v3886_v45 = vrot.slane %v3204_v4, 9  ;;  %v3885_v29 = vrot.slane %v3205_v57, 9  ;;  %v3206_v1 = vcombine.high %v3204_v4, %v3204_v4  ;;  %v3327_v20 = vld [vmem:[#allocation14 + $0x68] sm:$0xff]  ;;  %v3328_v17 = vld [vmem:[#allocation14 + $0x70] sm:$0xff] }
 0x4b9   : > { %v3244_v59 = vmax.f32 %v3214_v36, %v3889_v23 }
 0x4ba   : > { %3251 = vrot.lane.b32.xlu0 %v3239_v2, %s4974_s30  ;;  %v3241_v34 = vmax.f32 %v3204_v4, %v3886_v45  ;;  %v3887_v31 = vrot.slane %v3206_v1, 9  ;;  %v3240_v60 = vmax.f32 %v3205_v57, %v3885_v29  ;;  %v3329_v57 = vld [vmem:[#allocation14 + $0x78] sm:$0xff]  ;;  %v3512_v29 = vld [vmem:[#allocation14 + $0x80] sm:$0xff] }
 0x4bb   : > { %v4555_v45 = vpack.c.bf16 %v3329_v57, %v3328_v17 }
 0x4bc   : > { %3255 = vrot.lane.b32.xlu1 %v3241_v34, %s4974_s30  ;;  %v3242_v24 = vmax.f32 %v3206_v1, %v3887_v31  ;;  %v3513_v1 = vld [vmem:[#allocation14 + $0x88] sm:$0xff]  ;;  %v3515_v31 = vld [vmem:[#allocation14 + $0x98] sm:$0xff] }
 0x4bd   : > { %v4558_v35 = vpack.c.bf16 %v3513_v1, %v3512_v29 }
 0x4be   : > { %3253 = vrot.lane.b32.xlu0 %v3240_v60, %s4974_s30 }
 0x4c0   : > { %3257 = vrot.lane.b32.xlu1 %v3242_v24, %s4974_s30 }
 0x4c2   : > { %3259 = vrot.lane.b32.xlu0 %v3243_v12, %s4974_s30 }
 0x4c4   : > { %3261 = vrot.lane.b32.xlu1 %v3244_v59, %s4974_s30 }
 0x52c   : > { %v3252_v46 = vpop.permute.xlu0 %3251 }
 0x52d   : > { %v3269_v11 = vmax.f32 %v3239_v2, %v3252_v46 }
 0x52e   : > { %v3256_v48 = vpop.permute.xlu1 %3255 }
 0x52f   : > { %v3271_v55 = vmax.f32 %v3241_v34, %v3256_v48  ;;  %v3290_v25 = vrot.slane %v3269_v11, %v5461_v30  ;;  %v3514_v34 = vld [vmem:[#allocation14 + $0x90] sm:$0xff] }
 0x530   : > { %v3254_v50 = vpop.permute.xlu0 %3253  ;;  %v4561_v47 = vpack.c.bf16 %v3515_v31, %v3514_v34 }
 0x531   : > { %v3270_v37 = vmax.f32 %v3240_v60, %v3254_v50  ;;  %v3298_v13 = vrot.slane %v3271_v55, %v5461_v30  ;;  %v3516_v60 = vld [vmem:[#allocation14 + $0xa0] sm:$0xff] }
 0x532   : > { %v3258_v52 = vpop.permute.xlu1 %3257  ;;  %v4564_v56 = vpack.c.bf16 %v3517_v9, %v3516_v60 }
 0x533   : > { %v3294_v27 = vrot.slane %v3270_v37, %v5461_v30  ;;  %v3272_v61 = vmax.f32 %v3242_v24, %v3258_v52 }
 0x534   : > { %v3260_v38 = vpop.permute.xlu0 %3259 }
 0x535   : > { %v3311_v43 = vsel %vm2273_vm4, %v3294_v27, %v3290_v25  ;;  %v3302_v28 = vrot.slane %v3272_v61, %v5461_v30  ;;  %v3273_v58 = vmax.f32 %v3243_v12, %v3260_v38 }
 0x536   : > { %3318 = vst.msk [vmem:[#allocation5 + $0x1] sm:$0x3] %vm3317_vm12, %v3311_v43  ;;  %v3262_v49 = vpop.permute.xlu1 %3261  ;;  %v3432_v4 = vsel %vm1989_vm3, %v3298_v13, %v3311_v43 }
 0x537   : > { %v3312_v26 = vsel %vm2273_vm4, %v3302_v28, %v3298_v13  ;;  %v3274_v16 = vmax.f32 %v3244_v59, %v3262_v49  ;;  %v3306_v0 = vrot.slane %v3273_v58, %v5461_v30  ;;  %v3433_v2 = vsel %vm1991_vm5, %v3302_v28, %v3432_v4 }
 0x538   : > { %3319 = vst.msk [vmem:[#allocation5 + $0x5] sm:$0x3] %vm3317_vm12, %v3312_v26 }
 0x539   : > { %v3310_v51 = vrot.slane %v3274_v16, %v5461_v30  ;;  %v3326_v30 = vld [vmem:[#allocation14 + $0x60] sm:$0xff]  ;;  %v3434_v22 = vsel %vm1993_vm6, %v3306_v0, %v3433_v2 }
 0x53a   : > { %v4552_v42 = vpack.c.bf16 %v3327_v20, %v3326_v30 }
 0x53b   : > { %v3313_v63 = vsel %vm2273_vm4, %v3310_v51, %v3306_v0  ;;  %v3435_v36 = vsel %vm1995_vm7, %v3310_v51, %v3434_v22 }
 0x53c   : > { %3320 = vst.msk [vmem:[#allocation5 + $0x9] sm:$0x3] %vm3317_vm12, %v3313_v63 }
 0x53f   : > { %v4741_v19 = vld.sshfl [vmem:[#allocation5] sm:$0xf pattern:$0x76325410] }
 0x540   : > { %v4742_v33 = vld.sshfl [vmem:[#allocation5 + $0x2] sm:$0xf pattern:$0x76325410] }
 0x543   : > { %v3890_v39 = vld.sshfl [vmem:[#allocation5 + $0x8] sm:$0x3 pattern:$0x76325410] }
 0x544   : > { %v3359_v18 = vcombine.low %v4741_v19, %v3890_v39  ;;  %v3893_v24 = vld.sshfl [vmem:[#allocation5 + $0xa] sm:$0x3 pattern:$0x76325410] }
 0x545   : > { %v3538_v23 = vcombine.low %v4742_v33, %v3893_v24 }
 0x546   : > { %4109 = vmatmul.mubr.msk.f32.vlgmr.msra.gmra.mrb[26].mxu1 %vm425_vm1, %v3359_v18 }
 0x547   : > { %4547 = vmatpush3.bf16.msra.mxu1 %v4546_v62  ;;  %4127 = vmatprep.mubr.msk.f32.mxu1 %vm4976_vm11, %v6402_v32 }
 0x548   : > { %4548 = vmatprep.subr.bf16.mxu1 %v4975_v15 }
 0x54b   : > { %4550 = vmatpush3.bf16.msra.mxu1 %v4549_v3 }
 0x54c   : > { %4551 = vmatprep.subr.bf16.mxu1 %v4975_v15 }
 0x54f   : > { %4553 = vmatpush3.bf16.msra.mxu1 %v4552_v42 }
 0x550   : > { %4554 = vmatprep.subr.bf16.mxu1 %v4975_v15 }
 0x553   : > { %4556 = vmatpush3.bf16.msra.mxu1 %v4555_v45 }
 0x554   : > { %4557 = vmatprep.subr.bf16.mxu1 %v4975_v15 }
 0x556   : > { %4128 = vmatmul.mubr.msk.f32.vlgmr.msra.gmra.mrb[28].mxu1 %vm425_vm1, %v3435_v36 }
 0x557   : > { %4559 = vmatpush3.bf16.msra.mxu1 %v4558_v35  ;;  %4146 = vmatprep.mubr.msk.f32.mxu1 %vm4976_vm11, %v6402_v32 }
 0x558   : > { %4560 = vmatprep.subr.bf16.mxu1 %v4975_v15 }
 0x55b   : > { %4562 = vmatpush3.bf16.msra.mxu1 %v4561_v47 }
 0x55c   : > { %4563 = vmatprep.subr.bf16.mxu1 %v4975_v15 }
 0x55f   : > { %4565 = vmatpush3.bf16.msra.mxu1 %v4564_v56 }
 0x560   : > { %4566 = vmatprep.subr.bf16.mxu1 %v4975_v15 }
 0x563   : > { %4568 = vmatpush3.bf16.msra.mxu1 %v4567_v44 }
 0x566   : > { %4147 = vmatmul.mubr.msk.f32.vlgmr.msra.gmra.mrb[30].mxu1 %vm425_vm1, %v3538_v23 }
 0x619   : > { %v3428_v32 = vpop.f32.mrb[26].mxu1 }
 0x61a   : > { %v4110_v12 = vpop.f32.mrb[27].mxu1 }
 0x629   : > { %v3504_v5 = vpop.f32.mrb[28].mxu1 }
 0x62a   : > { %v3505_v14 = vadd.f32 %v3504_v5, %v3428_v32  ;;  %v4129_v40 = vpop.f32.mrb[29].mxu1 }
 0x639   : > { %v3607_v59 = vpop.f32.mrb[30].mxu1 }
 0x63a   : > { %v3611_v46 = vadd.f32 %v3607_v59, %v3505_v14  ;;  %v4148_v48 = vpop.f32.mrb[31].mxu1 }
 0x63c   : > { %v3619_v11 = vadd.f32 %v3895_v54, %v3611_v46 }
 0x63e   : > { %v3620_v15 = vmax.f32 %v3619_v11, 0.0 }
 0x640   : > { %v3622_v50 = vcombine.high %v3620_v15, %v3620_v15  ;;  %v3629_v55 = vrot.slane %v3620_v15, %v5559_v10 }
 0x642   : > { %v3896_v37 = vrot.slane %v3629_v55, 9  ;;  %v3637_v52 = vcombine.high %v3629_v55, %v3629_v55  ;;  %v3636_v25 = vrot.slane %v3622_v50, %v5559_v10 }
 0x644   : > { %v3650_v27 = vmax.f32 %v3629_v55, %v3896_v37  ;;  %v3897_v61 = vrot.slane %v3637_v52, 9  ;;  %v3898_v38 = vrot.slane %v3636_v25, 9 }
 0x646   : > { %3656 = vrot.lane.b32.xlu0 %v3650_v27, %s4977_s29  ;;  %v3651_v13 = vmax.f32 %v3637_v52, %v3897_v61  ;;  %v3652_v43 = vmax.f32 %v3636_v25, %v3898_v38 }
 0x648   : > { %3658 = vrot.lane.b32.xlu1 %v3651_v13, %s4977_s29 }
 0x64a   : > { %3660 = vrot.lane.b32.xlu0 %v3652_v43, %s4977_s29 }
 0x6b8   : > { %v3657_v28 = vpop.permute.xlu0 %3656 }
 0x6b9   : > { %v3665_v58 = vmax.f32 %v3650_v27, %v3657_v28 }
 0x6ba   : > { %v3659_v10 = vpop.permute.xlu1 %3658 }
 0x6bb   : > { %3669 = vst.msk [vmem:[%s409_s16] sm:$0x1] %vm3668_vm13, %v3665_v58  ;;  %v3666_v49 = vmax.f32 %v3651_v13, %v3659_v10 }
 0x6bc   : > { %v3661_v26 = vpop.permute.xlu0 %3660 }
 0x6bd   : > { %3670 = vst.msk [vmem:[%s409_s16 + $0x1] sm:$0x1] %vm3668_vm13, %v3666_v49  ;;  %v3667_v16 = vmax.f32 %v3652_v43, %v3661_v26 }
 0x6bf   : > { %3671 = vst.msk [vmem:[%s409_s16 + $0x2] sm:$0x1] %vm3668_vm13, %v3667_v16 }
 0x6c0   : > { %4898 = shalt.err (!%p4895_p13)
}
 0x6c1   : > { %s4899_s25 = scalar_lea.hbm %s6196_s15, 48  ;;  %s4903_s22 = scalar_lea.hbm %s6249_s9, 96 }
 0x6c2   : > { %p4900_p9 = scmp.ne.s32.totalorder %s6196_s15, %s4899_s25  ;;  %p4904_p4 = scmp.lt.u32.totalorder %s6196_s15, %s6249_s9 }
 0x6c3   : > { %p4905_p8 = scmp.lt.u32.totalorder %s4903_s22, %s4899_s25  ;;  %p4907_p3 = scmp.lt.u32.totalorder %s4899_s25, %s6196_s15 }
 0x6c4   : > { %p4901_p0 = pnand %p4900_p9, %p5193_p10 }
 0x6c5   : > { %p4906_p6 = por %p4905_p8, %p4904_p4 }
 0x6c6   : > { %p4902_p11 = pneg %p4901_p0 }
 0x6c7   : > { %p4908_p5 = por %p4907_p3, %p4906_p6 }
 0x6c9   : > { %p4909_p7 = pnand %p4908_p5, %p4902_p11 }
 0x6cb   : > { %4912 = shalt.err (!%p4909_p7)
}
 0x6cc   : > { %s4979_s16 = smov 16   ;;  %s4980_s1 = smov 1  }
 0x6cd   : > { %4654 = dma.vmem_to_hbm [thread:$0]  (%p5193_p10), %s6191_s3, 48, %s6196_s15, %s3673_s17, %s4979_s16, %s4979_s16, %s4980_s1  }
 0x6ce PF: > { %s6403_s27 = sld [smem:[#allocation20_spill]]  ;;  %s6404_s19 = sld [smem:[#allocation21_spill]] }
 0x6cf   : > { %p6406_p2 = scmp.ge.s32.totalorder %s4959_s12, 2 }
 0x6d4   : > { %s3701_s21 = sand.u32 1, %s6403_s27   ;;  %p6405_p12 = scmp.ne.s32.totalorder %s6404_s19, 0 }
 0x6d5   : > { %s3702_s13 = scalar_lea.sflag [#allocation8], %s3701_s21 }
 0x6d6   : > { %p4674_p1 = pnand %p6406_p2, %p6405_p12 }
 0x6d8   : > { %4942 = dma.done.wait (!%p4674_p1), %s3702_s13, 48  }
 0x6d9   : > { %4944 = vsyncadd (!%p4674_p1), %s3702_s13, 4294967248  ;;  %p24_p13 = scmp.ge.s32.totalorder %s5183_s28, 4   ;;  %s6407_s30 = smov %s4951_s10 }
 0x6da   : > { %s6408_s10 = smov %s4955_s11  ;;  %s6409_s11 = smov %s5199_s26 }
 0x6db   : > { %s6410_s12 = smov %s5183_s28  ;;  %26 = sbr.rel (!%p24_p13) target bundleno = 11 (0xb), region = 130 }
 0x6e2   :  { %3707 = vsyncpa [#allocation7], 1 }
 0x6e3   :  { %3709 = vsyncpa [#allocation7 + $0x1], 1 }
 0x6e4   :  { %3710 = vsyncpa [#allocation10], 1 }
 0x6e5   :  { %3711 = vsyncpa [#allocation13], 1 }
 0x6e6   :  { %3712 = vsyncpa [#allocation8], 1 }
 0x6e7   :  { %3714 = vsyncpa [#allocation8 + $0x1], 1 }

</bundles_post_ra>
